<compile_context>
chip_gen: v6e
topology: v6e:2x2x1
jax: 0.10.0
libtpu: 0.0.40
codegen_flags: <defaults>
</compile_context>

<pallas_src>
import functools

import numpy as np
import jax
import jax.numpy as jnp
from jax.experimental import pallas as pl
from jax.experimental.pallas import tpu as pltpu

LANE = 128
SUB = 8


def _round_up(x, m):
    return (x + m - 1) // m * m


def _pick_tile_rows(H, max_rows=32):
    if H <= max_rows:
        return H
    for th in range(max_rows, 0, -1):
        if H % th == 0:
            return th
    return H


# ---------------------------------------------------------------------------
# Fused kernel: one (batch, row-tile) step of  out = x + conv2(relu(conv1(x)))
# ---------------------------------------------------------------------------
def _br_kernel(x_ref, w1_ref, b1_ref, w2_ref, b2_ref, m_ref, o_ref, *,
               TH, W, Wh, Wc2, Cp, packed, mxu_dtype):
    """Refs:
      x_ref : (1, H+4, Wp, Cp)  spatially padded f32 input, whole image resident
                                (upper channel lanes carry the col+1 copy when packed)
      w1/w2 : (S, 3, Cp, Cp)    per-stream / per-kh weight matrices (mxu_dtype)
      b1/b2 : (1, Cp)           f32 biases
      m_ref : (Wh, Cp)          f32 column mask for conv2's zero padding
      o_ref : (1, TH, W, Cp)    output row tile (f32)
    """
    i = pl.program_id(1)
    r0 = pl.multiple_of(i * TH, TH)

    # (TH+4, Wp, Cp) window with 2-row halo (conv-of-conv needs 2). Stays f32.
    xt = x_ref[:, pl.ds(r0, TH + 4), :, :][0]

    # ---- conv1 (+bias, ReLU) over the haloed (TH+2, Wh) window --------------
    shifts1 = (0, 2) if packed else (0, 1, 2)
    R1 = (TH + 2) * Wh
    acc1 = jnp.zeros((R1, Cp), jnp.float32)
    for s, sh in enumerate(shifts1):
        xs = xt[:, sh:sh + Wh, :].astype(mxu_dtype)       # hoisted column shift
        for kh in range(3):                               # leading-dim slice: free
            a = xs[kh:kh + TH + 2].reshape(R1, Cp)        # Wh % 8 == 0 -> free
            acc1 = acc1 + jnp.dot(a, w1_ref[s, kh, :, :],
                                  preferred_element_type=jnp.float32)

    h3 = jnp.maximum(acc1 + b1_ref[...], 0.0).reshape(TH + 2, Wh, Cp)

    # conv2's zero padding: out-of-image columns via the tiny precomputed mask,
    # halo rows only on the first / last row tile (scalar-gated multiplies).
    h3 = h3 * m_ref[...]
    keep_top = (i != 0).astype(jnp.float32)
    keep_bot = (i != pl.num_programs(1) - 1).astype(jnp.float32)
    h3 = jnp.concatenate([h3[0:1] * keep_top,
                          h3[1:TH + 1],
                          h3[TH + 1:TH + 2] * keep_bot], axis=0)

    # ---- conv2 (+bias) + residual -------------------------------------------
    R2 = TH * Wc2
    acc2 = jnp.zeros((R2, Cp), jnp.float32)
    if packed:
        # Pack column c (lower lanes) with column c+1 (upper lanes): h3's upper
        # channel lanes are zero, so a single half-lane roll does the packing.
        up = pltpu.roll(h3[:, 1:1 + Wc2, :], Cp // 2, 2)
        h3p = (h3[:, :Wc2, :] + up).astype(mxu_dtype)
        h3c = h3.astype(mxu_dtype)
        streams2 = ((h3p, 0), (h3c, 2))
    else:
        h3c = h3.astype(mxu_dtype)
        streams2 = ((h3c, 0), (h3c, 1), (h3c, 2))

    for s, (src, sh) in enumerate(streams2):
        hs = src[:, sh:sh + Wc2, :]
        for kh in range(3):
            a = hs[kh:kh + TH].reshape(R2, Cp)
            acc2 = acc2 + jnp.dot(a, w2_ref[s, kh, :, :],
                                  preferred_element_type=jnp.float32)

    x_center = xt[2:2 + TH, 2:2 + W, :]                   # exact f32 residual
    out = acc2.reshape(TH, Wc2, Cp)[:, :W, :] + b2_ref[...] + x_center
    o_ref[...] = out[None].astype(o_ref.dtype)


# ---------------------------------------------------------------------------
# Wrapper: NCHW in / NCHW out
# ---------------------------------------------------------------------------
def br_forward(x_nchw, w1_oihw, b1, w2_oihw, b2, *, mxu_dtype=jnp.bfloat16):
    N, C, H, W = x_nchw.shape
    Cp = _round_up(C, LANE)
    Chalf = Cp // 2
    packed = C <= Chalf                       # 2 taps share the 128 K lanes

    Wc2 = _round_up(W, SUB)                   # conv2 compute width
    Wh = _round_up(Wc2 + 2, SUB)              # conv1 output / h width
    Wp = _round_up(Wh + 2, SUB)               # padded input width
    TH = _pick_tile_rows(H)
    n_tiles = H // TH

    # NCHW -> NHWC f32; rows padded by 2, columns padded by 2 + alignment.
    x = jnp.transpose(x_nchw, (0, 2, 3, 1)).astype(jnp.float32)
    xsp = jnp.pad(x, ((0, 0), (2, 2), (2, Wp - W - 2), (0, 0)))
    xq = jnp.pad(xsp, ((0, 0), (0, 0), (0, 0), (0, Cp - C)))
    if packed:
        # Upper channel lanes carry the column+1 shifted copy (K-dim tap pack).
        xs1 = jnp.pad(xsp[:, :, 1:, :], ((0, 0), (0, 0), (0, 1), (0, 0)))
        xq = xq + jnp.pad(xs1, ((0, 0), (0, 0), (0, 0),
                                (Chalf, Cp - Chalf - C)))

    def hwio(w):                              # OIHW -> HWIO
        return jnp.transpose(w, (2, 3, 1, 0)).astype(jnp.float32)

    def make_wmats(wh):                       # wh: (3, 3, C, C) HWIO
        if packed:
            a = jnp.zeros((3, Cp, Cp), jnp.float32)
            a = a.at[:, :C, :C].set(wh[:, 0])
            a = a.at[:, Chalf:Chalf + C, :C].set(wh[:, 1])
            b = jnp.zeros((3, Cp, Cp), jnp.float32)
            b = b.at[:, :C, :C].set(wh[:, 2])
            m = jnp.stack([a, b], axis=0)                 # (2, 3, Cp, Cp)
        else:
            m = jnp.zeros((3, 3, Cp, Cp), jnp.float32)
            m = m.at[:, :, :C, :C].set(wh)
            m = jnp.transpose(m, (1, 0, 2, 3))            # (kw, kh, Cp, Cp)
        return m.astype(mxu_dtype)

    w1m = make_wmats(hwio(w1_oihw))
    w2m = make_wmats(hwio(w2_oihw))
    S = int(w1m.shape[0])

    b1p = jnp.pad(b1.astype(jnp.float32), (0, Cp - C)).reshape(1, Cp)
    b2p = jnp.pad(b2.astype(jnp.float32), (0, Cp - C)).reshape(1, Cp)

    # Column mask on the h buffer: buffer col c <-> original col c-1.
    col = np.arange(Wh)
    cmask_np = ((col >= 1) & (col <= W)).astype(np.float32)
    cmask = jnp.asarray(np.repeat(cmask_np[:, None], Cp, axis=1))

    kernel = functools.partial(_br_kernel, TH=TH, W=W, Wh=Wh, Wc2=Wc2,
                               Cp=Cp, packed=packed, mxu_dtype=mxu_dtype)

    # VMEM budget: ~3/4 of the chip's VMEM (128 MiB v5e/v6e, 64 MiB v7x), capped.
    try:
        cap = int(pltpu.get_tpu_info().vmem_capacity_bytes)
    except Exception:
        cap = 64 * 1024 * 1024
    vmem_limit = max(32 * 1024 * 1024, min(cap * 3 // 4, 100 * 1024 * 1024))

    R1 = (TH + 2) * Wh
    R2 = TH * Wc2
    flops = int(2 * Cp * Cp * 3 * S * (R1 + R2)) * N * n_tiles
    wbytes = jnp.dtype(mxu_dtype).itemsize
    bytes_accessed = int(xq.size * 4 + (w1m.size + w2m.size) * wbytes
                         + (b1p.size + b2p.size + cmask.size) * 4
                         + N * H * W * Cp * 4)

    out = pl.pallas_call(
        kernel,
        out_shape=jax.ShapeDtypeStruct((N, H, W, Cp), jnp.float32),
        grid=(N, n_tiles),
        in_specs=[
            # whole padded image: constant across row tiles -> DMA'd once per n
            pl.BlockSpec((1, H + 4, Wp, Cp), lambda n, i: (n, 0, 0, 0)),
            pl.BlockSpec((S, 3, Cp, Cp), lambda n, i: (0, 0, 0, 0)),
            pl.BlockSpec((1, Cp), lambda n, i: (0, 0)),
            pl.BlockSpec((S, 3, Cp, Cp), lambda n, i: (0, 0, 0, 0)),
            pl.BlockSpec((1, Cp), lambda n, i: (0, 0)),
            pl.BlockSpec((Wh, Cp), lambda n, i: (0, 0)),
        ],
        out_specs=pl.BlockSpec((1, TH, W, Cp), lambda n, i: (n, i, 0, 0)),
        compiler_params=pltpu.CompilerParams(
            dimension_semantics=("parallel", "arbitrary"),
            vmem_limit_bytes=vmem_limit),
        cost_estimate=pl.CostEstimate(flops=flops, transcendentals=0,
                                      bytes_accessed=bytes_accessed),
    )(xq, w1m, b1p, w2m, b2p, cmask)

    out = out[..., :C]                        # drop channel padding / packing lanes
    return jnp.transpose(out, (0, 3, 1, 2))   # back to NCHW


# ---------------------------------------------------------------------------
# Pure-JAX reference (matches the PyTorch BR module)
# ---------------------------------------------------------------------------
def _conv3x3_same(x_nhwc, w_hwio):
    return jax.lax.conv_general_dilated(
        x_nhwc, w_hwio, window_strides=(1, 1), padding=[(1, 1), (1, 1)],
        dimension_numbers=("NHWC", "HWIO", "NHWC"),
        precision=jax.lax.Precision.HIGHEST)


def br_reference(x_nchw, w1_oihw, b1, w2_oihw, b2):
    x = jnp.transpose(x_nchw, (0, 2, 3, 1)).astype(jnp.float32)
    w1 = jnp.transpose(w1_oihw, (2, 3, 1, 0))
    w2 = jnp.transpose(w2_oihw, (2, 3, 1, 0))
    y = jnp.maximum(_conv3x3_same(x, w1) + b1, 0.0)
    y = _conv3x3_same(y, w2) + b2
    return jnp.transpose(x + y, (0, 3, 1, 2))


# ---------------------------------------------------------------------------
if __name__ == "__main__":
    N, C, H, W = 2, 64, 16, 16                 # small, module-consistent shapes

    key = jax.random.PRNGKey(0)
    kx, k1, k2, k3, k4 = jax.random.split(key, 5)
    x = jax.random.normal(kx, (N, C, H, W), jnp.float32)

    bound = 1.0 / np.sqrt(C * 3 * 3)           # PyTorch Conv2d default init
    w1 = jax.random.uniform(k1, (C, C, 3, 3), jnp.float32, -bound, bound)
    b1 = jax.random.uniform(k2, (C,), jnp.float32, -bound, bound)
    w2 = jax.random.uniform(k3, (C, C, 3, 3), jnp.float32, -bound, bound)
    b2 = jax.random.uniform(k4, (C,), jnp.float32, -bound, bound)

    ref = br_reference(x, w1, b1, w2, b2)

    # f32-operand path: tight check of the indexing / tap-packing logic.
    out_f32 = jax.block_until_ready(
        br_forward(x, w1, b1, w2, b2, mxu_dtype=jnp.float32))
    assert out_f32.shape == (N, C, H, W), out_f32.shape
    np.testing.assert_allclose(np.asarray(out_f32), np.asarray(ref),
                               atol=2e-3, rtol=2e-3)

    # Default bf16-operand MXU path (f32 accumulation, exact f32 residual).
    out_bf16 = jax.block_until_ready(br_forward(x, w1, b1, w2, b2))
    assert out_bf16.shape == (N, C, H, W), out_bf16.shape
    np.testing.assert_allclose(np.asarray(out_bf16), np.asarray(ref),
                               atol=3e-2, rtol=3e-2)

    print("KERNEL_OK")
</pallas_src>

<mosaic_0001>
module attributes {stable_mosaic.version = 11 : i64} {
  func.func @_br_kernel(%arg0: i32, %arg1: i32, %arg2: memref<1x20x32x128xf32, #tpu.memory_space<vmem>>, %arg3: memref<2x3x128x128xf32, #tpu.memory_space<vmem>>, %arg4: memref<1x128xf32, #tpu.memory_space<vmem>>, %arg5: memref<2x3x128x128xf32, #tpu.memory_space<vmem>>, %arg6: memref<1x128xf32, #tpu.memory_space<vmem>>, %arg7: memref<24x128xf32, #tpu.memory_space<vmem>>, %arg8: memref<1x16x16x128xf32, #tpu.memory_space<vmem>>) attributes {dimension_semantics = [#tpu.dimension_semantics<parallel>, #tpu.dimension_semantics<arbitrary>], iteration_bounds = array<i64: 2, 1>, scalar_prefetch = 0 : i64, scratch_operands = 0 : i64, tpu.core_type = #tpu.core_type<tc>, window_params = [{transform_indices = @transform_0, window_bounds = array<i64: 1, 20, 32, 128>}, {pipeline_mode = #tpu.pipeline_mode<synchronous>, transform_indices = @transform_1, window_bounds = array<i64: 2, 3, 128, 128>}, {pipeline_mode = #tpu.pipeline_mode<synchronous>, transform_indices = @transform_2, window_bounds = array<i64: 1, 128>}, {pipeline_mode = #tpu.pipeline_mode<synchronous>, transform_indices = @transform_3, window_bounds = array<i64: 2, 3, 128, 128>}, {pipeline_mode = #tpu.pipeline_mode<synchronous>, transform_indices = @transform_4, window_bounds = array<i64: 1, 128>}, {pipeline_mode = #tpu.pipeline_mode<synchronous>, transform_indices = @transform_5, window_bounds = array<i64: 24, 128>}, {transform_indices = @transform_6, window_bounds = array<i64: 1, 16, 16, 128>}]} {
    %c16_i32 = arith.constant 16 : i32
    %0 = arith.muli %arg1, %c16_i32 : i32
    %1 = tpu.assume_multiple %0, 16 : i32
    %c0 = arith.constant 0 : index
    %2 = arith.index_cast %1 : i32 to index
    %c0_0 = arith.constant 0 : index
    %c0_1 = arith.constant 0 : index
    %3 = vector.load %arg2[%c0, %2, %c0_0, %c0_1] : memref<1x20x32x128xf32, #tpu.memory_space<vmem>>, vector<1x20x32x128xf32>
    %4 = vector.shape_cast %3 : vector<1x20x32x128xf32> to vector<20x32x128xf32>
    %cst = arith.constant 0.000000e+00 : f32
    %5 = vector.broadcast %cst : f32 to vector<432x128xf32>
    %6 = vector.extract_strided_slice %4 {offsets = [0, 0, 0], sizes = [20, 24, 128], strides = [1, 1, 1]} : vector<20x32x128xf32> to vector<20x24x128xf32>
    %7 = vector.extract_strided_slice %6 {offsets = [0, 0, 0], sizes = [18, 24, 128], strides = [1, 1, 1]} : vector<20x24x128xf32> to vector<18x24x128xf32>
    %8 = vector.shape_cast %7 : vector<18x24x128xf32> to vector<432x128xf32>
    %c0_2 = arith.constant 0 : index
    %c0_3 = arith.constant 0 : index
    %c0_4 = arith.constant 0 : index
    %c0_5 = arith.constant 0 : index
    %9 = vector.load %arg3[%c0_2, %c0_3, %c0_4, %c0_5] : memref<2x3x128x128xf32, #tpu.memory_space<vmem>>, vector<1x1x128x128xf32>
    %10 = vector.shape_cast %9 : vector<1x1x128x128xf32> to vector<128x128xf32>
    %cst_6 = arith.constant dense<0.000000e+00> : vector<432x128xf32>
    %11 = tpu.matmul %8, %10, %cst_6 {dimension_numbers = #tpu.dot_dimension_numbers<[1], [0], [0], [1], [0, 0, 1, 1], [], []>} : vector<432x128xf32>, vector<128x128xf32>, vector<432x128xf32> -> vector<432x128xf32>
    %12 = arith.addf %5, %11 : vector<432x128xf32>
    %13 = vector.extract_strided_slice %6 {offsets = [1, 0, 0], sizes = [18, 24, 128], strides = [1, 1, 1]} : vector<20x24x128xf32> to vector<18x24x128xf32>
    %14 = vector.shape_cast %13 : vector<18x24x128xf32> to vector<432x128xf32>
    %c0_7 = arith.constant 0 : index
    %c1 = arith.constant 1 : index
    %c0_8 = arith.constant 0 : index
    %c0_9 = arith.constant 0 : index
    %15 = vector.load %arg3[%c0_7, %c1, %c0_8, %c0_9] : memref<2x3x128x128xf32, #tpu.memory_space<vmem>>, vector<1x1x128x128xf32>
    %16 = vector.shape_cast %15 : vector<1x1x128x128xf32> to vector<128x128xf32>
    %cst_10 = arith.constant dense<0.000000e+00> : vector<432x128xf32>
    %17 = tpu.matmul %14, %16, %cst_10 {dimension_numbers = #tpu.dot_dimension_numbers<[1], [0], [0], [1], [0, 0, 1, 1], [], []>} : vector<432x128xf32>, vector<128x128xf32>, vector<432x128xf32> -> vector<432x128xf32>
    %18 = arith.addf %12, %17 : vector<432x128xf32>
    %19 = vector.extract_strided_slice %6 {offsets = [2, 0, 0], sizes = [18, 24, 128], strides = [1, 1, 1]} : vector<20x24x128xf32> to vector<18x24x128xf32>
    %20 = vector.shape_cast %19 : vector<18x24x128xf32> to vector<432x128xf32>
    %c0_11 = arith.constant 0 : index
    %c2 = arith.constant 2 : index
    %c0_12 = arith.constant 0 : index
    %c0_13 = arith.constant 0 : index
    %21 = vector.load %arg3[%c0_11, %c2, %c0_12, %c0_13] : memref<2x3x128x128xf32, #tpu.memory_space<vmem>>, vector<1x1x128x128xf32>
    %22 = vector.shape_cast %21 : vector<1x1x128x128xf32> to vector<128x128xf32>
    %cst_14 = arith.constant dense<0.000000e+00> : vector<432x128xf32>
    %23 = tpu.matmul %20, %22, %cst_14 {dimension_numbers = #tpu.dot_dimension_numbers<[1], [0], [0], [1], [0, 0, 1, 1], [], []>} : vector<432x128xf32>, vector<128x128xf32>, vector<432x128xf32> -> vector<432x128xf32>
    %24 = arith.addf %18, %23 : vector<432x128xf32>
    %25 = vector.extract_strided_slice %4 {offsets = [0, 2, 0], sizes = [20, 24, 128], strides = [1, 1, 1]} : vector<20x32x128xf32> to vector<20x24x128xf32>
    %26 = vector.extract_strided_slice %25 {offsets = [0, 0, 0], sizes = [18, 24, 128], strides = [1, 1, 1]} : vector<20x24x128xf32> to vector<18x24x128xf32>
    %27 = vector.shape_cast %26 : vector<18x24x128xf32> to vector<432x128xf32>
    %c1_15 = arith.constant 1 : index
    %c0_16 = arith.constant 0 : index
    %c0_17 = arith.constant 0 : index
    %c0_18 = arith.constant 0 : index
    %28 = vector.load %arg3[%c1_15, %c0_16, %c0_17, %c0_18] : memref<2x3x128x128xf32, #tpu.memory_space<vmem>>, vector<1x1x128x128xf32>
    %29 = vector.shape_cast %28 : vector<1x1x128x128xf32> to vector<128x128xf32>
    %cst_19 = arith.constant dense<0.000000e+00> : vector<432x128xf32>
    %30 = tpu.matmul %27, %29, %cst_19 {dimension_numbers = #tpu.dot_dimension_numbers<[1], [0], [0], [1], [0, 0, 1, 1], [], []>} : vector<432x128xf32>, vector<128x128xf32>, vector<432x128xf32> -> vector<432x128xf32>
    %31 = arith.addf %24, %30 : vector<432x128xf32>
    %32 = vector.extract_strided_slice %25 {offsets = [1, 0, 0], sizes = [18, 24, 128], strides = [1, 1, 1]} : vector<20x24x128xf32> to vector<18x24x128xf32>
    %33 = vector.shape_cast %32 : vector<18x24x128xf32> to vector<432x128xf32>
    %c1_20 = arith.constant 1 : index
    %c1_21 = arith.constant 1 : index
    %c0_22 = arith.constant 0 : index
    %c0_23 = arith.constant 0 : index
    %34 = vector.load %arg3[%c1_20, %c1_21, %c0_22, %c0_23] : memref<2x3x128x128xf32, #tpu.memory_space<vmem>>, vector<1x1x128x128xf32>
    %35 = vector.shape_cast %34 : vector<1x1x128x128xf32> to vector<128x128xf32>
    %cst_24 = arith.constant dense<0.000000e+00> : vector<432x128xf32>
    %36 = tpu.matmul %33, %35, %cst_24 {dimension_numbers = #tpu.dot_dimension_numbers<[1], [0], [0], [1], [0, 0, 1, 1], [], []>} : vector<432x128xf32>, vector<128x128xf32>, vector<432x128xf32> -> vector<432x128xf32>
    %37 = arith.addf %31, %36 : vector<432x128xf32>
    %38 = vector.extract_strided_slice %25 {offsets = [2, 0, 0], sizes = [18, 24, 128], strides = [1, 1, 1]} : vector<20x24x128xf32> to vector<18x24x128xf32>
    %39 = vector.shape_cast %38 : vector<18x24x128xf32> to vector<432x128xf32>
    %c1_25 = arith.constant 1 : index
    %c2_26 = arith.constant 2 : index
    %c0_27 = arith.constant 0 : index
    %c0_28 = arith.constant 0 : index
    %40 = vector.load %arg3[%c1_25, %c2_26, %c0_27, %c0_28] : memref<2x3x128x128xf32, #tpu.memory_space<vmem>>, vector<1x1x128x128xf32>
    %41 = vector.shape_cast %40 : vector<1x1x128x128xf32> to vector<128x128xf32>
    %cst_29 = arith.constant dense<0.000000e+00> : vector<432x128xf32>
    %42 = tpu.matmul %39, %41, %cst_29 {dimension_numbers = #tpu.dot_dimension_numbers<[1], [0], [0], [1], [0, 0, 1, 1], [], []>} : vector<432x128xf32>, vector<128x128xf32>, vector<432x128xf32> -> vector<432x128xf32>
    %43 = arith.addf %37, %42 : vector<432x128xf32>
    %c0_30 = arith.constant 0 : index
    %c0_31 = arith.constant 0 : index
    %44 = vector.load %arg4[%c0_30, %c0_31] : memref<1x128xf32, #tpu.memory_space<vmem>>, vector<1x128xf32>
    %45 = vector.broadcast %44 : vector<1x128xf32> to vector<432x128xf32>
    %46 = arith.addf %43, %45 : vector<432x128xf32>
    %cst_32 = arith.constant 0.000000e+00 : f32
    %47 = vector.broadcast %cst_32 : f32 to vector<432x128xf32>
    %48 = arith.maximumf %46, %47 : vector<432x128xf32>
    %49 = vector.shape_cast %48 : vector<432x128xf32> to vector<18x24x128xf32>
    %c0_33 = arith.constant 0 : index
    %c0_34 = arith.constant 0 : index
    %50 = vector.load %arg7[%c0_33, %c0_34] : memref<24x128xf32, #tpu.memory_space<vmem>>, vector<24x128xf32>
    %51 = vector.shape_cast %50 : vector<24x128xf32> to vector<1x24x128xf32>
    %52 = vector.broadcast %51 : vector<1x24x128xf32> to vector<18x24x128xf32>
    %53 = arith.mulf %49, %52 : vector<18x24x128xf32>
    %c0_i32 = arith.constant 0 : i32
    %54 = arith.cmpi ne, %arg1, %c0_i32 : i32
    %55 = arith.extui %54 : i1 to i32
    %56 = arith.sitofp %55 : i32 to f32
    %c0_i32_35 = arith.constant 0 : i32
    %57 = arith.cmpi ne, %arg1, %c0_i32_35 : i32
    %58 = arith.extui %57 : i1 to i32
    %59 = arith.sitofp %58 : i32 to f32
    %60 = vector.extract_strided_slice %53 {offsets = [0, 0, 0], sizes = [1, 24, 128], strides = [1, 1, 1]} : vector<18x24x128xf32> to vector<1x24x128xf32>
    %61 = vector.broadcast %56 : f32 to vector<1x24x128xf32>
    %62 = arith.mulf %60, %61 : vector<1x24x128xf32>
    %63 = vector.extract_strided_slice %53 {offsets = [1, 0, 0], sizes = [16, 24, 128], strides = [1, 1, 1]} : vector<18x24x128xf32> to vector<16x24x128xf32>
    %64 = vector.extract_strided_slice %53 {offsets = [17, 0, 0], sizes = [1, 24, 128], strides = [1, 1, 1]} : vector<18x24x128xf32> to vector<1x24x128xf32>
    %65 = vector.broadcast %59 : f32 to vector<1x24x128xf32>
    %66 = arith.mulf %64, %65 : vector<1x24x128xf32>
    %67 = tpu.concatenate %62, %63, %66 in 0 : vector<1x24x128xf32>, vector<16x24x128xf32>, vector<1x24x128xf32> -> vector<18x24x128xf32>
    %cst_36 = arith.constant 0.000000e+00 : f32
    %68 = vector.broadcast %cst_36 : f32 to vector<256x128xf32>
    %69 = vector.extract_strided_slice %67 {offsets = [0, 1, 0], sizes = [18, 16, 128], strides = [1, 1, 1]} : vector<18x24x128xf32> to vector<18x16x128xf32>
    %c64_i32 = arith.constant 64 : i32
    %70 = tpu.dynamic_rotate %69 by %c64_i32 dim 2 : vector<18x16x128xf32>, i32 -> vector<18x16x128xf32>
    %71 = vector.extract_strided_slice %67 {offsets = [0, 0, 0], sizes = [18, 16, 128], strides = [1, 1, 1]} : vector<18x24x128xf32> to vector<18x16x128xf32>
    %72 = arith.addf %71, %70 : vector<18x16x128xf32>
    %73 = vector.extract_strided_slice %72 {offsets = [0, 0, 0], sizes = [16, 16, 128], strides = [1, 1, 1]} : vector<18x16x128xf32> to vector<16x16x128xf32>
    %74 = vector.shape_cast %73 : vector<16x16x128xf32> to vector<256x128xf32>
    %c0_37 = arith.constant 0 : index
    %c0_38 = arith.constant 0 : index
    %c0_39 = arith.constant 0 : index
    %c0_40 = arith.constant 0 : index
    %75 = vector.load %arg5[%c0_37, %c0_38, %c0_39, %c0_40] : memref<2x3x128x128xf32, #tpu.memory_space<vmem>>, vector<1x1x128x128xf32>
    %76 = vector.shape_cast %75 : vector<1x1x128x128xf32> to vector<128x128xf32>
    %cst_41 = arith.constant dense<0.000000e+00> : vector<256x128xf32>
    %77 = tpu.matmul %74, %76, %cst_41 {dimension_numbers = #tpu.dot_dimension_numbers<[1], [0], [0], [1], [0, 0, 1, 1], [], []>} : vector<256x128xf32>, vector<128x128xf32>, vector<256x128xf32> -> vector<256x128xf32>
    %78 = arith.addf %68, %77 : vector<256x128xf32>
    %79 = vector.extract_strided_slice %72 {offsets = [1, 0, 0], sizes = [16, 16, 128], strides = [1, 1, 1]} : vector<18x16x128xf32> to vector<16x16x128xf32>
    %80 = vector.shape_cast %79 : vector<16x16x128xf32> to vector<256x128xf32>
    %c0_42 = arith.constant 0 : index
    %c1_43 = arith.constant 1 : index
    %c0_44 = arith.constant 0 : index
    %c0_45 = arith.constant 0 : index
    %81 = vector.load %arg5[%c0_42, %c1_43, %c0_44, %c0_45] : memref<2x3x128x128xf32, #tpu.memory_space<vmem>>, vector<1x1x128x128xf32>
    %82 = vector.shape_cast %81 : vector<1x1x128x128xf32> to vector<128x128xf32>
    %cst_46 = arith.constant dense<0.000000e+00> : vector<256x128xf32>
    %83 = tpu.matmul %80, %82, %cst_46 {dimension_numbers = #tpu.dot_dimension_numbers<[1], [0], [0], [1], [0, 0, 1, 1], [], []>} : vector<256x128xf32>, vector<128x128xf32>, vector<256x128xf32> -> vector<256x128xf32>
    %84 = arith.addf %78, %83 : vector<256x128xf32>
    %85 = vector.extract_strided_slice %72 {offsets = [2, 0, 0], sizes = [16, 16, 128], strides = [1, 1, 1]} : vector<18x16x128xf32> to vector<16x16x128xf32>
    %86 = vector.shape_cast %85 : vector<16x16x128xf32> to vector<256x128xf32>
    %c0_47 = arith.constant 0 : index
    %c2_48 = arith.constant 2 : index
    %c0_49 = arith.constant 0 : index
    %c0_50 = arith.constant 0 : index
    %87 = vector.load %arg5[%c0_47, %c2_48, %c0_49, %c0_50] : memref<2x3x128x128xf32, #tpu.memory_space<vmem>>, vector<1x1x128x128xf32>
    %88 = vector.shape_cast %87 : vector<1x1x128x128xf32> to vector<128x128xf32>
    %cst_51 = arith.constant dense<0.000000e+00> : vector<256x128xf32>
    %89 = tpu.matmul %86, %88, %cst_51 {dimension_numbers = #tpu.dot_dimension_numbers<[1], [0], [0], [1], [0, 0, 1, 1], [], []>} : vector<256x128xf32>, vector<128x128xf32>, vector<256x128xf32> -> vector<256x128xf32>
    %90 = arith.addf %84, %89 : vector<256x128xf32>
    %91 = vector.extract_strided_slice %67 {offsets = [0, 2, 0], sizes = [18, 16, 128], strides = [1, 1, 1]} : vector<18x24x128xf32> to vector<18x16x128xf32>
    %92 = vector.extract_strided_slice %91 {offsets = [0, 0, 0], sizes = [16, 16, 128], strides = [1, 1, 1]} : vector<18x16x128xf32> to vector<16x16x128xf32>
    %93 = vector.shape_cast %92 : vector<16x16x128xf32> to vector<256x128xf32>
    %c1_52 = arith.constant 1 : index
    %c0_53 = arith.constant 0 : index
    %c0_54 = arith.constant 0 : index
    %c0_55 = arith.constant 0 : index
    %94 = vector.load %arg5[%c1_52, %c0_53, %c0_54, %c0_55] : memref<2x3x128x128xf32, #tpu.memory_space<vmem>>, vector<1x1x128x128xf32>
    %95 = vector.shape_cast %94 : vector<1x1x128x128xf32> to vector<128x128xf32>
    %cst_56 = arith.constant dense<0.000000e+00> : vector<256x128xf32>
    %96 = tpu.matmul %93, %95, %cst_56 {dimension_numbers = #tpu.dot_dimension_numbers<[1], [0], [0], [1], [0, 0, 1, 1], [], []>} : vector<256x128xf32>, vector<128x128xf32>, vector<256x128xf32> -> vector<256x128xf32>
    %97 = arith.addf %90, %96 : vector<256x128xf32>
    %98 = vector.extract_strided_slice %91 {offsets = [1, 0, 0], sizes = [16, 16, 128], strides = [1, 1, 1]} : vector<18x16x128xf32> to vector<16x16x128xf32>
    %99 = vector.shape_cast %98 : vector<16x16x128xf32> to vector<256x128xf32>
    %c1_57 = arith.constant 1 : index
    %c1_58 = arith.constant 1 : index
    %c0_59 = arith.constant 0 : index
    %c0_60 = arith.constant 0 : index
    %100 = vector.load %arg5[%c1_57, %c1_58, %c0_59, %c0_60] : memref<2x3x128x128xf32, #tpu.memory_space<vmem>>, vector<1x1x128x128xf32>
    %101 = vector.shape_cast %100 : vector<1x1x128x128xf32> to vector<128x128xf32>
    %cst_61 = arith.constant dense<0.000000e+00> : vector<256x128xf32>
    %102 = tpu.matmul %99, %101, %cst_61 {dimension_numbers = #tpu.dot_dimension_numbers<[1], [0], [0], [1], [0, 0, 1, 1], [], []>} : vector<256x128xf32>, vector<128x128xf32>, vector<256x128xf32> -> vector<256x128xf32>
    %103 = arith.addf %97, %102 : vector<256x128xf32>
    %104 = vector.extract_strided_slice %91 {offsets = [2, 0, 0], sizes = [16, 16, 128], strides = [1, 1, 1]} : vector<18x16x128xf32> to vector<16x16x128xf32>
    %105 = vector.shape_cast %104 : vector<16x16x128xf32> to vector<256x128xf32>
    %c1_62 = arith.constant 1 : index
    %c2_63 = arith.constant 2 : index
    %c0_64 = arith.constant 0 : index
    %c0_65 = arith.constant 0 : index
    %106 = vector.load %arg5[%c1_62, %c2_63, %c0_64, %c0_65] : memref<2x3x128x128xf32, #tpu.memory_space<vmem>>, vector<1x1x128x128xf32>
    %107 = vector.shape_cast %106 : vector<1x1x128x128xf32> to vector<128x128xf32>
    %cst_66 = arith.constant dense<0.000000e+00> : vector<256x128xf32>
    %108 = tpu.matmul %105, %107, %cst_66 {dimension_numbers = #tpu.dot_dimension_numbers<[1], [0], [0], [1], [0, 0, 1, 1], [], []>} : vector<256x128xf32>, vector<128x128xf32>, vector<256x128xf32> -> vector<256x128xf32>
    %109 = arith.addf %103, %108 : vector<256x128xf32>
    %110 = vector.extract_strided_slice %4 {offsets = [2, 2, 0], sizes = [16, 16, 128], strides = [1, 1, 1]} : vector<20x32x128xf32> to vector<16x16x128xf32>
    %111 = vector.shape_cast %109 : vector<256x128xf32> to vector<16x16x128xf32>
    %c0_67 = arith.constant 0 : index
    %c0_68 = arith.constant 0 : index
    %112 = vector.load %arg6[%c0_67, %c0_68] : memref<1x128xf32, #tpu.memory_space<vmem>>, vector<1x128xf32>
    %113 = vector.shape_cast %112 : vector<1x128xf32> to vector<1x1x128xf32>
    %114 = vector.broadcast %113 : vector<1x1x128xf32> to vector<16x16x128xf32>
    %115 = arith.addf %111, %114 : vector<16x16x128xf32>
    %116 = arith.addf %115, %110 : vector<16x16x128xf32>
    %117 = vector.shape_cast %116 : vector<16x16x128xf32> to vector<1x16x16x128xf32>
    %c0_69 = arith.constant 0 : index
    %c0_70 = arith.constant 0 : index
    %c0_71 = arith.constant 0 : index
    %c0_72 = arith.constant 0 : index
    %118 = vector.load %arg8[%c0_69, %c0_70, %c0_71, %c0_72] : memref<1x16x16x128xf32, #tpu.memory_space<vmem>>, vector<1x16x16x128xf32>
    tpu.vector_store %arg8[%c0_69, %c0_70, %c0_71, %c0_72], %117 {strides = array<i32>} : memref<1x16x16x128xf32, #tpu.memory_space<vmem>>, vector<1x16x16x128xf32>,
    return
  }
  func.func @transform_0(%arg0: i32, %arg1: i32) -> (i32, i32, i32, i32) {
    %c0_i32 = arith.constant 0 : i32
    %c0_i32_0 = arith.constant 0 : i32
    %c0_i32_1 = arith.constant 0 : i32
    %c0_i32_2 = arith.constant 0 : i32
    return %arg0, %c0_i32, %c0_i32_0, %c0_i32_1 : i32, i32, i32, i32
  }
  func.func @transform_1(%arg0: i32, %arg1: i32) -> (i32, i32, i32, i32) {
    %c0_i32 = arith.constant 0 : i32
    %c0_i32_0 = arith.constant 0 : i32
    %c0_i32_1 = arith.constant 0 : i32
    %c0_i32_2 = arith.constant 0 : i32
    %c0_i32_3 = arith.constant 0 : i32
    return %c0_i32, %c0_i32_0, %c0_i32_1, %c0_i32_2 : i32, i32, i32, i32
  }
  func.func @transform_2(%arg0: i32, %arg1: i32) -> (i32, i32) {
    %c0_i32 = arith.constant 0 : i32
    %c0_i32_0 = arith.constant 0 : i32
    %c0_i32_1 = arith.constant 0 : i32
    return %c0_i32, %c0_i32_0 : i32, i32
  }
  func.func @transform_3(%arg0: i32, %arg1: i32) -> (i32, i32, i32, i32) {
    %c0_i32 = arith.constant 0 : i32
    %c0_i32_0 = arith.constant 0 : i32
    %c0_i32_1 = arith.constant 0 : i32
    %c0_i32_2 = arith.constant 0 : i32
    %c0_i32_3 = arith.constant 0 : i32
    return %c0_i32, %c0_i32_0, %c0_i32_1, %c0_i32_2 : i32, i32, i32, i32
  }
  func.func @transform_4(%arg0: i32, %arg1: i32) -> (i32, i32) {
    %c0_i32 = arith.constant 0 : i32
    %c0_i32_0 = arith.constant 0 : i32
    %c0_i32_1 = arith.constant 0 : i32
    return %c0_i32, %c0_i32_0 : i32, i32
  }
  func.func @transform_5(%arg0: i32, %arg1: i32) -> (i32, i32) {
    %c0_i32 = arith.constant 0 : i32
    %c0_i32_0 = arith.constant 0 : i32
    %c0_i32_1 = arith.constant 0 : i32
    return %c0_i32, %c0_i32_0 : i32, i32
  }
  func.func @transform_6(%arg0: i32, %arg1: i32) -> (i32, i32, i32, i32) {
    %c0_i32 = arith.constant 0 : i32
    %c0_i32_0 = arith.constant 0 : i32
    %c0_i32_1 = arith.constant 0 : i32
    return %arg0, %arg1, %c0_i32, %c0_i32_0 : i32, i32, i32, i32
  }
}

</mosaic_0001>

<bundles_post_ra>
// kernel: tpu_custom_call.1
= control target key start
LH: loop header
LB: loop body
LE: loop exit
PB: predicated region body
PF: predicated region fallthrough
CT: control target
= control target key end

     0   :  { %s10219_s0 = inlined_call_operand.hbm [shape: f32[2,20,32,128], index: 0, kind: input, shape index: {}]   ;;  %s10220_s1 = inlined_call_operand.hbm [shape: f32[2,3,128,128], index: 1, kind: input, shape index: {}]   ;;  %s10221_s2 = inlined_call_operand.vmem [shape: f32[1,128], index: 2, kind: input, shape index: {}]   ;;  %s10222_s3 = inlined_call_operand.hbm [shape: f32[2,3,128,128], index: 3, kind: input, shape index: {}]   ;;  %s10223_s4 = inlined_call_operand.vmem [shape: f32[1,128], index: 4, kind: input, shape index: {}]   ;;  %s10224_s5 = inlined_call_operand.hbm [shape: f32[24,128], index: 5, kind: input, shape index: {}]   ;;  %s10225_s6 = inlined_call_operand.hbm [shape: f32[2,16,16,128], index: 6, kind: output, shape index: {}]  }
   0x1   :  { %10298 = sst [smem:[#allocation111_spill]] %s10220_s1 }
   0x2   :  { %10299 = sst [smem:[#allocation112_spill]] %s10222_s3 }
   0x3   :  { %10300 = sst [smem:[#allocation113_spill]] %s10224_s5 }
   0x4   :  { %11 = vsyncpa [#allocation3], 0 }
   0x5   :  { %13 = vsyncpa [#allocation3 + $0x1], 0 }
   0x6   :  { %14 = vsyncpa [#allocation6], 0 }
   0x7   :  { %15 = vsyncpa [#allocation9], 0 }
   0x8   :  { %16 = vsyncpa [#allocation4], 0 }
   0x9   :  { %18 = vsyncpa [#allocation4 + $0x1], 0  ;;  %s7667_s21 = smov 0   ;;  %s7669_s22 = smov 0  }
   0xa   :  { %s7671_s23 = smov 0   ;;  %s7673_s24 = smov 0  }
   0xb   :  { %s7675_s25 = smov 0   ;;  %s7677_s26 = smov 0  }
   0xc LB: > { %s5431_s27 = sadd.s32 4294967295, %s7620_s26   ;;  %s5432_s28 = sadd.s32 4294967294, %s7620_s26   ;;  %s7620_s26 = sphi %s7677_s26, %s24_s26   ;;  %s7616_s25 = sphi %s7675_s25, %s10685_s25   ;;  %s7612_s24 = sphi %s7673_s24, %s10684_s24   ;;  %s7608_s23 = sphi %s7671_s23, %s10683_s23   ;;  %s7604_s22 = sphi %s7669_s22, %s10682_s22   ;;  %s7600_s21 = sphi %s7667_s21, %s10681_s21  }
   0xd   : > { %p56_p0 = scmp.ne.s32.totalorder %s7604_s22, %s7600_s21  ;;  %p7701_p1 = scmp.eq.s32.totalorder %s5431_s27, 0 }
   0xe   : > { %p7705_p2 = scmp.eq.s32.totalorder %s5431_s27, 1  ;;  %p193_p3 = scmp.eq.s32.totalorder %s5432_s28, 1 }
   0xf   : > { %p7711_p4 = por %p7701_p1, %p56_p0  ;;  %p5433_p5 = scmp.ge.s32.totalorder %s7620_s26, 1 }
  0x10   : > { %p7716_p6 = por %p193_p3, %p56_p0  ;;  %p200_p7 = scmp.lt.s32.totalorder %s7620_s26, 3 }
  0x11   : > { %s7622_s10 = smov [#allocation5]   ;;  %s7623_s13 = smov [#allocation7]  }
  0x12   : > { %s10304_s8 = scalar_select %p7716_p6, 1, 0 }
  0x13   : > { %p7721_p8 = pnand %p5433_p5, %p200_p7  ;;  %s212_s11 = sshll.u32 %s7622_s10, 4  ;;  %s213_s11 = int_to_ptr.vmem [resolvable:$true] %s212_s11 }
  0x14   : > { %s228_s14 = sshll.u32 %s7623_s13, 4  ;;  %s7624_s15 = smov [#allocation8]   ;;  %s229_s14 = int_to_ptr.vmem [resolvable:$true] %s228_s14 }
  0x15   : > { %p7337_p9 = pneg %p7721_p8  ;;  %s244_s16 = sshll.u32 %s7624_s15, 4  ;;  %s245_s16 = int_to_ptr.vmem [resolvable:$true] %s244_s16 }
  0x16   : > { %s7437_s17 = scalar_lea.vmem %s213_s11, 12288  ;;  %p7445_p5 = scmp.lt.s32.totalorder %s213_s11, %s213_s11 }
  0x17   : > { %p7730_p11 = pnand %p7337_p9, %p7701_p1  ;;  %p7438_p13 = scmp.ne.s32.totalorder %s213_s11, %s7437_s17 }
  0x18   : > { %p7446_p7 = scmp.lt.s32.totalorder %s7437_s17, %s7437_s17 }
  0x19   : > { %p7428_p12 = pneg %p7730_p11 }
  0x1a   : > { %p7447_p9 = por %p7446_p7, %p7445_p5 }
  0x1b   : > { %p7440_p0 = pnand %p7438_p13, %p7428_p12 }
  0x1d   : > { %p7441_p3 = pneg %p7440_p0 }
  0x1f   : > { %p7448_p10 = pnand %p7447_p9, %p7441_p3 }
  0x21   : > { %7451 = shalt.err (!%p7448_p10)
}
  0x22   : > { %s10226_s18 = smov 128   ;;  %s10227_s19 = smov 8  }
  0x23   : > { %s10307_s1 = sld [smem:[#allocation111_spill]]  ;;  %s7463_s28 = scalar_lea.vmem %s229_s14, 12288 }
  0x24   : > { %p7464_p13 = scmp.ne.s32.totalorder %s229_s14, %s7463_s28  ;;  %p7471_p3 = scmp.lt.s32.totalorder %s229_s14, %s229_s14 }
  0x25   : > { %p7472_p10 = scmp.lt.s32.totalorder %s7463_s28, %s7463_s28 }
  0x26   : > { %p7466_p0 = pnand %p7464_p13, %p7428_p12 }
  0x27   : > { %p7473_p7 = por %p7472_p10, %p7471_p3 }
  0x28   : > { %p7467_p5 = pneg %p7466_p0 }
  0x29   : > { %7340 = dma.hbm_to_vmem [thread:$0]  (!%p7730_p11), %s10307_s1, 12288, %s213_s11, [#allocation6], %s10226_s18, %s10226_s18, %s10227_s19  }
  0x2a   : > { %p7474_p9 = pnand %p7473_p7, %p7467_p5 }
  0x2c   : > { %7477 = shalt.err (!%p7474_p9)
}
  0x2d   : > { %s10308_s3 = sld [smem:[#allocation112_spill]]  ;;  %s7489_s11 = scalar_lea.vmem %s245_s16, 384 }
  0x2e   : > { %p7490_p6 = scmp.ne.s32.totalorder %s245_s16, %s7489_s11  ;;  %p7497_p3 = scmp.lt.s32.totalorder %s245_s16, %s245_s16 }
  0x2f   : > { %p7498_p5 = scmp.lt.s32.totalorder %s7489_s11, %s7489_s11 }
  0x30   : > { %p7492_p13 = pnand %p7490_p6, %p7428_p12 }
  0x31   : > { %p7499_p10 = por %p7498_p5, %p7497_p3 }
  0x32   : > { %p7493_p0 = pneg %p7492_p13 }
  0x33   : > { %7343 = dma.hbm_to_vmem [thread:$0]  (!%p7730_p11), %s10308_s3, 12288, %s229_s14, [#allocation6], %s10226_s18, %s10226_s18, %s10227_s19  }
  0x34   : > { %p7500_p7 = pnand %p7499_p10, %p7493_p0 }
  0x36   : > { %7503 = shalt.err (!%p7500_p7)
}
  0x37   : > { %s10309_s5 = sld [smem:[#allocation113_spill]]  ;;  %s43_s14 = sadd.s32 1, %s7608_s23 }
  0x38   : > { %s36_s12 = sadd.s32 1, %s7616_s25  ;;  %p50_p6 = scmp.ne.s32.totalorder %s7608_s23, %s7604_s22 }
  0x39   : > { %p38_p12 = scmp.ge.s32.totalorder %s36_s12, 2  ;;  %p51_p9 = scmp.eq.s32.totalorder %s7620_s26, 0 }
  0x3a   : > { %p7776_p13 = por %p7705_p2, %p50_p6  ;;  %p7358_p0 = scmp.lt.s32.totalorder %s7620_s26, 2 }
  0x3b   : > { %s10687_s12 = smov (%p38_p12, %s36_s12), 0  ;;  %p52_p3 = por %p51_p9, %p50_p6 }
  0x3c   : > { %10311 = sst [smem:[#allocation15_spill]] %s10687_s12  ;;  %s258_s27 = sand.u32 1, %s7608_s23  }
  0x3d   : > { %7346 = dma.hbm_to_vmem [thread:$0]  (!%p7730_p11), %s10309_s5, 384, %s245_s16, [#allocation9], %s10226_s18, %s10226_s18, %s10227_s19  }
  0x3e   : > { %s40_s28 = ssub.s32 %s7616_s25, %s10687_s12  ;;  %s7318_s16 = smul.u32 640, %s258_s27 }
  0x3f   : > { %p41_p5 = scmp.eq.s32.totalorder %s40_s28, 0  ;;  %s7319_s10 = smul.u32 10240, %s7616_s25 }
  0x40   : > { %p7787_p11 = pnand %p7358_p0, %p52_p3  ;;  %s262_s18 = scalar_lea.vmem [#allocation2], %s7318_s16 }
  0x41   : > { %s7792_s30 = scalar_select %p41_p5, %s7608_s23, %s43_s14  }
  0x42   : > { %s268_s17 = scalar_lea.hbm %s10219_s0, %s7319_s10  ;;  %s269_s19 = sshll.u32 %s262_s18, 4  ;;  %s270_s19 = int_to_ptr.vmem [resolvable:$true] %s269_s19 }
  0x43   : > { %s259_s1 = scalar_lea.sflag [#allocation3], %s258_s27  ;;  %p7506_p2 = pneg %p7787_p11 }
  0x44   : > { %s7517_s28 = scalar_lea.vmem %s270_s19, 10240  ;;  %s7627_s3 = smov [#allocation2]  }
  0x45   : > { %p7518_p10 = scmp.ne.s32.totalorder %s270_s19, %s7517_s28  ;;  %s7522_s5 = sshll.u32 %s7627_s3, 4  ;;  %s7523_s5 = int_to_ptr.vmem [resolvable:$false] %s7522_s5 }
  0x46   : > { %s7524_s12 = scalar_lea.vmem %s7523_s5, 20480  ;;  %p7525_p12 = scmp.lt.s32.totalorder %s270_s19, %s7523_s5 }
  0x47   : > { %p7520_p7 = pnand %p7518_p10, %p7506_p2  ;;  %p7526_p9 = scmp.lt.s32.totalorder %s7524_s12, %s7517_s28 }
  0x49   : > { %p7521_p6 = pneg %p7520_p7  ;;  %p7527_p0 = por %p7526_p9, %p7525_p12 }
  0x4b   : > { %p7528_p3 = pnand %p7527_p0, %p7521_p6 }
  0x4d   : > { %7531 = shalt.err (!%p7528_p3)
}
  0x4e   : > { %s10313_s18 = smov 8   ;;  %s10314_s14 = smov 128  }
  0x4f   : > { %7350 = dma.hbm_to_vmem [thread:$0]  (!%p7787_p11), %s268_s17, 10240, %s270_s19, %s259_s1, %s10314_s14, %s10314_s14, %s10313_s18  }
  0x50   : > { %281 = sbr.rel (%p7721_p8) target bundleno = 1116 (0x45c), region = 44 }
  0x55   : > { %s7807_s27 = sand.u32 1, %s7604_s22  }
  0x56   : > { %s7320_s3 = smul.u32 640, %s7807_s27  ;;  %s284_s5 = scalar_lea.sflag [#allocation3], %s7807_s27 }
  0x58   : > { %s7811_s12 = scalar_lea.vmem [#allocation2], %s7320_s3 }
  0x59   : > { %7583 = dma.done.wait (%p7711_p4), %s284_s5, 10240  }
  0x5a   : > { %7585 = vsyncadd (%p7711_p4), %s284_s5, 4294957056 }
  0x5b   : > { %7587 = dma.done.wait (%p7701_p1), [#allocation6], 24576  }
  0x5c   : > { %7589 = vsyncadd (%p7701_p1), [#allocation6], 4294942720 }
  0x5d   : > { %7591 = dma.done.wait (%p7701_p1), [#allocation9], 384  }
  0x5e   : > { %7593 = vsyncadd (%p7701_p1), [#allocation9], 4294966912  ;;  %v444_v0 = vld [vmem:[#allocation5 + $0xf8] sm:$0xff]  ;;  %v443_v2 = vld [vmem:[#allocation5 + $0xf0] sm:$0xff]  ;;  %vm1593_vm0 = vcmask 1045504   ;;  %vm3256_vm1 = vcmask 1046528  }
  0x5f   : > { %v427_v1 = vld [vmem:[#allocation5 + $0x78] sm:$0xff]  ;;  %6160 = vmatprep.subr.mxu0 %v444_v0  ;;  %v426_v3 = vld [vmem:[#allocation5 + $0x70] sm:$0xff]  ;;  %v442_v4 = vld [vmem:[#allocation5 + $0xe8] sm:$0xff]  ;;  %s7628_s7 = smov 64   ;;  %s5443_s13 = sshll.u32 %s7807_s27, 8 }
  0x60   : > { %6273 = vmatprep.subr.mxu1 %v427_v1  ;;  %6161 = vmatpush3.msra.mxu0 %v444_v0  ;;  %v425_v5 = vld [vmem:[#allocation5 + $0x68] sm:$0xff]  ;;  %v441_v6 = vld [vmem:[#allocation5 + $0xe0] sm:$0xff]  ;;  %v440_v8 = vld [vmem:[#allocation5 + $0xd8] sm:$0xff]  ;;  %s9995_s11 = scalar_lea.vmem [#allocation10], %s5443_s13  ;;  %s5451_s15 = sshll.u32 %s7612_s24, 12 }
  0x61   : > { %6274 = vmatpush3.msra.mxu1 %v427_v1  ;;  %6162 = vmatprep.subr.mxu0 %v443_v2  ;;  %v424_v7 = vld [vmem:[#allocation5 + $0x60] sm:$0xff]  ;;  %v423_v9 = vld [vmem:[#allocation5 + $0x58] sm:$0xff]  ;;  %v439_v10 = vld [vmem:[#allocation5 + $0xd0] sm:$0xff]  ;;  %s5316_s17 = sshll.u32 %s9995_s11, 4  ;;  %s10166_s14 = scalar_lea.hbm %s10225_s6, %s5451_s15  ;;  %s10168_s17 = int_to_ptr.vmem [resolvable:$true] %s5316_s17 }
  0x62   : > { %6275 = vmatprep.subr.mxu1 %v426_v3  ;;  %6163 = vmatpush3.msra.mxu0 %v443_v2  ;;  %v422_v11 = vld [vmem:[#allocation5 + $0x50] sm:$0xff]  ;;  %v438_v12 = vld [vmem:[#allocation5 + $0xc8] sm:$0xff]  ;;  %v437_v14 = vld [vmem:[#allocation5 + $0xc0] sm:$0xff]  ;;  %s5300_s24 = scalar_lea.sflag [#allocation4], %s7807_s27  ;;  %s7532_s3 = scalar_lea.vmem %s10168_s17, 4096 }
  0x63   : > { %6276 = vmatpush3.msra.mxu1 %v426_v3  ;;  %6164 = vmatprep.subr.mxu0 %v442_v4  ;;  %v421_v13 = vld [vmem:[#allocation5 + $0x48] sm:$0xff]  ;;  %v7826_v15 = vld [vmem:[%s7811_s12] sm:$0xff]  ;;  %v7842_v24 = vld [vmem:[%s7811_s12 + $0x10] sm:$0xff]  ;;  %p7533_p1 = scmp.ne.s32.totalorder %s10168_s17, %s7532_s3  ;;  %s7629_s5 = smov [#allocation10]  }
  0x64   : > { %6277 = vmatprep.subr.mxu1 %v425_v5  ;;  %6165 = vmatpush3.msra.mxu0 %v442_v4  ;;  %v7829_v16 = vld [vmem:[%s7811_s12 + $0x8] sm:$0xff]  ;;  %v420_v17 = vld [vmem:[#allocation5 + $0x40] sm:$0xff]  ;;  %v1594_v19 = vrot.slane %v7826_v15, 2  ;;  %v436_v25 = vld [vmem:[#allocation5 + $0xb8] sm:$0xff]  ;;  %v1597_v27 = vrot.slane %v7842_v24, 2 }
  0x65   : > { %6278 = vmatpush3.msra.mxu1 %v425_v5  ;;  %6166 = vmatprep.subr.mxu0 %v441_v6  ;;  %v7832_v18 = vld [vmem:[%s7811_s12 + $0x20] sm:$0xff]  ;;  %v7836_v20 = vld [vmem:[%s7811_s12 + $0x28] sm:$0xff]  ;;  %v1595_v21 = vrot.slane %v7829_v16, 2  ;;  %v419_v26 = vld [vmem:[#allocation5 + $0x38] sm:$0xff]  ;;  %p7534_p4 = pnand %p7533_p1, %p7776_p13 }
  0x66   : > { %6279 = vmatprep.subr.mxu1 %v424_v7  ;;  %6167 = vmatpush3.msra.mxu0 %v441_v6  ;;  %v1601_v22 = vrot.slane %v7832_v18, 2  ;;  %v1602_v23 = vrot.slane %v7836_v20, 2  ;;  %v7849_v29 = vld [vmem:[%s7811_s12 + $0x30] sm:$0xff]  ;;  %v434_v35 = vld [vmem:[#allocation5 + $0xa8] sm:$0xff]  ;;  %v433_v37 = vld [vmem:[#allocation5 + $0xa0] sm:$0xff] }
  0x67   : > { %6280 = vmatpush3.msra.mxu1 %v424_v7  ;;  %6168 = vmatprep.subr.mxu0 %v440_v8  ;;  %v7846_v28 = vsel %vm1593_vm0, %v1594_v19, %v1595_v21  ;;  %v435_v30 = vld [vmem:[#allocation5 + $0xb0] sm:$0xff]  ;;  %v10229_v32 = vrot.slane %v7849_v29, 2  ;;  %v7855_v33 = vsel %vm1593_vm0, %v1595_v21, %v1597_v27  ;;  %v417_v36 = vld [vmem:[#allocation5 + $0x28] sm:$0xff]  ;;  %v416_v38 = vld [vmem:[#allocation5 + $0x20] sm:$0xff]  ;;  %p7535_p8 = pneg %p7534_p4 }
  0x68   : > { %6281 = vmatprep.subr.mxu1 %v423_v9  ;;  %6169 = vmatpush3.msra.mxu0 %v440_v8  ;;  %v418_v31 = vld [vmem:[#allocation5 + $0x30] sm:$0xff]  ;;  %v7858_v34 = vsel %vm1593_vm0, %v1601_v22, %v1602_v23  ;;  %v432_v40 = vld [vmem:[#allocation5 + $0x98] sm:$0xff]  ;;  %v430_v44 = vld [vmem:[#allocation5 + $0x88] sm:$0xff] }
  0x69   : > { %6282 = vmatpush3.msra.mxu1 %v423_v9  ;;  %6170 = vmatprep.subr.mxu0 %v439_v10  ;;  %v7863_v39 = vsel %vm1593_vm0, %v1602_v23, %v10229_v32  ;;  %v415_v41 = vld [vmem:[#allocation5 + $0x18] sm:$0xff]  ;;  %v431_v42 = vld [vmem:[#allocation5 + $0x90] sm:$0xff]  ;;  %v413_v45 = vld [vmem:[#allocation5 + $0x8] sm:$0xff] }
  0x6a   : > { %6283 = vmatprep.subr.mxu1 %v422_v11  ;;  %6171 = vmatpush3.msra.mxu0 %v439_v10  ;;  %v414_v43 = vld [vmem:[#allocation5 + $0x10] sm:$0xff]  ;;  %v429_v46 = vld [vmem:[#allocation5 + $0x80] sm:$0xff]  ;;  %v1131_v48 = vld [vmem:[#allocation5 + $0x178] sm:$0xff] }
  0x6b   : > { %6284 = vmatpush3.msra.mxu1 %v422_v11  ;;  %6172 = vmatprep.subr.mxu0 %v438_v12  ;;  %v412_v47 = vld [vmem:[#allocation5] sm:$0xff]  ;;  %v1790_v49 = vld [vmem:[#allocation5 + $0x1f8] sm:$0xff]  ;;  %v7874_v51 = vld [vmem:[%s7811_s12 + $0x48] sm:$0xff] }
  0x6c   : > { %6285 = vmatprep.subr.mxu1 %v421_v13  ;;  %6173 = vmatpush3.msra.mxu0 %v438_v12  ;;  %v7870_v50 = vld [vmem:[%s7811_s12 + $0x40] sm:$0xff]  ;;  %v1130_v52 = vld [vmem:[#allocation5 + $0x170] sm:$0xff]  ;;  %v1129_v56 = vld [vmem:[#allocation5 + $0x168] sm:$0xff] }
  0x6d   : > { %6286 = vmatpush3.msra.mxu1 %v421_v13  ;;  %6174 = vmatprep.subr.mxu0 %v437_v14  ;;  %v1789_v53 = vld [vmem:[#allocation5 + $0x1f0] sm:$0xff]  ;;  %v7885_v55 = vld [vmem:[%s7811_s12 + $0x60] sm:$0xff]  ;;  %v1788_v57 = vld [vmem:[#allocation5 + $0x1e8] sm:$0xff] }
  0x6e   : > { %6287 = vmatprep.subr.mxu1 %v420_v17  ;;  %6175 = vmatpush3.msra.mxu0 %v437_v14  ;;  %v7882_v54 = vld [vmem:[%s7811_s12 + $0x50] sm:$0xff]  ;;  %v7892_v58 = vld [vmem:[%s7811_s12 + $0x68] sm:$0xff]  ;;  %v1128_v60 = vld [vmem:[#allocation5 + $0x160] sm:$0xff] }
  0x6f   : > { %6288 = vmatpush3.msra.mxu1 %v420_v17  ;;  %6176 = vmatprep.subr.mxu0 %v436_v25  ;;  %v7895_v59 = vld [vmem:[%s7811_s12 + $0x70] sm:$0xff]  ;;  %v1787_v61 = vld [vmem:[#allocation5 + $0x1e0] sm:$0xff]  ;;  %v7905_v63 = vld [vmem:[%s7811_s12 + $0x88] sm:$0xff] }
  0x70   : > { %6289 = vmatprep.subr.mxu1 %v419_v26  ;;  %6177 = vmatpush3.msra.mxu0 %v436_v25  ;;  %v7902_v62 = vld [vmem:[%s7811_s12 + $0x80] sm:$0xff]  ;;  %v1127_v0 = vld [vmem:[#allocation5 + $0x158] sm:$0xff]  ;;  %v7912_v2 = vld [vmem:[%s7811_s12 + $0x90] sm:$0xff] }
  0x71   : > { %6290 = vmatpush3.msra.mxu1 %v419_v26  ;;  %6178 = vmatprep.subr.mxu0 %v435_v30  ;;  %v1786_v1 = vld [vmem:[#allocation5 + $0x1d8] sm:$0xff]  ;;  %v7915_v3 = vld [vmem:[%s7811_s12 + $0xa0] sm:$0xff]  ;;  %v1126_v4 = vld [vmem:[#allocation5 + $0x150] sm:$0xff] }
  0x72   : > { %6291 = vmatprep.subr.mxu1 %v418_v31  ;;  %6179 = vmatpush3.msra.mxu0 %v435_v30  ;;  %v1785_v5 = vld [vmem:[#allocation5 + $0x1d0] sm:$0xff]  ;;  %v7922_v6 = vld [vmem:[%s7811_s12 + $0xa8] sm:$0xff]  ;;  %v7932_v10 = vld [vmem:[%s7811_s12 + $0xc0] sm:$0xff] }
  0x73   : > { %6292 = vmatpush3.msra.mxu1 %v418_v31  ;;  %6180 = vmatprep.subr.mxu0 %v434_v35  ;;  %v7925_v7 = vld [vmem:[%s7811_s12 + $0xb0] sm:$0xff]  ;;  %v1125_v8 = vld [vmem:[#allocation5 + $0x148] sm:$0xff]  ;;  %v1124_v12 = vld [vmem:[#allocation5 + $0x140] sm:$0xff] }
  0x74   : > { %6293 = vmatprep.subr.mxu1 %v417_v36  ;;  %6181 = vmatpush3.msra.mxu0 %v434_v35  ;;  %v1784_v9 = vld [vmem:[#allocation5 + $0x1c8] sm:$0xff]  ;;  %v1783_v13 = vld [vmem:[#allocation5 + $0x1c0] sm:$0xff]  ;;  %v7942_v14 = vld [vmem:[%s7811_s12 + $0xd0] sm:$0xff] }
  0x75   : > { %6294 = vmatpush3.msra.mxu1 %v417_v36  ;;  %6182 = vmatprep.subr.mxu0 %v433_v37  ;;  %v7935_v11 = vld [vmem:[%s7811_s12 + $0xc8] sm:$0xff]  ;;  %v1782_v17 = vld [vmem:[#allocation5 + $0x1b8] sm:$0xff]  ;;  %v7955_v19 = vld [vmem:[%s7811_s12 + $0xf0] sm:$0xff] }
  0x76   : > { %6295 = vmatprep.subr.mxu1 %v416_v38  ;;  %6183 = vmatpush3.msra.mxu0 %v433_v37  ;;  %v1781_v21 = vld [vmem:[#allocation5 + $0x1b0] sm:$0xff]  ;;  %v7962_v22 = vld [vmem:[%s7811_s12 + $0x100] sm:$0xff]  ;;  %v7965_v23 = vld [vmem:[%s7811_s12 + $0x108] sm:$0xff] }
  0x77   : > { %6296 = vmatpush3.msra.mxu1 %v416_v38  ;;  %6184 = vmatprep.subr.mxu0 %v432_v40  ;;  %v1121_v25 = vld [vmem:[#allocation5 + $0x128] sm:$0xff]  ;;  %v7972_v30 = vld [vmem:[%s7811_s12 + $0x110] sm:$0xff]  ;;  %v7975_v31 = vld [vmem:[%s7811_s12 + $0x120] sm:$0xff] }
  0x78   : > { %6297 = vmatprep.subr.mxu1 %v415_v41  ;;  %6185 = vmatpush3.msra.mxu0 %v432_v40  ;;  %v1780_v26 = vld [vmem:[#allocation5 + $0x1a8] sm:$0xff]  ;;  %v1120_v35 = vld [vmem:[#allocation5 + $0x120] sm:$0xff]  ;;  %v7985_v38 = vld [vmem:[%s7811_s12 + $0x130] sm:$0xff] }
  0x79   : > { %6298 = vmatpush3.msra.mxu1 %v415_v41  ;;  %6186 = vmatprep.subr.mxu0 %v431_v42  ;;  %v1779_v36 = vld [vmem:[#allocation5 + $0x1a0] sm:$0xff]  ;;  %v7982_v37 = vld [vmem:[%s7811_s12 + $0x128] sm:$0xff]  ;;  %v1119_v40 = vld [vmem:[#allocation5 + $0x118] sm:$0xff] }
  0x7a   : > { %6299 = vmatprep.subr.mxu1 %v414_v43  ;;  %6187 = vmatpush3.msra.mxu0 %v431_v42  ;;  %v1778_v41 = vld [vmem:[#allocation5 + $0x198] sm:$0xff]  ;;  %v7992_v42 = vld [vmem:[%s7811_s12 + $0x140] sm:$0xff] }
  0x7b   : > { %6300 = vmatpush3.msra.mxu1 %v414_v43  ;;  %6188 = vmatprep.subr.mxu0 %v430_v44  ;;  %v7995_v43 = vld [vmem:[%s7811_s12 + $0x148] sm:$0xff] }
  0x7c   : > { %6301 = vmatprep.subr.mxu1 %v413_v45  ;;  %6189 = vmatpush3.msra.mxu0 %v430_v44  ;;  %v1118_v44 = vld [vmem:[#allocation5 + $0x110] sm:$0xff] }
  0x7d   : > { %6302 = vmatpush3.msra.mxu1 %v413_v45  ;;  %6190 = vmatprep.subr.mxu0 %v429_v46  ;;  %v1777_v45 = vld [vmem:[#allocation5 + $0x190] sm:$0xff] }
  0x7e   : > { %6303 = vmatprep.subr.mxu1 %v412_v47  ;;  %6191 = vmatpush3.msra.mxu0 %v429_v46  ;;  %v8002_v46 = vld [vmem:[%s7811_s12 + $0x150] sm:$0xff] }
  0x7f   : > { %6192 = vmatprep.mubr.f32.mxu0 %v7832_v18  ;;  %6304 = vmatpush3.msra.mxu1 %v412_v47  ;;  %v8005_v47 = vld [vmem:[%s7811_s12 + $0x160] sm:$0xff] }
  0x80   : > { %6305 = vmatprep.mubr.f32.mxu1 %v7826_v15  ;;  %6193 = vmatmul.mubr.f32.vlgmr.msra.gmra.mxu0 %v7836_v20  ;;  %v7945_v15 = vld [vmem:[%s7811_s12 + $0xe0] sm:$0xff] }
  0x81   : > { %6306 = vmatmul.mubr.f32.vlgmr.msra.gmra.mxu1 %v7829_v16  ;;  %6386 = vmatprep.subr.mxu0 %v1131_v48  ;;  %v1123_v16 = vld [vmem:[#allocation5 + $0x138] sm:$0xff] }
  0x82   : > { %6499 = vmatprep.subr.mxu1 %v1790_v49  ;;  %6387 = vmatpush3.msra.mxu0 %v1131_v48  ;;  %v1117_v48 = vld [vmem:[#allocation5 + $0x108] sm:$0xff] }
  0x83   : > { %6195 = vmatprep.mubr.f32.mxu0 %v7849_v29  ;;  %6308 = vmatprep.mubr.f32.mxu1 %v7842_v24  ;;  %v343_v24 = vld [vmem:[%s7811_s12 + $0x58] sm:$0xff] }
  0x84   : > { %6500 = vmatpush3.msra.mxu1 %v1790_v49  ;;  %6196 = vmatmul.mubr.f32.gmra.mxu0 %v7870_v50  ;;  %v1776_v49 = vld [vmem:[#allocation5 + $0x188] sm:$0xff] }
  0x85   : > { %6309 = vmatmul.mubr.f32.gmra.mxu1 %v7832_v18  ;;  %6198 = vmatprep.mubr.f32.mxu0 %v7874_v51  ;;  %v7952_v18 = vld [vmem:[%s7811_s12 + $0xe8] sm:$0xff] }
  0x86   : > { %6311 = vmatprep.mubr.f32.mxu1 %v7836_v20  ;;  %6388 = vmatprep.subr.mxu0 %v1130_v52  ;;  %v1122_v20 = vld [vmem:[#allocation5 + $0x130] sm:$0xff] }
  0x87   : > { %6501 = vmatprep.subr.mxu1 %v1789_v53  ;;  %6389 = vmatpush3.msra.mxu0 %v1130_v52  ;;  %v8012_v52 = vld [vmem:[%s7811_s12 + $0x168] sm:$0xff] }
  0x88   : > { %6502 = vmatpush3.msra.mxu1 %v1789_v53  ;;  %6199 = vmatmul.mubr.f32.gmra.mxu0 %v7882_v54  ;;  %v8015_v53 = vld [vmem:[%s7811_s12 + $0x170] sm:$0xff] }
  0x89   : > { %6312 = vmatmul.mubr.f32.gmra.mxu1 %v7849_v29  ;;  %6201 = vmatprep.mubr.f32.mxu0 %v7885_v55 }
  0x8a   : > { %6314 = vmatprep.mubr.f32.mxu1 %v7870_v50  ;;  %6390 = vmatprep.subr.mxu0 %v1129_v56 }
  0x8b   : > { %6503 = vmatprep.subr.mxu1 %v1788_v57  ;;  %6391 = vmatpush3.msra.mxu0 %v1129_v56  ;;  %v1116_v56 = vld [vmem:[#allocation5 + $0x100] sm:$0xff] }
  0x8c   : > { %6504 = vmatpush3.msra.mxu1 %v1788_v57  ;;  %6202 = vmatmul.mubr.f32.gmra.mxu0 %v7892_v58  ;;  %v1775_v57 = vld [vmem:[#allocation5 + $0x180] sm:$0xff] }
  0x8d   : > { %6315 = vmatmul.mubr.f32.gmra.mxu1 %v7874_v51  ;;  %6204 = vmatprep.mubr.f32.mxu0 %v7895_v59 }
  0x8e   : > { %6317 = vmatprep.mubr.f32.mxu1 %v7882_v54  ;;  %6392 = vmatprep.subr.mxu0 %v1128_v60 }
  0x8f   : > { %6505 = vmatprep.subr.mxu1 %v1787_v61  ;;  %6393 = vmatpush3.msra.mxu0 %v1128_v60  ;;  %v8022_v60 = vld [vmem:[%s7811_s12 + $0x180] sm:$0xff] }
  0x90   : > { %6506 = vmatpush3.msra.mxu1 %v1787_v61  ;;  %6205 = vmatmul.mubr.f32.gmra.mxu0 %v7902_v62  ;;  %v8025_v61 = vld [vmem:[%s7811_s12 + $0x188] sm:$0xff] }
  0x91   : > { %6318 = vmatmul.mubr.f32.gmra.mxu1 %v7885_v55  ;;  %6207 = vmatprep.mubr.f32.mxu0 %v7905_v63 }
  0x92   : > { %6320 = vmatprep.mubr.f32.mxu1 %v7892_v58  ;;  %6394 = vmatprep.subr.mxu0 %v1127_v0 }
  0x93   : > { %6507 = vmatprep.subr.mxu1 %v1786_v1  ;;  %6395 = vmatpush3.msra.mxu0 %v1127_v0  ;;  %v8027_v0 = vld [vmem:[#allocation5 + $0x278] sm:$0xff] }
  0x94   : > { %6508 = vmatpush3.msra.mxu1 %v1786_v1  ;;  %6208 = vmatmul.mubr.f32.gmra.mxu0 %v7912_v2  ;;  %v8029_v1 = vld [vmem:[#allocation5 + $0x2f8] sm:$0xff] }
  0x95   : > { %6321 = vmatmul.mubr.f32.gmra.mxu1 %v7895_v59  ;;  %6210 = vmatprep.mubr.f32.mxu0 %v7915_v3 }
  0x96   : > { %6323 = vmatprep.mubr.f32.mxu1 %v7902_v62  ;;  %6396 = vmatprep.subr.mxu0 %v1126_v4 }
  0x97   : > { %6509 = vmatprep.subr.mxu1 %v1785_v5  ;;  %6397 = vmatpush3.msra.mxu0 %v1126_v4  ;;  %v8036_v4 = vld [vmem:[%s7811_s12 + $0x190] sm:$0xff] }
  0x98   : > { %6510 = vmatpush3.msra.mxu1 %v1785_v5  ;;  %6211 = vmatmul.mubr.f32.gmra.mxu0 %v7922_v6  ;;  %v8039_v5 = vld [vmem:[%s7811_s12 + $0x1a0] sm:$0xff] }
  0x99   : > { %6324 = vmatmul.mubr.f32.gmra.mxu1 %v7905_v63  ;;  %6213 = vmatprep.mubr.f32.mxu0 %v7925_v7 }
  0x9a   : > { %6326 = vmatprep.mubr.f32.mxu1 %v7912_v2  ;;  %6398 = vmatprep.subr.mxu0 %v1125_v8 }
  0x9b   : > { %6511 = vmatprep.subr.mxu1 %v1784_v9  ;;  %6399 = vmatpush3.msra.mxu0 %v1125_v8  ;;  %v8048_v8 = vld [vmem:[%s7811_s12 + $0x1a8] sm:$0xff] }
  0x9c   : > { %6512 = vmatpush3.msra.mxu1 %v1784_v9  ;;  %6214 = vmatmul.mubr.f32.gmra.mxu0 %v7932_v10  ;;  %v8051_v9 = vld [vmem:[%s7811_s12 + $0x1b0] sm:$0xff] }
  0x9d   : > { %6327 = vmatmul.mubr.f32.gmra.mxu1 %v7915_v3  ;;  %6216 = vmatprep.mubr.f32.mxu0 %v7935_v11 }
  0x9e   : > { %6329 = vmatprep.mubr.f32.mxu1 %v7922_v6  ;;  %6400 = vmatprep.subr.mxu0 %v1124_v12 }
  0x9f   : > { %6513 = vmatprep.subr.mxu1 %v1783_v13  ;;  %6401 = vmatpush3.msra.mxu0 %v1124_v12  ;;  %v8058_v12 = vld [vmem:[%s7811_s12 + $0x1c0] sm:$0xff] }
  0xa0   : > { %6514 = vmatpush3.msra.mxu1 %v1783_v13  ;;  %6217 = vmatmul.mubr.f32.gmra.mxu0 %v7942_v14  ;;  %v8061_v13 = vld [vmem:[%s7811_s12 + $0x1c8] sm:$0xff] }
  0xa1   : > { %6330 = vmatmul.mubr.f32.gmra.mxu1 %v7925_v7  ;;  %6219 = vmatprep.mubr.f32.mxu0 %v7945_v15 }
  0xa2   : > { %6332 = vmatprep.mubr.f32.mxu1 %v7932_v10  ;;  %6402 = vmatprep.subr.mxu0 %v1123_v16 }
  0xa3   : > { %6515 = vmatprep.subr.mxu1 %v1782_v17  ;;  %6403 = vmatpush3.msra.mxu0 %v1123_v16  ;;  %v8068_v16 = vld [vmem:[%s7811_s12 + $0x1d0] sm:$0xff] }
  0xa4   : > { %6516 = vmatpush3.msra.mxu1 %v1782_v17  ;;  %6220 = vmatmul.mubr.f32.gmra.mxu0 %v7952_v18  ;;  %v8071_v17 = vld [vmem:[%s7811_s12 + $0x1e0] sm:$0xff] }
  0xa5   : > { %6333 = vmatmul.mubr.f32.gmra.mxu1 %v7935_v11  ;;  %6222 = vmatprep.mubr.f32.mxu0 %v7955_v19 }
  0xa6   : > { %6335 = vmatprep.mubr.f32.mxu1 %v7942_v14  ;;  %6404 = vmatprep.subr.mxu0 %v1122_v20 }
  0xa7   : > { %6517 = vmatprep.subr.mxu1 %v1781_v21  ;;  %6405 = vmatpush3.msra.mxu0 %v1122_v20  ;;  %v8078_v20 = vld [vmem:[%s7811_s12 + $0x1e8] sm:$0xff] }
  0xa8   : > { %6518 = vmatpush3.msra.mxu1 %v1781_v21  ;;  %6223 = vmatmul.mubr.f32.gmra.mxu0 %v7962_v22  ;;  %v8081_v21 = vld [vmem:[%s7811_s12 + $0x1f0] sm:$0xff] }
  0xa9   : > { %6336 = vmatmul.mubr.f32.gmra.mxu1 %v7945_v15  ;;  %6225 = vmatprep.mubr.f32.mxu0 %v7965_v23 }
  0xaa   : > { %6338 = vmatprep.mubr.f32.mxu1 %v7952_v18  ;;  %6406 = vmatprep.subr.mxu0 %v1121_v25 }
  0xab   : > { %6519 = vmatprep.subr.mxu1 %v1780_v26  ;;  %6407 = vmatpush3.msra.mxu0 %v1121_v25  ;;  %v8088_v25 = vld [vmem:[%s7811_s12 + $0x200] sm:$0xff] }
  0xac   : > { %6520 = vmatpush3.msra.mxu1 %v1780_v26  ;;  %6226 = vmatmul.mubr.f32.gmra.mxu0 %v7972_v30  ;;  %v8091_v26 = vld [vmem:[%s7811_s12 + $0x208] sm:$0xff] }
  0xad   : > { %6339 = vmatmul.mubr.f32.gmra.mxu1 %v7955_v19  ;;  %6228 = vmatprep.mubr.f32.mxu0 %v7975_v31 }
  0xae   : > { %6341 = vmatprep.mubr.f32.mxu1 %v7962_v22  ;;  %6408 = vmatprep.subr.mxu0 %v1120_v35 }
  0xaf   : > { %6521 = vmatprep.subr.mxu1 %v1779_v36  ;;  %6409 = vmatpush3.msra.mxu0 %v1120_v35  ;;  %v8098_v35 = vld [vmem:[%s7811_s12 + $0x210] sm:$0xff] }
  0xb0   : > { %6522 = vmatpush3.msra.mxu1 %v1779_v36  ;;  %6229 = vmatmul.mubr.f32.gmra.mxu0 %v7982_v37  ;;  %v8101_v36 = vld [vmem:[%s7811_s12 + $0x220] sm:$0xff] }
  0xb1   : > { %6342 = vmatmul.mubr.f32.gmra.mxu1 %v7965_v23  ;;  %6231 = vmatprep.mubr.f32.mxu0 %v7985_v38 }
  0xb2   : > { %6344 = vmatprep.mubr.f32.mxu1 %v7972_v30  ;;  %6410 = vmatprep.subr.mxu0 %v1119_v40 }
  0xb3   : > { %6523 = vmatprep.subr.mxu1 %v1778_v41  ;;  %6411 = vmatpush3.msra.mxu0 %v1119_v40  ;;  %v8108_v40 = vld [vmem:[%s7811_s12 + $0x228] sm:$0xff] }
  0xb4   : > { %6524 = vmatpush3.msra.mxu1 %v1778_v41  ;;  %6232 = vmatmul.mubr.f32.gmra.mxu0 %v7992_v42  ;;  %v8111_v41 = vld [vmem:[%s7811_s12 + $0x230] sm:$0xff] }
  0xb5   : > { %6345 = vmatmul.mubr.f32.gmra.mxu1 %v7975_v31  ;;  %6234 = vmatprep.mubr.f32.mxu0 %v7995_v43 }
  0xb6   : > { %6347 = vmatprep.mubr.f32.mxu1 %v7982_v37  ;;  %6412 = vmatprep.subr.mxu0 %v1118_v44 }
  0xb7   : > { %6525 = vmatprep.subr.mxu1 %v1777_v45  ;;  %6413 = vmatpush3.msra.mxu0 %v1118_v44  ;;  %v8118_v44 = vld [vmem:[%s7811_s12 + $0x240] sm:$0xff] }
  0xb8   : > { %6526 = vmatpush3.msra.mxu1 %v1777_v45  ;;  %6235 = vmatmul.mubr.f32.gmra.mxu0 %v8002_v46  ;;  %10315 = vst [vmem:[#allocation16_spill] sm:$0xff] %v8118_v44  ;;  %v8121_v45 = vld [vmem:[%s7811_s12 + $0x248] sm:$0xff] }
  0xb9   : > { %6348 = vmatmul.mubr.f32.gmra.mxu1 %v7985_v38  ;;  %6237 = vmatprep.mubr.f32.mxu0 %v8005_v47  ;;  %10316 = vst [vmem:[#allocation17_spill] sm:$0xff] %v8121_v45 }
  0xba   : > { %6350 = vmatprep.mubr.f32.mxu1 %v7992_v42  ;;  %6414 = vmatprep.subr.mxu0 %v1117_v48 }
  0xbb   : > { %6527 = vmatprep.subr.mxu1 %v1776_v49  ;;  %6415 = vmatpush3.msra.mxu0 %v1117_v48  ;;  %v335_v48 = vld [vmem:[%s7811_s12 + $0x18] sm:$0xff] }
  0xbc   : > { %6528 = vmatpush3.msra.mxu1 %v1776_v49  ;;  %6238 = vmatmul.mubr.f32.gmra.mxu0 %v8012_v52  ;;  %v8129_v49 = vld [vmem:[%s7811_s12 + $0x250] sm:$0xff] }
  0xbd   : > { %6351 = vmatmul.mubr.f32.gmra.mxu1 %v7995_v43  ;;  %6240 = vmatprep.mubr.f32.mxu0 %v8015_v53  ;;  %10317 = vst [vmem:[#allocation18_spill] sm:$0xff] %v8129_v49 }
  0xbe   : > { %6353 = vmatprep.mubr.f32.mxu1 %v8002_v46  ;;  %6416 = vmatprep.subr.mxu0 %v1116_v56 }
  0xbf   : > { %6529 = vmatprep.subr.mxu1 %v1775_v57  ;;  %6417 = vmatpush3.msra.mxu0 %v1116_v56  ;;  %v1599_v56 = vrot.slane %v335_v48, 2  ;;  %v2629_v48 = vld [vmem:[#allocation5 + $0x2f0] sm:$0xff] }
  0xc0   : > { %6530 = vmatpush3.msra.mxu1 %v1775_v57  ;;  %6241 = vmatmul.mubr.f32.gmra.mxu0 %v8022_v60  ;;  %v339_v57 = vld [vmem:[%s7811_s12 + $0x38] sm:$0xff] }
  0xc1   : > { %6354 = vmatmul.mubr.f32.gmra.mxu1 %v8005_v47  ;;  %6243 = vmatprep.mubr.f32.mxu0 %v8025_v61  ;;  %v1600_v32 = vsel %vm1593_vm0, %v1597_v27, %v1599_v56  ;;  %v2208_v27 = vld [vmem:[#allocation5 + $0x268] sm:$0xff]  ;;  %v2627_v56 = vld [vmem:[#allocation5 + $0x2e0] sm:$0xff] }
  0xc2   : > { %6356 = vmatprep.mubr.f32.mxu1 %v8012_v52  ;;  %6612 = vmatprep.subr.mxu0 %v8027_v0 }
  0xc3   : > { %6725 = vmatprep.subr.mxu1 %v8029_v1 }
  0xc4   : > { %6244 = vmatmul.mubr.f32.gmra.mxu0 %v8036_v4 }
  0xc5   : > { %6357 = vmatmul.mubr.f32.gmra.mxu1 %v8015_v53  ;;  %6246 = vmatprep.mubr.f32.mxu0 %v8039_v5 }
  0xc6   : > { %6359 = vmatprep.mubr.f32.mxu1 %v8022_v60 }
  0xc8   : > { %6247 = vmatmul.mubr.f32.gmra.mxu0 %v8048_v8 }
  0xc9   : > { %6360 = vmatmul.mubr.f32.gmra.mxu1 %v8025_v61  ;;  %6249 = vmatprep.mubr.f32.mxu0 %v8051_v9 }
  0xca   : > { %6362 = vmatprep.mubr.f32.mxu1 %v8036_v4 }
  0xcc   : > { %6250 = vmatmul.mubr.f32.gmra.mxu0 %v8058_v12 }
  0xcd   : > { %6363 = vmatmul.mubr.f32.gmra.mxu1 %v8039_v5  ;;  %6252 = vmatprep.mubr.f32.mxu0 %v8061_v13 }
  0xce   : > { %6365 = vmatprep.mubr.f32.mxu1 %v8048_v8 }
  0xd0   : > { %6253 = vmatmul.mubr.f32.gmra.mxu0 %v8068_v16 }
  0xd1   : > { %6366 = vmatmul.mubr.f32.gmra.mxu1 %v8051_v9  ;;  %6255 = vmatprep.mubr.f32.mxu0 %v8071_v17 }
  0xd2   : > { %6368 = vmatprep.mubr.f32.mxu1 %v8058_v12 }
  0xd4   : > { %6256 = vmatmul.mubr.f32.gmra.mxu0 %v8078_v20 }
  0xd5   : > { %6369 = vmatmul.mubr.f32.gmra.mxu1 %v8061_v13  ;;  %6258 = vmatprep.mubr.f32.mxu0 %v8081_v21 }
  0xd6   : > { %6371 = vmatprep.mubr.f32.mxu1 %v8068_v16 }
  0xd8   : > { %6259 = vmatmul.mubr.f32.gmra.mxu0 %v8088_v25 }
  0xd9   : > { %6372 = vmatmul.mubr.f32.gmra.mxu1 %v8071_v17  ;;  %6261 = vmatprep.mubr.f32.mxu0 %v8091_v26 }
  0xda   : > { %6374 = vmatprep.mubr.f32.mxu1 %v8078_v20 }
  0xdc   : > { %6262 = vmatmul.mubr.f32.gmra.mxu0 %v8098_v35 }
  0xdd   : > { %6375 = vmatmul.mubr.f32.gmra.mxu1 %v8081_v21  ;;  %6264 = vmatprep.mubr.f32.mxu0 %v8101_v36 }
  0xde   : > { %6377 = vmatprep.mubr.f32.mxu1 %v8088_v25 }
  0xe0   : > { %6265 = vmatmul.mubr.f32.gmra.mxu0 %v8108_v40 }
  0xe1   : > { %6378 = vmatmul.mubr.f32.gmra.mxu1 %v8091_v26  ;;  %6267 = vmatprep.mubr.f32.mxu0 %v8111_v41 }
  0xe2   : > { %6380 = vmatprep.mubr.f32.mxu1 %v8098_v35 }
  0xe4   : > { %6268 = vmatmul.mubr.f32.gmra.mxu0 %v8118_v44  ;;  %v1608_v44 = vrot.slane %v7870_v50, 2 }
  0xe5   : > { %6381 = vmatmul.mubr.f32.gmra.mxu1 %v8101_v36  ;;  %6270 = vmatprep.mubr.f32.mxu0 %v8121_v45  ;;  %v2209_v45 = vld [vmem:[#allocation5 + $0x270] sm:$0xff] }
  0xe6   : > { %6383 = vmatprep.mubr.f32.mxu1 %v8108_v40 }
  0xe8   : > { %6271 = vmatmul.mubr.f32.gmra.mxu0 %v8129_v49  ;;  %v1606_v49 = vrot.slane %v339_v57, 2 }
  0xe9   : > { %6384 = vmatmul.mubr.f32.gmra.mxu1 %v8111_v41  ;;  %6418 = vmatprep.mubr.f32.mxu0 %v7870_v50  ;;  %v10318_v50 = vrot.slane %v7849_v29, 2  ;;  %v1615_v29 = vrot.slane %v7885_v55, 2 }
  0xea   : > { %6531 = vmatprep.mubr.f32.mxu1 %v7846_v28  ;;  %v1609_v28 = vrot.slane %v7874_v51, 2 }
  0xec   : > { %6419 = vmatmul.mubr.f32.vlgmr.msra.gmra.mxu0 %v7874_v51  ;;  %v8155_v51 = vsel %vm1593_vm0, %v10318_v50, %v1606_v49  ;;  %v1616_v49 = vrot.slane %v7892_v58, 2  ;;  %v2205_v50 = vld [vmem:[#allocation5 + $0x250] sm:$0xff] }
  0xed   : > { %6532 = vmatmul.mubr.f32.vlgmr.msra.gmra.mxu1 %v7855_v33  ;;  %6613 = vmatpush3.msra.mxu0 %v8027_v0  ;;  %v2628_v33 = vld [vmem:[#allocation5 + $0x2e8] sm:$0xff]  ;;  %v1611_v0 = vrot.slane %v7882_v54, 2 }
  0xee   : > { %6421 = vmatprep.mubr.f32.mxu0 %v7882_v54  ;;  %6726 = vmatpush3.msra.mxu1 %v8029_v1  ;;  %v1613_v1 = vrot.slane %v343_v24, 2  ;;  %v2207_v54 = vld [vmem:[#allocation5 + $0x260] sm:$0xff]  ;;  %v1622_v24 = vrot.slane %v7902_v62, 2 }
  0xef   : > { %6534 = vmatprep.mubr.f32.mxu1 %v1600_v32  ;;  %6614 = vmatprep.subr.mxu0 %v2209_v45  ;;  %v8158_v32 = vsel %vm1593_vm0, %v1608_v44, %v1609_v28  ;;  %v8167_v44 = vsel %vm1593_vm0, %v1609_v28, %v1611_v0 }
  0xf0   : > { %6727 = vmatprep.subr.mxu1 %v2629_v48  ;;  %6422 = vmatmul.mubr.f32.gmra.mxu0 %v7885_v55  ;;  %10319 = vst [vmem:[#allocation19_spill] sm:$0xff] %v8158_v32  ;;  %10320 = vst [vmem:[#allocation20_spill] sm:$0xff] %v8167_v44  ;;  %v8171_v57 = vsel %vm1593_vm0, %v1611_v0, %v1613_v1  ;;  %v2206_v55 = vld [vmem:[#allocation5 + $0x258] sm:$0xff]  ;;  %v2625_v1 = vld [vmem:[#allocation5 + $0x2d0] sm:$0xff] }
  0xf1   : > { %6535 = vmatmul.mubr.f32.gmra.mxu1 %v7858_v34  ;;  %6424 = vmatprep.mubr.f32.mxu0 %v7892_v58  ;;  %v2626_v58 = vld [vmem:[#allocation5 + $0x2d8] sm:$0xff] }
  0xf2   : > { %6537 = vmatprep.mubr.f32.mxu1 %v7863_v39  ;;  %6615 = vmatpush3.msra.mxu0 %v2209_v45  ;;  %v1618_v45 = vrot.slane %v7895_v59, 2  ;;  %v351_v0 = vld [vmem:[%s7811_s12 + $0x98] sm:$0xff] }
  0xf3   : > { %6728 = vmatpush3.msra.mxu1 %v2629_v48  ;;  %6616 = vmatprep.subr.mxu0 %v2208_v27  ;;  %v347_v48 = vld [vmem:[%s7811_s12 + $0x78] sm:$0xff] }
  0xf4   : > { %6729 = vmatprep.subr.mxu1 %v2628_v33  ;;  %6425 = vmatmul.mubr.f32.gmra.mxu0 %v7895_v59  ;;  %v8179_v59 = vsel %vm1593_vm0, %v1615_v29, %v1616_v49  ;;  %v1620_v28 = vrot.slane %v347_v48, 2  ;;  %v1625_v29 = vrot.slane %v7912_v2, 2 }
  0xf5   : > { %6538 = vmatmul.mubr.f32.gmra.mxu1 %v8155_v51  ;;  %6427 = vmatprep.mubr.f32.mxu0 %v7902_v62  ;;  %10321 = vst [vmem:[#allocation21_spill] sm:$0xff] %v8179_v59 }
  0xf6   : > { %6540 = vmatprep.mubr.f32.mxu1 %v8158_v32  ;;  %6617 = vmatpush3.msra.mxu0 %v2208_v27  ;;  %v1623_v27 = vrot.slane %v7905_v63, 2  ;;  %v8193_v62 = vsel %vm1593_vm0, %v1618_v45, %v1620_v28  ;;  %v355_v28 = vld [vmem:[%s7811_s12 + $0xb8] sm:$0xff] }
  0xf7   : > { %6730 = vmatpush3.msra.mxu1 %v2628_v33  ;;  %6618 = vmatprep.subr.mxu0 %v2207_v54  ;;  %v8184_v33 = vsel %vm1593_vm0, %v1616_v49, %v1618_v45  ;;  %v1629_v49 = vrot.slane %v7915_v3, 2  ;;  %v1630_v45 = vrot.slane %v7922_v6, 2 }
  0xf8   : > { %6731 = vmatprep.subr.mxu1 %v2627_v56  ;;  %6428 = vmatmul.mubr.f32.gmra.mxu0 %v7905_v63  ;;  %10322 = vst [vmem:[#allocation22_spill] sm:$0xff] %v8184_v33  ;;  %v8196_v63 = vsel %vm1593_vm0, %v1622_v24, %v1623_v27  ;;  %v8205_v48 = vsel %vm1593_vm0, %v1623_v27, %v1625_v29  ;;  %v1634_v24 = vrot.slane %v355_v28, 2  ;;  %v1636_v27 = vrot.slane %v7932_v10, 2 }
  0xf9   : > { %6541 = vmatmul.mubr.f32.gmra.mxu1 %v8167_v44  ;;  %6430 = vmatprep.mubr.f32.mxu0 %v7912_v2  ;;  %10323 = vst [vmem:[#allocation23_spill] sm:$0xff] %v8196_v63  ;;  %v2204_v2 = vld [vmem:[#allocation5 + $0x248] sm:$0xff]  ;;  %10324 = vst [vmem:[#allocation24_spill] sm:$0xff] %v8205_v48 }
  0xfa   : > { %6543 = vmatprep.mubr.f32.mxu1 %v8171_v57  ;;  %6619 = vmatpush3.msra.mxu0 %v2207_v54  ;;  %v1627_v54 = vrot.slane %v351_v0, 2  ;;  %v1637_v0 = vrot.slane %v7935_v11, 2 }
  0xfb   : > { %6732 = vmatpush3.msra.mxu1 %v2627_v56  ;;  %6620 = vmatprep.subr.mxu0 %v2206_v55  ;;  %v2624_v56 = vld [vmem:[#allocation5 + $0x2c8] sm:$0xff] }
  0xfc   : > { %6733 = vmatprep.subr.mxu1 %v2626_v58  ;;  %6431 = vmatmul.mubr.f32.gmra.mxu0 %v7915_v3  ;;  %v2203_v3 = vld [vmem:[#allocation5 + $0x240] sm:$0xff] }
  0xfd   : > { %6544 = vmatmul.mubr.f32.gmra.mxu1 %v8179_v59  ;;  %6433 = vmatprep.mubr.f32.mxu0 %v7922_v6  ;;  %v2623_v6 = vld [vmem:[#allocation5 + $0x2c0] sm:$0xff] }
  0xfe   : > { %6546 = vmatprep.mubr.f32.mxu1 %v8184_v33  ;;  %6621 = vmatpush3.msra.mxu0 %v2206_v55  ;;  %v1632_v55 = vrot.slane %v7925_v7, 2 }
  0xff   : > { %6734 = vmatpush3.msra.mxu1 %v2626_v58  ;;  %6622 = vmatprep.subr.mxu0 %v2205_v50  ;;  %v8209_v58 = vsel %vm1593_vm0, %v1625_v29, %v1627_v54  ;;  %v2202_v29 = vld [vmem:[#allocation5 + $0x238] sm:$0xff] }
 0x100   : > { %6735 = vmatprep.subr.mxu1 %v2625_v1  ;;  %6434 = vmatmul.mubr.f32.gmra.mxu0 %v7925_v7  ;;  %v8217_v7 = vsel %vm1593_vm0, %v1629_v49, %v1630_v45  ;;  %v2622_v54 = vld [vmem:[#allocation5 + $0x2b8] sm:$0xff]  ;;  %v1639_v49 = vrot.slane %v7942_v14, 2 }
 0x101   : > { %6547 = vmatmul.mubr.f32.gmra.mxu1 %v8193_v62  ;;  %6436 = vmatprep.mubr.f32.mxu0 %v7932_v10  ;;  %10325 = vst [vmem:[#allocation25_spill] sm:$0xff] %v8217_v7  ;;  %v8231_v10 = vsel %vm1593_vm0, %v1632_v55, %v1634_v24  ;;  %v363_v24 = vld [vmem:[%s7811_s12 + $0xf8] sm:$0xff] }
 0x102   : > { %6549 = vmatprep.mubr.f32.mxu1 %v8196_v63  ;;  %6623 = vmatpush3.msra.mxu0 %v2205_v50  ;;  %v8222_v50 = vsel %vm1593_vm0, %v1630_v45, %v1632_v55  ;;  %v1643_v45 = vrot.slane %v7945_v15, 2  ;;  %v1644_v55 = vrot.slane %v7952_v18, 2  ;;  %v8243_v28 = vsel %vm1593_vm0, %v1637_v0, %v1639_v49 }
 0x103   : > { %6736 = vmatpush3.msra.mxu1 %v2625_v1  ;;  %6624 = vmatprep.subr.mxu0 %v2204_v2  ;;  %10326 = vst [vmem:[#allocation26_spill] sm:$0xff] %v8222_v50  ;;  %v359_v1 = vld [vmem:[%s7811_s12 + $0xd8] sm:$0xff]  ;;  %10328 = vst [vmem:[#allocation28_spill] sm:$0xff] %v8243_v28 }
 0x104   : > { %6737 = vmatprep.subr.mxu1 %v2624_v56  ;;  %6437 = vmatmul.mubr.f32.gmra.mxu0 %v7935_v11  ;;  %v8234_v11 = vsel %vm1593_vm0, %v1636_v27, %v1637_v0  ;;  %v1648_v27 = vrot.slane %v363_v24, 2  ;;  %v1650_v0 = vrot.slane %v7962_v22, 2 }
 0x105   : > { %6550 = vmatmul.mubr.f32.gmra.mxu1 %v8205_v48  ;;  %6439 = vmatprep.mubr.f32.mxu0 %v7942_v14  ;;  %10327 = vst [vmem:[#allocation27_spill] sm:$0xff] %v8234_v11  ;;  %v2201_v14 = vld [vmem:[#allocation5 + $0x230] sm:$0xff] }
 0x106   : > { %6552 = vmatprep.mubr.f32.mxu1 %v8209_v58  ;;  %6625 = vmatpush3.msra.mxu0 %v2204_v2  ;;  %v1641_v2 = vrot.slane %v359_v1, 2  ;;  %v1651_v1 = vrot.slane %v7965_v23, 2 }
 0x107   : > { %6738 = vmatpush3.msra.mxu1 %v2624_v56  ;;  %6626 = vmatprep.subr.mxu0 %v2203_v3  ;;  %v2621_v56 = vld [vmem:[#allocation5 + $0x2b0] sm:$0xff] }
 0x108   : > { %6739 = vmatprep.subr.mxu1 %v2623_v6  ;;  %6440 = vmatmul.mubr.f32.gmra.mxu0 %v7945_v15  ;;  %v2200_v15 = vld [vmem:[#allocation5 + $0x228] sm:$0xff] }
 0x109   : > { %6553 = vmatmul.mubr.f32.gmra.mxu1 %v8217_v7  ;;  %6442 = vmatprep.mubr.f32.mxu0 %v7952_v18  ;;  %v2620_v18 = vld [vmem:[#allocation5 + $0x2a8] sm:$0xff] }
 0x10a   : > { %6555 = vmatprep.mubr.f32.mxu1 %v8222_v50  ;;  %6627 = vmatpush3.msra.mxu0 %v2203_v3  ;;  %v1646_v3 = vrot.slane %v7955_v19, 2 }
 0x10b   : > { %6740 = vmatpush3.msra.mxu1 %v2623_v6  ;;  %6628 = vmatprep.subr.mxu0 %v2202_v29  ;;  %v8247_v6 = vsel %vm1593_vm0, %v1639_v49, %v1641_v2  ;;  %v2199_v49 = vld [vmem:[#allocation5 + $0x220] sm:$0xff] }
 0x10c   : > { %6741 = vmatprep.subr.mxu1 %v2622_v54  ;;  %6443 = vmatmul.mubr.f32.gmra.mxu0 %v7955_v19  ;;  %v8255_v19 = vsel %vm1593_vm0, %v1643_v45, %v1644_v55  ;;  %v2619_v2 = vld [vmem:[#allocation5 + $0x2a0] sm:$0xff]  ;;  %v1653_v45 = vrot.slane %v7972_v30, 2 }
 0x10d   : > { %6556 = vmatmul.mubr.f32.gmra.mxu1 %v8231_v10  ;;  %6445 = vmatprep.mubr.f32.mxu0 %v7962_v22  ;;  %10329 = vst [vmem:[#allocation29_spill] sm:$0xff] %v8255_v19  ;;  %v8269_v22 = vsel %vm1593_vm0, %v1646_v3, %v1648_v27  ;;  %v371_v27 = vld [vmem:[%s7811_s12 + $0x138] sm:$0xff] }
 0x10e   : > { %6558 = vmatprep.mubr.f32.mxu1 %v8234_v11  ;;  %6629 = vmatpush3.msra.mxu0 %v2202_v29  ;;  %v8260_v29 = vsel %vm1593_vm0, %v1644_v55, %v1646_v3  ;;  %v1657_v55 = vrot.slane %v7975_v31, 2  ;;  %v1658_v3 = vrot.slane %v7982_v37, 2  ;;  %v8281_v24 = vsel %vm1593_vm0, %v1651_v1, %v1653_v45 }
 0x10f   : > { %6742 = vmatpush3.msra.mxu1 %v2622_v54  ;;  %6630 = vmatprep.subr.mxu0 %v2201_v14  ;;  %10330 = vst [vmem:[#allocation30_spill] sm:$0xff] %v8260_v29  ;;  %v367_v54 = vld [vmem:[%s7811_s12 + $0x118] sm:$0xff]  ;;  %10332 = vst [vmem:[#allocation32_spill] sm:$0xff] %v8281_v24 }
 0x110   : > { %6743 = vmatprep.subr.mxu1 %v2621_v56  ;;  %6446 = vmatmul.mubr.f32.gmra.mxu0 %v7965_v23  ;;  %v8272_v23 = vsel %vm1593_vm0, %v1650_v0, %v1651_v1  ;;  %v1662_v0 = vrot.slane %v371_v27, 2  ;;  %v1664_v1 = vrot.slane %v7992_v42, 2 }
 0x111   : > { %6559 = vmatmul.mubr.f32.gmra.mxu1 %v8243_v28  ;;  %6448 = vmatprep.mubr.f32.mxu0 %v7972_v30  ;;  %10331 = vst [vmem:[#allocation31_spill] sm:$0xff] %v8272_v23  ;;  %v2198_v30 = vld [vmem:[#allocation5 + $0x218] sm:$0xff] }
 0x112   : > { %6561 = vmatprep.mubr.f32.mxu1 %v8247_v6  ;;  %6631 = vmatpush3.msra.mxu0 %v2201_v14  ;;  %v1655_v14 = vrot.slane %v367_v54, 2  ;;  %v1665_v54 = vrot.slane %v7995_v43, 2 }
 0x113   : > { %6744 = vmatpush3.msra.mxu1 %v2621_v56  ;;  %6632 = vmatprep.subr.mxu0 %v2200_v15  ;;  %v2618_v56 = vld [vmem:[#allocation5 + $0x298] sm:$0xff] }
 0x114   : > { %6745 = vmatprep.subr.mxu1 %v2620_v18  ;;  %6449 = vmatmul.mubr.f32.gmra.mxu0 %v7975_v31  ;;  %v2197_v31 = vld [vmem:[#allocation5 + $0x210] sm:$0xff] }
 0x115   : > { %6562 = vmatmul.mubr.f32.gmra.mxu1 %v8255_v19  ;;  %6451 = vmatprep.mubr.f32.mxu0 %v7982_v37  ;;  %v2617_v37 = vld [vmem:[#allocation5 + $0x290] sm:$0xff] }
 0x116   : > { %6564 = vmatprep.mubr.f32.mxu1 %v8260_v29  ;;  %6633 = vmatpush3.msra.mxu0 %v2200_v15  ;;  %v1660_v15 = vrot.slane %v7985_v38, 2 }
 0x117   : > { %6746 = vmatpush3.msra.mxu1 %v2620_v18  ;;  %6634 = vmatprep.subr.mxu0 %v2199_v49  ;;  %v8285_v18 = vsel %vm1593_vm0, %v1653_v45, %v1655_v14  ;;  %v2196_v45 = vld [vmem:[#allocation5 + $0x208] sm:$0xff] }
 0x118   : > { %6747 = vmatprep.subr.mxu1 %v2619_v2  ;;  %6452 = vmatmul.mubr.f32.gmra.mxu0 %v7985_v38  ;;  %v8293_v38 = vsel %vm1593_vm0, %v1657_v55, %v1658_v3  ;;  %v2616_v14 = vld [vmem:[#allocation5 + $0x288] sm:$0xff]  ;;  %v1667_v55 = vrot.slane %v8002_v46, 2 }
 0x119   : > { %6565 = vmatmul.mubr.f32.gmra.mxu1 %v8269_v22  ;;  %6454 = vmatprep.mubr.f32.mxu0 %v7992_v42  ;;  %10333 = vst [vmem:[#allocation33_spill] sm:$0xff] %v8293_v38  ;;  %v8307_v42 = vsel %vm1593_vm0, %v1660_v15, %v1662_v0  ;;  %v379_v0 = vld [vmem:[%s7811_s12 + $0x178] sm:$0xff] }
 0x11a   : > { %6567 = vmatprep.mubr.f32.mxu1 %v8272_v23  ;;  %6635 = vmatpush3.msra.mxu0 %v2199_v49  ;;  %v8298_v49 = vsel %vm1593_vm0, %v1658_v3, %v1660_v15  ;;  %v1671_v3 = vrot.slane %v8005_v47, 2  ;;  %v1672_v15 = vrot.slane %v8012_v52, 2  ;;  %v8319_v27 = vsel %vm1593_vm0, %v1665_v54, %v1667_v55 }
 0x11b   : > { %6748 = vmatpush3.msra.mxu1 %v2619_v2  ;;  %6636 = vmatprep.subr.mxu0 %v2198_v30  ;;  %10334 = vst [vmem:[#allocation34_spill] sm:$0xff] %v8298_v49  ;;  %v375_v2 = vld [vmem:[%s7811_s12 + $0x158] sm:$0xff]  ;;  %10336 = vst [vmem:[#allocation36_spill] sm:$0xff] %v8319_v27 }
 0x11c   : > { %6749 = vmatprep.subr.mxu1 %v2618_v56  ;;  %6455 = vmatmul.mubr.f32.gmra.mxu0 %v7995_v43  ;;  %v8310_v43 = vsel %vm1593_vm0, %v1664_v1, %v1665_v54  ;;  %v1679_v1 = vrot.slane %v8025_v61, 2 }
 0x11d   : > { %6568 = vmatmul.mubr.f32.gmra.mxu1 %v8281_v24  ;;  %6457 = vmatprep.mubr.f32.mxu0 %v8002_v46  ;;  %10335 = vst [vmem:[#allocation35_spill] sm:$0xff] %v8310_v43  ;;  %v2195_v46 = vld [vmem:[#allocation5 + $0x200] sm:$0xff] }
 0x11e   : > { %6570 = vmatprep.mubr.f32.mxu1 %v8285_v18  ;;  %6637 = vmatpush3.msra.mxu0 %v2198_v30  ;;  %v1669_v30 = vrot.slane %v375_v2, 2  ;;  %v383_v2 = vld [vmem:[%s7811_s12 + $0x198] sm:$0xff] }
 0x11f   : > { %6750 = vmatpush3.msra.mxu1 %v2618_v56  ;;  %6638 = vmatprep.subr.mxu0 %v2197_v31  ;;  %v2615_v56 = vld [vmem:[#allocation5 + $0x280] sm:$0xff] }
 0x120   : > { %6751 = vmatprep.subr.mxu1 %v2617_v37  ;;  %6458 = vmatmul.mubr.f32.gmra.mxu0 %v8005_v47  ;;  %v8331_v47 = vsel %vm1593_vm0, %v1671_v3, %v1672_v15  ;;  %v387_v3 = vld [vmem:[%s7811_s12 + $0x1b8] sm:$0xff] }
 0x121   : > { %6571 = vmatmul.mubr.f32.gmra.mxu1 %v8293_v38  ;;  %6460 = vmatprep.mubr.f32.mxu0 %v8012_v52  ;;  %10337 = vst [vmem:[#allocation37_spill] sm:$0xff] %v8331_v47  ;;  %v1676_v52 = vrot.slane %v379_v0, 2  ;;  %v391_v0 = vld [vmem:[%s7811_s12 + $0x1d8] sm:$0xff] }
 0x122   : > { %6573 = vmatprep.mubr.f32.mxu1 %v8298_v49  ;;  %6639 = vmatpush3.msra.mxu0 %v2197_v31  ;;  %v1674_v31 = vrot.slane %v8015_v53, 2 }
 0x123   : > { %6752 = vmatpush3.msra.mxu1 %v2617_v37  ;;  %6640 = vmatprep.subr.mxu0 %v2196_v45  ;;  %v8323_v37 = vsel %vm1593_vm0, %v1667_v55, %v1669_v30  ;;  %v1685_v55 = vrot.slane %v8039_v5, 2  ;;  %v1686_v30 = vrot.slane %v8048_v8, 2 }
 0x124   : > { %6753 = vmatprep.subr.mxu1 %v2616_v14  ;;  %6461 = vmatmul.mubr.f32.gmra.mxu0 %v8015_v53  ;;  %v1678_v53 = vrot.slane %v8022_v60, 2  ;;  %v8336_v54 = vsel %vm1593_vm0, %v1672_v15, %v1674_v31  ;;  %v1692_v15 = vrot.slane %v8058_v12, 2 }
 0x125   : > { %6574 = vmatmul.mubr.f32.gmra.mxu1 %v8307_v42  ;;  %6463 = vmatprep.mubr.f32.mxu0 %v8022_v60  ;;  %10338 = vst [vmem:[#allocation38_spill] sm:$0xff] %v8336_v54  ;;  %v8345_v60 = vsel %vm1593_vm0, %v1674_v31, %v1676_v52  ;;  %v1695_v52 = vrot.slane %v8068_v16, 2 }
 0x126   : > { %6576 = vmatprep.mubr.f32.mxu1 %v8310_v43  ;;  %6641 = vmatpush3.msra.mxu0 %v2196_v45  ;;  %v1681_v45 = vrot.slane %v8036_v4, 2 }
 0x127   : > { %6754 = vmatpush3.msra.mxu1 %v2616_v14  ;;  %6642 = vmatprep.subr.mxu0 %v2195_v46  ;;  %v1683_v14 = vrot.slane %v383_v2, 2  ;;  %v1700_v2 = vrot.slane %v8078_v20, 2 }
 0x128   : > { %6755 = vmatprep.subr.mxu1 %v2615_v56  ;;  %6464 = vmatmul.mubr.f32.gmra.mxu0 %v8025_v61  ;;  %v8348_v61 = vsel %vm1593_vm0, %v1678_v53, %v1679_v1 }
 0x129   : > { %6577 = vmatmul.mubr.f32.gmra.mxu1 %v8319_v27  ;;  %6466 = vmatprep.mubr.f32.mxu0 %v8036_v4  ;;  %10339 = vst [vmem:[#allocation39_spill] sm:$0xff] %v8348_v61  ;;  %v8357_v4 = vsel %vm1593_vm0, %v1679_v1, %v1681_v45  ;;  %v1699_v1 = vrot.slane %v8071_v17, 2 }
 0x12a   : > { %6579 = vmatprep.mubr.f32.mxu1 %v8323_v37  ;;  %6643 = vmatpush3.msra.mxu0 %v2195_v46  ;;  %10340 = vst [vmem:[#allocation40_spill] sm:$0xff] %v8357_v4  ;;  %v1688_v46 = vrot.slane %v8051_v9, 2 }
 0x12b   : > { %6756 = vmatpush3.msra.mxu1 %v2615_v56  ;;  %v8361_v56 = vsel %vm1593_vm0, %v1681_v45, %v1683_v14  ;;  %v1702_v45 = vrot.slane %v8081_v21, 2 }
 0x12c   : > { %6467 = vmatmul.mubr.f32.gmra.mxu0 %v8039_v5  ;;  %v8369_v5 = vsel %vm1593_vm0, %v1685_v55, %v1686_v30  ;;  %v8374_v31 = vsel %vm1593_vm0, %v1686_v30, %v1688_v46  ;;  %v395_v55 = vld [vmem:[%s7811_s12 + $0x1f8] sm:$0xff] }
 0x12d   : > { %6580 = vmatmul.mubr.f32.gmra.mxu1 %v8331_v47  ;;  %6469 = vmatprep.mubr.f32.mxu0 %v8048_v8  ;;  %10341 = vst [vmem:[#allocation41_spill] sm:$0xff] %v8369_v5  ;;  %v1690_v8 = vrot.slane %v387_v3, 2  ;;  %10342 = vst [vmem:[#allocation42_spill] sm:$0xff] %v8374_v31  ;;  %v1706_v3 = vrot.slane %v8088_v25, 2 }
 0x12e   : > { %6582 = vmatprep.mubr.f32.mxu1 %v8336_v54 }
 0x12f   : > { %v8383_v53 = vsel %vm1593_vm0, %v1688_v46, %v1690_v8  ;;  %v1707_v8 = vrot.slane %v8091_v26, 2 }
 0x130   : > { %6470 = vmatmul.mubr.f32.gmra.mxu0 %v8051_v9  ;;  %v1693_v9 = vrot.slane %v8061_v13, 2 }
 0x131   : > { %6583 = vmatmul.mubr.f32.gmra.mxu1 %v8345_v60  ;;  %6472 = vmatprep.mubr.f32.mxu0 %v8058_v12 }
 0x132   : > { %6585 = vmatprep.mubr.f32.mxu1 %v8348_v61  ;;  %v8386_v12 = vsel %vm1593_vm0, %v1692_v15, %v1693_v9 }
 0x133   : > { %10343 = vst [vmem:[#allocation43_spill] sm:$0xff] %v8386_v12 }
 0x134   : > { %6473 = vmatmul.mubr.f32.gmra.mxu0 %v8061_v13  ;;  %v1697_v13 = vrot.slane %v391_v0, 2  ;;  %v8414_v0 = vsel %vm1593_vm0, %v1700_v2, %v1702_v45 }
 0x135   : > { %6586 = vmatmul.mubr.f32.gmra.mxu1 %v8357_v4  ;;  %6475 = vmatprep.mubr.f32.mxu0 %v8068_v16  ;;  %v8395_v16 = vsel %vm1593_vm0, %v1693_v9, %v1695_v52  ;;  %10347 = vst [vmem:[#allocation47_spill] sm:$0xff] %v8414_v0 }
 0x136   : > { %6588 = vmatprep.mubr.f32.mxu1 %v8361_v56  ;;  %10344 = vst [vmem:[#allocation44_spill] sm:$0xff] %v8395_v16  ;;  %v8399_v14 = vsel %vm1593_vm0, %v1695_v52, %v1697_v13  ;;  %v399_v13 = vld [vmem:[%s7811_s12 + $0x218] sm:$0xff] }
 0x138   : > { %6476 = vmatmul.mubr.f32.gmra.mxu0 %v8071_v17 }
 0x139   : > { %6589 = vmatmul.mubr.f32.gmra.mxu1 %v8369_v5  ;;  %6478 = vmatprep.mubr.f32.mxu0 %v8078_v20  ;;  %v8409_v20 = vsel %vm1593_vm0, %v1699_v1, %v1700_v2  ;;  %v1709_v1 = vrot.slane %v8098_v35, 2 }
 0x13a   : > { %6591 = vmatprep.mubr.f32.mxu1 %v8374_v31  ;;  %10346 = vst [vmem:[#allocation46_spill] sm:$0xff] %v8409_v20 }
 0x13c   : > { %6479 = vmatmul.mubr.f32.gmra.mxu0 %v8081_v21  ;;  %v1704_v21 = vrot.slane %v395_v55, 2 }
 0x13d   : > { %6592 = vmatmul.mubr.f32.gmra.mxu1 %v8383_v53  ;;  %6481 = vmatprep.mubr.f32.mxu0 %v8088_v25 }
 0x13e   : > { %6594 = vmatprep.mubr.f32.mxu1 %v8386_v12  ;;  %v8427_v25 = vsel %vm1593_vm0, %v1702_v45, %v1704_v21  ;;  %v1714_v45 = vrot.slane %v8108_v40, 2 }
 0x140   : > { %v6194_v30 = vpop.f32.mrf.mxu0  ;;  %6482 = vmatmul.mubr.f32.gmra.mxu0 %v8091_v26 }
 0x141   : > { %v6307_v46 = vpop.f32.mrf.mxu1  ;;  %6595 = vmatmul.mubr.f32.gmra.mxu1 %v8395_v16  ;;  %6484 = vmatprep.mubr.f32.mxu0 %v8098_v35 }
 0x142   : > { %v8404_v17 = vadd.f32 %v6307_v46, %v6194_v30  ;;  %6597 = vmatprep.mubr.f32.mxu1 %v8399_v14  ;;  %v511_v15 = vpop.f32.mrf.mxu0 }
 0x143   : > { %v846_v9 = vpop.f32.mrf.mxu1 }
 0x144   : > { %10345 = vst [vmem:[#allocation45_spill] sm:$0xff] %v8404_v17  ;;  %v8416_v52 = vadd.f32 %v846_v9, %v511_v15  ;;  %v6197_v30 = vpop.f32.mrf.mxu0  ;;  %6485 = vmatmul.mubr.f32.gmra.mxu0 %v8101_v36  ;;  %v8430_v15 = vsel %vm1593_vm0, %v1706_v3, %v1707_v8  ;;  %v1711_v9 = vrot.slane %v399_v13, 2  ;;  %v8443_v3 = vsel %vm1593_vm0, %v1707_v8, %v1709_v1  ;;  %v10358_v8 = vld [vmem:[#allocation18_spill] sm:$0xff] }
 0x145   : > { %v6310_v46 = vpop.f32.mrf.mxu1  ;;  %6598 = vmatmul.mubr.f32.gmra.mxu1 %v8409_v20  ;;  %6487 = vmatprep.mubr.f32.mxu0 %v8108_v40  ;;  %10350 = vst [vmem:[#allocation50_spill] sm:$0xff] %v8430_v15  ;;  %v1716_v13 = vrot.slane %v8111_v41, 2 }
 0x146   : > { %10348 = vst [vmem:[#allocation48_spill] sm:$0xff] %v8416_v52  ;;  %v8422_v55 = vadd.f32 %v6310_v46, %v6197_v30  ;;  %6600 = vmatprep.mubr.f32.mxu1 %v8414_v0  ;;  %v521_v26 = vpop.f32.mrf.mxu0  ;;  %v1713_v30 = vrot.slane %v8101_v36, 2  ;;  %v10353_v46 = vld [vmem:[#allocation16_spill] sm:$0xff] }
 0x147   : > { %v856_v2 = vpop.f32.mrf.mxu1  ;;  %10354 = vst [vmem:[#allocation16_spill] sm:$0xff] %v8443_v3  ;;  %v403_v36 = vld [vmem:[%s7811_s12 + $0x238] sm:$0xff] }
 0x148   : > { %10349 = vst [vmem:[#allocation49_spill] sm:$0xff] %v8422_v55  ;;  %v8432_v52 = vadd.f32 %v856_v2, %v521_v26  ;;  %v6200_v17 = vpop.f32.mrf.mxu0  ;;  %6488 = vmatmul.mubr.f32.gmra.mxu0 %v8111_v41  ;;  %v8458_v41 = vld [vmem:[%s7811_s12 + $0x260] sm:$0xff] }
 0x149   : > { %v6313_v35 = vpop.f32.mrf.mxu1  ;;  %6601 = vmatmul.mubr.f32.gmra.mxu1 %v8427_v25  ;;  %6490 = vmatprep.mubr.f32.mxu0 %v10353_v46 }
 0x14a   : > { %10351 = vst [vmem:[#allocation51_spill] sm:$0xff] %v8432_v52  ;;  %v8438_v21 = vadd.f32 %v6313_v35, %v6200_v17  ;;  %6603 = vmatprep.mubr.f32.mxu1 %v8430_v15  ;;  %v531_v26 = vpop.f32.mrf.mxu0  ;;  %v8447_v52 = vsel %vm1593_vm0, %v1709_v1, %v1711_v9  ;;  %v8462_v1 = vsel %vm1593_vm0, %v1713_v30, %v1714_v45  ;;  %v1718_v9 = vrot.slane %v403_v36, 2  ;;  %v8478_v30 = vld [vmem:[%s7811_s12 + $0x270] sm:$0xff] }
 0x14b   : > { %v866_v2 = vpop.f32.mrf.mxu1  ;;  %10359 = vst [vmem:[#allocation18_spill] sm:$0xff] %v8462_v1 }
 0x14c   : > { %10352 = vst [vmem:[#allocation52_spill] sm:$0xff] %v8438_v21  ;;  %v8450_v40 = vadd.f32 %v866_v2, %v531_v26  ;;  %v6203_v17 = vpop.f32.mrf.mxu0  ;;  %v10356_v21 = vld [vmem:[#allocation17_spill] sm:$0xff]  ;;  %v8482_v36 = vsel %vm1593_vm0, %v1716_v13, %v1718_v9 }
 0x14d   : > { %v6316_v35 = vpop.f32.mrf.mxu1  ;;  %6491 = vmatmul.mubr.f32.gmra.mxu0 %v10356_v21  ;;  %6604 = vmatmul.mubr.f32.gmra.mxu1 %v8443_v3  ;;  %v8468_v21 = vsel %vm1593_vm0, %v1714_v45, %v1716_v13 }
 0x14e   : > { %10355 = vst [vmem:[#allocation53_spill] sm:$0xff] %v8450_v40  ;;  %v8454_v46 = vadd.f32 %v6316_v35, %v6203_v17  ;;  %6493 = vmatprep.mubr.f32.mxu0 %v10358_v8  ;;  %6606 = vmatprep.mubr.f32.mxu1 %v8447_v52  ;;  %v541_v26 = vpop.f32.mrf.mxu0  ;;  %v8465_v40 = vld [vmem:[%s7811_s12 + $0x268] sm:$0xff]  ;;  %10361 = vst [vmem:[#allocation55_spill] sm:$0xff] %v8468_v21 }
 0x14f   : > { %v876_v2 = vpop.f32.mrf.mxu1  ;;  %10360 = vst [vmem:[#allocation54_spill] sm:$0xff] %v8465_v40 }
 0x150   : > { %10357 = vst [vmem:[#allocation17_spill] sm:$0xff] %v8454_v46  ;;  %v8470_v17 = vadd.f32 %v876_v2, %v541_v26  ;;  %v6206_v35 = vpop.f32.mrf.mxu0 }
 0x151   : > { %v6319_v8 = vpop.f32.mrf.mxu1  ;;  %6494 = vmatmul.mubr.f32.gmra.mxu0 %v8458_v41  ;;  %6607 = vmatmul.mubr.f32.gmra.mxu1 %v8462_v1 }
 0x152   : > { %10362 = vst [vmem:[#allocation56_spill] sm:$0xff] %v8470_v17  ;;  %v8474_v46 = vadd.f32 %v6319_v8, %v6206_v35  ;;  %6496 = vmatprep.mubr.f32.mxu0 %v8465_v40  ;;  %6609 = vmatprep.mubr.f32.mxu1 %v8468_v21  ;;  %v551_v45 = vpop.f32.mrf.mxu0 }
 0x153   : > { %v886_v26 = vpop.f32.mrf.mxu1 }
 0x154   : > { %10363 = vst [vmem:[#allocation57_spill] sm:$0xff] %v8474_v46  ;;  %v8484_v2 = vadd.f32 %v886_v26, %v551_v45  ;;  %v6209_v17 = vpop.f32.mrf.mxu0 }
 0x155   : > { %v6322_v55 = vpop.f32.mrf.mxu1  ;;  %6497 = vmatmul.mubr.f32.gmra.mxu0 %v8478_v30  ;;  %6610 = vmatmul.mubr.f32.gmra.mxu1 %v8482_v36 }
 0x156   : > { %10364 = vst [vmem:[#allocation58_spill] sm:$0xff] %v8484_v2  ;;  %v8488_v35 = vadd.f32 %v6322_v55, %v6209_v17  ;;  %6644 = vmatprep.mubr.f32.mxu0 %v7858_v34  ;;  %6757 = vmatprep.mubr.f32.mxu1 %v8158_v32  ;;  %v561_v8 = vpop.f32.mrf.mxu0 }
 0x157   : > { %v896_v46 = vpop.f32.mrf.mxu1 }
 0x158   : > { %v8492_v13 = vadd.f32 %v896_v46, %v561_v8  ;;  %v6212_v9 = vpop.f32.mrf.mxu0 }
 0x159   : > { %v6325_v40 = vpop.f32.mrf.mxu1  ;;  %6645 = vmatmul.mubr.f32.vlgmr.msra.gmra.mxu0 %v7863_v39  ;;  %6758 = vmatmul.mubr.f32.vlgmr.msra.gmra.mxu1 %v8167_v44 }
 0x15a   : > { %v8496_v45 = vadd.f32 %v6325_v40, %v6212_v9  ;;  %6647 = vmatprep.mubr.f32.mxu0 %v8155_v51  ;;  %6760 = vmatprep.mubr.f32.mxu1 %v8171_v57  ;;  %v571_v55 = vpop.f32.mrf.mxu0 }
 0x15b   : > { %v906_v34 = vpop.f32.mrf.mxu1 }
 0x15c   : > { %v8500_v17 = vadd.f32 %v906_v34, %v571_v55  ;;  %v6215_v26 = vpop.f32.mrf.mxu0 }
 0x15d   : > { %v6328_v2 = vpop.f32.mrf.mxu1  ;;  %6648 = vmatmul.mubr.f32.gmra.mxu0 %v8158_v32  ;;  %6761 = vmatmul.mubr.f32.gmra.mxu1 %v8179_v59 }
 0x15e   : > { %v8504_v46 = vadd.f32 %v6328_v2, %v6215_v26  ;;  %6650 = vmatprep.mubr.f32.mxu0 %v8167_v44  ;;  %6763 = vmatprep.mubr.f32.mxu1 %v8184_v33  ;;  %v581_v39 = vpop.f32.mrf.mxu0 }
 0x15f   : > { %v916_v51 = vpop.f32.mrf.mxu1 }
 0x160   : > { %v8508_v40 = vadd.f32 %v916_v51, %v581_v39  ;;  %v6218_v8 = vpop.f32.mrf.mxu0 }
 0x161   : > { %v6331_v9 = vpop.f32.mrf.mxu1  ;;  %6651 = vmatmul.mubr.f32.gmra.mxu0 %v8171_v57  ;;  %6764 = vmatmul.mubr.f32.gmra.mxu1 %v8193_v62 }
 0x162   : > { %v8512_v55 = vadd.f32 %v6331_v9, %v6218_v8  ;;  %6653 = vmatprep.mubr.f32.mxu0 %v8179_v59  ;;  %6766 = vmatprep.mubr.f32.mxu1 %v8196_v63  ;;  %v591_v2 = vpop.f32.mrf.mxu0 }
 0x163   : > { %v926_v34 = vpop.f32.mrf.mxu1 }
 0x164   : > { %v8516_v26 = vadd.f32 %v926_v34, %v591_v2  ;;  %v6221_v32 = vpop.f32.mrf.mxu0 }
 0x165   : > { %v6334_v44 = vpop.f32.mrf.mxu1  ;;  %6654 = vmatmul.mubr.f32.gmra.mxu0 %v8184_v33  ;;  %6767 = vmatmul.mubr.f32.gmra.mxu1 %v8205_v48 }
 0x166   : > { %v8520_v39 = vadd.f32 %v6334_v44, %v6221_v32  ;;  %6656 = vmatprep.mubr.f32.mxu0 %v8193_v62  ;;  %6769 = vmatprep.mubr.f32.mxu1 %v8209_v58  ;;  %v601_v57 = vpop.f32.mrf.mxu0 }
 0x167   : > { %v936_v51 = vpop.f32.mrf.mxu1 }
 0x168   : > { %v8524_v8 = vadd.f32 %v936_v51, %v601_v57  ;;  %v6224_v9 = vpop.f32.mrf.mxu0 }
 0x169   : > { %v6337_v59 = vpop.f32.mrf.mxu1  ;;  %6657 = vmatmul.mubr.f32.gmra.mxu0 %v8196_v63  ;;  %6770 = vmatmul.mubr.f32.gmra.mxu1 %v8217_v7 }
 0x16a   : > { %v8528_v2 = vadd.f32 %v6337_v59, %v6224_v9  ;;  %6659 = vmatprep.mubr.f32.mxu0 %v8205_v48  ;;  %6772 = vmatprep.mubr.f32.mxu1 %v8222_v50  ;;  %v611_v32 = vpop.f32.mrf.mxu0 }
 0x16b   : > { %v946_v44 = vpop.f32.mrf.mxu1 }
 0x16c   : > { %v8532_v62 = vadd.f32 %v946_v44, %v611_v32  ;;  %v6227_v34 = vpop.f32.mrf.mxu0 }
 0x16d   : > { %v6340_v33 = vpop.f32.mrf.mxu1  ;;  %6660 = vmatmul.mubr.f32.gmra.mxu0 %v8209_v58  ;;  %6773 = vmatmul.mubr.f32.gmra.mxu1 %v8231_v10 }
 0x16e   : > { %10365 = vst [vmem:[#allocation59_spill] sm:$0xff] %v8532_v62  ;;  %v8536_v57 = vadd.f32 %v6340_v33, %v6227_v34  ;;  %6662 = vmatprep.mubr.f32.mxu0 %v8217_v7  ;;  %6775 = vmatprep.mubr.f32.mxu1 %v8234_v11  ;;  %v621_v59 = vpop.f32.mrf.mxu0 }
 0x16f   : > { %v956_v51 = vpop.f32.mrf.mxu1 }
 0x170   : > { %v8540_v9 = vadd.f32 %v956_v51, %v621_v59  ;;  %v6230_v63 = vpop.f32.mrf.mxu0 }
 0x171   : > { %v6343_v48 = vpop.f32.mrf.mxu1  ;;  %6663 = vmatmul.mubr.f32.gmra.mxu0 %v8222_v50  ;;  %6776 = vmatmul.mubr.f32.gmra.mxu1 %v8243_v28 }
 0x172   : > { %10366 = vst [vmem:[#allocation60_spill] sm:$0xff] %v8540_v9  ;;  %v8544_v32 = vadd.f32 %v6343_v48, %v6230_v63  ;;  %6665 = vmatprep.mubr.f32.mxu0 %v8231_v10  ;;  %6778 = vmatprep.mubr.f32.mxu1 %v8247_v6  ;;  %v631_v33 = vpop.f32.mrf.mxu0 }
 0x173   : > { %v966_v58 = vpop.f32.mrf.mxu1 }
 0x174   : > { %v8548_v44 = vadd.f32 %v966_v58, %v631_v33  ;;  %v6233_v34 = vpop.f32.mrf.mxu0 }
 0x175   : > { %v6346_v7 = vpop.f32.mrf.mxu1  ;;  %6666 = vmatmul.mubr.f32.gmra.mxu0 %v8234_v11  ;;  %6779 = vmatmul.mubr.f32.gmra.mxu1 %v8255_v19 }
 0x176   : > { %10367 = vst [vmem:[#allocation61_spill] sm:$0xff] %v8548_v44  ;;  %v8552_v59 = vadd.f32 %v6346_v7, %v6233_v34  ;;  %6668 = vmatprep.mubr.f32.mxu0 %v8243_v28  ;;  %6781 = vmatprep.mubr.f32.mxu1 %v8260_v29  ;;  %v641_v63 = vpop.f32.mrf.mxu0 }
 0x177   : > { %v976_v48 = vpop.f32.mrf.mxu1 }
 0x178   : > { %v8556_v10 = vadd.f32 %v976_v48, %v641_v63  ;;  %v6236_v51 = vpop.f32.mrf.mxu0 }
 0x179   : > { %v6349_v50 = vpop.f32.mrf.mxu1  ;;  %6669 = vmatmul.mubr.f32.gmra.mxu0 %v8247_v6  ;;  %6782 = vmatmul.mubr.f32.gmra.mxu1 %v8269_v22 }
 0x17a   : > { %10368 = vst [vmem:[#allocation62_spill] sm:$0xff] %v8556_v10  ;;  %v8560_v33 = vadd.f32 %v6349_v50, %v6236_v51  ;;  %6671 = vmatprep.mubr.f32.mxu0 %v8255_v19  ;;  %6784 = vmatprep.mubr.f32.mxu1 %v8272_v23  ;;  %v651_v7 = vpop.f32.mrf.mxu0 }
 0x17b   : > { %v986_v58 = vpop.f32.mrf.mxu1 }
 0x17c   : > { %v8564_v34 = vadd.f32 %v986_v58, %v651_v7  ;;  %v6239_v11 = vpop.f32.mrf.mxu0 }
 0x17d   : > { %v6352_v28 = vpop.f32.mrf.mxu1  ;;  %6672 = vmatmul.mubr.f32.gmra.mxu0 %v8260_v29  ;;  %6785 = vmatmul.mubr.f32.gmra.mxu1 %v8281_v24 }
 0x17e   : > { %10369 = vst [vmem:[#allocation63_spill] sm:$0xff] %v8564_v34  ;;  %v8568_v63 = vadd.f32 %v6352_v28, %v6239_v11  ;;  %6674 = vmatprep.mubr.f32.mxu0 %v8269_v22  ;;  %6787 = vmatprep.mubr.f32.mxu1 %v8285_v18  ;;  %v661_v50 = vpop.f32.mrf.mxu0 }
 0x17f   : > { %v996_v6 = vpop.f32.mrf.mxu1 }
 0x180   : > { %v8572_v48 = vadd.f32 %v996_v6, %v661_v50  ;;  %v6242_v51 = vpop.f32.mrf.mxu0 }
 0x181   : > { %v6355_v19 = vpop.f32.mrf.mxu1  ;;  %6675 = vmatmul.mubr.f32.gmra.mxu0 %v8272_v23  ;;  %6788 = vmatmul.mubr.f32.gmra.mxu1 %v8293_v38 }
 0x182   : > { %10370 = vst [vmem:[#allocation64_spill] sm:$0xff] %v8572_v48  ;;  %v8576_v7 = vadd.f32 %v6355_v19, %v6242_v51  ;;  %6677 = vmatprep.mubr.f32.mxu0 %v8281_v24  ;;  %6790 = vmatprep.mubr.f32.mxu1 %v8298_v49  ;;  %v671_v11 = vpop.f32.mrf.mxu0 }
 0x183   : > { %v1006_v28 = vpop.f32.mrf.mxu1 }
 0x184   : > { %v8580_v22 = vadd.f32 %v1006_v28, %v671_v11  ;;  %v6245_v58 = vpop.f32.mrf.mxu0 }
 0x185   : > { %v6358_v29 = vpop.f32.mrf.mxu1  ;;  %6678 = vmatmul.mubr.f32.gmra.mxu0 %v8285_v18  ;;  %6791 = vmatmul.mubr.f32.gmra.mxu1 %v8307_v42 }
 0x186   : > { %10371 = vst [vmem:[#allocation65_spill] sm:$0xff] %v8580_v22  ;;  %v8584_v50 = vadd.f32 %v6358_v29, %v6245_v58  ;;  %6680 = vmatprep.mubr.f32.mxu0 %v8293_v38  ;;  %6793 = vmatprep.mubr.f32.mxu1 %v8310_v43  ;;  %v681_v19 = vpop.f32.mrf.mxu0 }
 0x187   : > { %v1016_v6 = vpop.f32.mrf.mxu1 }
 0x188   : > { %v8588_v51 = vadd.f32 %v1016_v6, %v681_v19  ;;  %v6248_v23 = vpop.f32.mrf.mxu0 }
 0x189   : > { %v6361_v24 = vpop.f32.mrf.mxu1  ;;  %6681 = vmatmul.mubr.f32.gmra.mxu0 %v8298_v49  ;;  %6794 = vmatmul.mubr.f32.gmra.mxu1 %v8319_v27 }
 0x18a   : > { %10372 = vst [vmem:[#allocation66_spill] sm:$0xff] %v8588_v51  ;;  %v8592_v11 = vadd.f32 %v6361_v24, %v6248_v23  ;;  %6683 = vmatprep.mubr.f32.mxu0 %v8307_v42  ;;  %6796 = vmatprep.mubr.f32.mxu1 %v8323_v37  ;;  %v691_v29 = vpop.f32.mrf.mxu0 }
 0x18b   : > { %v1026_v18 = vpop.f32.mrf.mxu1 }
 0x18c   : > { %v8596_v28 = vadd.f32 %v1026_v18, %v691_v29  ;;  %v6251_v58 = vpop.f32.mrf.mxu0 }
 0x18d   : > { %v6364_v38 = vpop.f32.mrf.mxu1  ;;  %6684 = vmatmul.mubr.f32.gmra.mxu0 %v8310_v43  ;;  %6797 = vmatmul.mubr.f32.gmra.mxu1 %v8331_v47 }
 0x18e   : > { %10373 = vst [vmem:[#allocation67_spill] sm:$0xff] %v8596_v28  ;;  %v8600_v19 = vadd.f32 %v6364_v38, %v6251_v58  ;;  %6686 = vmatprep.mubr.f32.mxu0 %v8319_v27  ;;  %6799 = vmatprep.mubr.f32.mxu1 %v8336_v54  ;;  %v701_v23 = vpop.f32.mrf.mxu0 }
 0x18f   : > { %v1036_v24 = vpop.f32.mrf.mxu1 }
 0x190   : > { %v8604_v42 = vadd.f32 %v1036_v24, %v701_v23  ;;  %v6254_v6 = vpop.f32.mrf.mxu0 }
 0x191   : > { %v6367_v49 = vpop.f32.mrf.mxu1  ;;  %6687 = vmatmul.mubr.f32.gmra.mxu0 %v8323_v37  ;;  %6800 = vmatmul.mubr.f32.gmra.mxu1 %v8345_v60 }
 0x192   : > { %10374 = vst [vmem:[#allocation68_spill] sm:$0xff] %v8604_v42  ;;  %v8608_v29 = vadd.f32 %v6367_v49, %v6254_v6  ;;  %6689 = vmatprep.mubr.f32.mxu0 %v8331_v47  ;;  %6802 = vmatprep.mubr.f32.mxu1 %v8348_v61  ;;  %v711_v38 = vpop.f32.mrf.mxu0  ;;  %v411_v42 = vld [vmem:[%s7811_s12 + $0x278] sm:$0xff] }
 0x193   : > { %v1046_v18 = vpop.f32.mrf.mxu1 }
 0x194   : > { %v8612_v58 = vadd.f32 %v1046_v18, %v711_v38  ;;  %v6257_v43 = vpop.f32.mrf.mxu0 }
 0x195   : > { %v6370_v27 = vpop.f32.mrf.mxu1  ;;  %6690 = vmatmul.mubr.f32.gmra.mxu0 %v8336_v54  ;;  %6803 = vmatmul.mubr.f32.gmra.mxu1 %v8357_v4 }
 0x196   : > { %10375 = vst [vmem:[#allocation69_spill] sm:$0xff] %v8612_v58  ;;  %v8616_v23 = vadd.f32 %v6370_v27, %v6257_v43  ;;  %6692 = vmatprep.mubr.f32.mxu0 %v8345_v60  ;;  %6805 = vmatprep.mubr.f32.mxu1 %v8361_v56  ;;  %v721_v49 = vpop.f32.mrf.mxu0 }
 0x197   : > { %v1056_v37 = vpop.f32.mrf.mxu1 }
 0x198   : > { %v8620_v24 = vadd.f32 %v1056_v37, %v721_v49  ;;  %v6260_v6 = vpop.f32.mrf.mxu0 }
 0x199   : > { %v6373_v47 = vpop.f32.mrf.mxu1  ;;  %6693 = vmatmul.mubr.f32.gmra.mxu0 %v8348_v61  ;;  %6806 = vmatmul.mubr.f32.gmra.mxu1 %v8369_v5 }
 0x19a   : > { %10376 = vst [vmem:[#allocation70_spill] sm:$0xff] %v8620_v24  ;;  %v8624_v38 = vadd.f32 %v6373_v47, %v6260_v6  ;;  %6695 = vmatprep.mubr.f32.mxu0 %v8357_v4  ;;  %6808 = vmatprep.mubr.f32.mxu1 %v8374_v31  ;;  %v731_v43 = vpop.f32.mrf.mxu0  ;;  %v10387_v24 = vld [vmem:[#allocation52_spill] sm:$0xff] }
 0x19b   : > { %v1066_v27 = vpop.f32.mrf.mxu1 }
 0x19c   : > { %v8628_v60 = vadd.f32 %v1066_v27, %v731_v43  ;;  %v6263_v18 = vpop.f32.mrf.mxu0 }
 0x19d   : > { %v6376_v54 = vpop.f32.mrf.mxu1  ;;  %6696 = vmatmul.mubr.f32.gmra.mxu0 %v8361_v56  ;;  %6809 = vmatmul.mubr.f32.gmra.mxu1 %v8383_v53 }
 0x19e   : > { %10377 = vst [vmem:[#allocation71_spill] sm:$0xff] %v8628_v60  ;;  %v8632_v49 = vadd.f32 %v6376_v54, %v6263_v18  ;;  %6698 = vmatprep.mubr.f32.mxu0 %v8369_v5  ;;  %6811 = vmatprep.mubr.f32.mxu1 %v8386_v12  ;;  %v741_v47 = vpop.f32.mrf.mxu0 }
 0x19f   : > { %v1076_v37 = vpop.f32.mrf.mxu1 }
 0x1a0   : > { %v8636_v6 = vadd.f32 %v1076_v37, %v741_v47  ;;  %v6266_v61 = vpop.f32.mrf.mxu0 }
 0x1a1   : > { %v6379_v4 = vpop.f32.mrf.mxu1  ;;  %6699 = vmatmul.mubr.f32.gmra.mxu0 %v8374_v31  ;;  %6812 = vmatmul.mubr.f32.gmra.mxu1 %v8395_v16 }
 0x1a2   : > { %10378 = vst [vmem:[#allocation72_spill] sm:$0xff] %v8636_v6  ;;  %v8640_v43 = vadd.f32 %v6379_v4, %v6266_v61  ;;  %6701 = vmatprep.mubr.f32.mxu0 %v8383_v53  ;;  %6814 = vmatprep.mubr.f32.mxu1 %v8399_v14  ;;  %v751_v54 = vpop.f32.mrf.mxu0 }
 0x1a3   : > { %v1086_v56 = vpop.f32.mrf.mxu1 }
 0x1a4   : > { %v8644_v27 = vadd.f32 %v1086_v56, %v751_v54  ;;  %v6269_v18 = vpop.f32.mrf.mxu0 }
 0x1a5   : > { %v6382_v5 = vpop.f32.mrf.mxu1  ;;  %6702 = vmatmul.mubr.f32.gmra.mxu0 %v8386_v12  ;;  %6815 = vmatmul.mubr.f32.gmra.mxu1 %v8409_v20 }
 0x1a6   : > { %10379 = vst [vmem:[#allocation73_spill] sm:$0xff] %v8644_v27  ;;  %v8648_v47 = vadd.f32 %v6382_v5, %v6269_v18  ;;  %6704 = vmatprep.mubr.f32.mxu0 %v8395_v16  ;;  %6817 = vmatprep.mubr.f32.mxu1 %v8414_v0  ;;  %v8652_v61 = vpop.f32.mrf.mxu0 }
 0x1a7   : > { %10380 = vst [vmem:[#allocation74_spill] sm:$0xff] %v8652_v61  ;;  %v8654_v4 = vpop.f32.mrf.mxu1 }
 0x1a8   : > { %10381 = vst [vmem:[#allocation75_spill] sm:$0xff] %v8654_v4  ;;  %v6272_v53 = vpop.f32.mrf.mxu0 }
 0x1a9   : > { %v6385_v37 = vpop.f32.mrf.mxu1  ;;  %6705 = vmatmul.mubr.f32.gmra.mxu0 %v8399_v14  ;;  %6818 = vmatmul.mubr.f32.gmra.mxu1 %v8427_v25  ;;  %v10384_v14 = vld [vmem:[#allocation45_spill] sm:$0xff] }
 0x1aa   : > { %v8658_v54 = vadd.f32 %v6385_v37, %v6272_v53  ;;  %6707 = vmatprep.mubr.f32.mxu0 %v8409_v20  ;;  %6820 = vmatprep.mubr.f32.mxu1 %v8430_v15  ;;  %v8662_v5 = vpop.f32.mrf.mxu0  ;;  %v7419_v53 = vld [vmem:[%s7811_s12 + $0x240] sm:$0xff]  ;;  %v7420_v20 = vld [vmem:[%s7811_s12 + $0x248] sm:$0xff] }
 0x1ab   : > { %10382 = vst [vmem:[#allocation76_spill] sm:$0xff] %v8662_v5  ;;  %v8664_v56 = vpop.f32.mrf.mxu1  ;;  %v2184_v37 = vrot.slane %v7419_v53, 2  ;;  %v2185_v31 = vrot.slane %v7420_v20, 2 }
 0x1ac   : > { %10383 = vst [vmem:[#allocation77_spill] sm:$0xff] %v8664_v56  ;;  %v6420_v18 = vpop.f32.mrf.mxu0 }
 0x1ad   : > { %6708 = vmatmul.mubr.f32.gmra.mxu0 %v8414_v0  ;;  %v6533_v12 = vpop.f32.mrf.mxu1  ;;  %6821 = vmatmul.mubr.f32.gmra.mxu1 %v8443_v3  ;;  %v1468_v16 = vadd.f32 %v6420_v18, %v10384_v14  ;;  %v407_v0 = vld [vmem:[%s7811_s12 + $0x258] sm:$0xff]  ;;  %v10385_v14 = vld [vmem:[#allocation49_spill] sm:$0xff] }
 0x1ae   : > { %6710 = vmatprep.mubr.f32.mxu0 %v8427_v25  ;;  %6823 = vmatprep.mubr.f32.mxu1 %v8447_v52  ;;  %v8673_v27 = vpop.f32.mrf.mxu0  ;;  %v7421_v25 = vld [vmem:[%s7811_s12 + $0x250] sm:$0xff]  ;;  %s7536_s12 = sshll.u32 %s7629_s5, 4  ;;  %s7537_s12 = int_to_ptr.vmem [resolvable:$false] %s7536_s12 }
 0x1af   : > { %v8675_v56 = vpop.f32.mrf.mxu1  ;;  %v8677_v5 = vadd.f32 %v6533_v12, %v1468_v16  ;;  %v2187_v18 = vrot.slane %v7421_v25, 2  ;;  %v2186_v12 = vsel %vm1593_vm0, %v2184_v37, %v2185_v31  ;;  %v2189_v16 = vrot.slane %v407_v0, 2  ;;  %s7538_s1 = scalar_lea.vmem %s7537_s12, 8192  ;;  %p7539_p5 = scmp.lt.s32.totalorder %s10168_s17, %s7537_s12 }
 0x1b0   : > { %v6423_v4 = vpop.f32.mrf.mxu0  ;;  %p7540_p11 = scmp.lt.s32.totalorder %s7538_s1, %s7532_s3 }
 0x1b1   : > { %6711 = vmatmul.mubr.f32.gmra.mxu0 %v8430_v15  ;;  %v6536_v61 = vpop.f32.mrf.mxu1  ;;  %6824 = vmatmul.mubr.f32.gmra.mxu1 %v8462_v1  ;;  %v1470_v6 = vadd.f32 %v6423_v4, %v10385_v14  ;;  %v2604_v4 = vrot.slane %v8458_v41, 2  ;;  %v10386_v14 = vld [vmem:[#allocation54_spill] sm:$0xff]  ;;  %v2188_v0 = vsel %vm1593_vm0, %v2185_v31, %v2187_v18 }
 0x1b2   : > { %6713 = vmatprep.mubr.f32.mxu0 %v8443_v3  ;;  %6826 = vmatprep.mubr.f32.mxu1 %v8468_v21  ;;  %v8686_v20 = vpop.f32.mrf.mxu0  ;;  %v2605_v3 = vrot.slane %v10386_v14, 2  ;;  %p7541_p2 = por %p7540_p11, %p7539_p5 }
 0x1b3   : > { %v8688_v53 = vpop.f32.mrf.mxu1  ;;  %v8691_v15 = vadd.f32 %v6536_v61, %v1470_v6  ;;  %v2607_v6 = vrot.slane %v8478_v30, 2  ;;  %v2609_v30 = vrot.slane %v411_v42, 2 }
 0x1b4   : > { %v6426_v60 = vpop.f32.mrf.mxu0  ;;  %v2606_v31 = vsel %vm1593_vm0, %v2604_v4, %v2605_v3  ;;  %p7542_p10 = pnand %p7541_p2, %p7535_p8 }
 0x1b5   : > { %6714 = vmatmul.mubr.f32.gmra.mxu0 %v8447_v52  ;;  %v6539_v25 = vpop.f32.mrf.mxu1  ;;  %6827 = vmatmul.mubr.f32.gmra.mxu1 %v8482_v36  ;;  %v1472_v58 = vadd.f32 %v6426_v60, %v10387_v24  ;;  %v2190_v52 = vsel %vm1593_vm0, %v2187_v18, %v2189_v16  ;;  %v10388_v60 = vld [vmem:[#allocation17_spill] sm:$0xff] }
 0x1b6   : > { %6716 = vmatprep.mubr.f32.mxu0 %v8462_v1  ;;  %6829 = vmatprep.mubr.f32.mxu1 %v2186_v12  ;;  %v8701_v61 = vpop.f32.mrf.mxu0 }
 0x1b7   : > { %v8703_v37 = vpop.f32.mrf.mxu1  ;;  %v8707_v28 = vadd.f32 %v6539_v25, %v1472_v58  ;;  %v2608_v58 = vsel %vm1593_vm0, %v2605_v3, %v2607_v6 }
 0x1b8   : > { %v6429_v41 = vpop.f32.mrf.mxu0 }
 0x1b9   : > { %6717 = vmatmul.mubr.f32.gmra.mxu0 %v8468_v21  ;;  %v6542_v24 = vpop.f32.mrf.mxu1  ;;  %6830 = vmatmul.mubr.f32.gmra.mxu1 %v2188_v0  ;;  %v1474_v14 = vadd.f32 %v6429_v41, %v10388_v60  ;;  %v10389_v21 = vld [vmem:[#allocation57_spill] sm:$0xff] }
 0x1ba   : > { %6719 = vmatprep.mubr.f32.mxu0 %v8482_v36  ;;  %6832 = vmatprep.mubr.f32.mxu1 %v2190_v52  ;;  %v8713_v1 = vpop.f32.mrf.mxu0  ;;  %v2610_v36 = vsel %vm1593_vm0, %v2607_v6, %v2609_v30 }
 0x1bb   : > { %v8715_v51 = vpop.f32.mrf.mxu1  ;;  %v8718_v18 = vadd.f32 %v6542_v24, %v1474_v14 }
 0x1bc   : > { %v6432_v16 = vpop.f32.mrf.mxu0 }
 0x1bd   : > { %6720 = vmatmul.mubr.f32.gmra.mxu0 %v2186_v12  ;;  %v6545_v25 = vpop.f32.mrf.mxu1  ;;  %6833 = vmatmul.mubr.f32.gmra.mxu1 %v2606_v31  ;;  %v1476_v41 = vadd.f32 %v6432_v16, %v10389_v21 }
 0x1be   : > { %6722 = vmatprep.mubr.f32.mxu0 %v2188_v0  ;;  %6835 = vmatprep.mubr.f32.mxu1 %v2608_v58  ;;  %v8722_v4 = vpop.f32.mrf.mxu0 }
 0x1bf   : > { %v8724_v42 = vpop.f32.mrf.mxu1  ;;  %v8726_v60 = vadd.f32 %v6545_v25, %v1476_v41 }
 0x1c0   : > { %v6435_v22 = vpop.f32.mrf.mxu0 }
 0x1c1   : > { %6723 = vmatmul.mubr.f32.gmra.mxu0 %v2190_v52  ;;  %v6548_v3 = vpop.f32.mrf.mxu1  ;;  %6836 = vmatmul.mubr.f32.gmra.mxu1 %v2610_v36  ;;  %v1478_v12 = vadd.f32 %v6435_v22, %v8488_v35 }
 0x1c2   : > { %v8729_v24 = vpop.f32.mrf.mxu0 }
 0x1c3   : > { %v8731_v14 = vpop.f32.mrf.mxu1  ;;  %v8733_v21 = vadd.f32 %v6548_v3, %v1478_v12 }
 0x1c4   : > { %v6438_v0 = vpop.f32.mrf.mxu0 }
 0x1c5   : > { %v6551_v6 = vpop.f32.mrf.mxu1  ;;  %v1480_v31 = vadd.f32 %v6438_v0, %v8496_v45 }
 0x1c6   : > { %v8736_v30 = vpop.f32.mrf.mxu0 }
 0x1c7   : > { %v8738_v58 = vpop.f32.mrf.mxu1  ;;  %v8740_v16 = vadd.f32 %v6551_v6, %v1480_v31 }
 0x1c8   : > { %v6441_v52 = vpop.f32.mrf.mxu0 }
 0x1c9   : > { %v6554_v25 = vpop.f32.mrf.mxu1  ;;  %v1482_v35 = vadd.f32 %v6441_v52, %v8504_v46 }
 0x1ca   : > { %v8743_v22 = vpop.f32.mrf.mxu0 }
 0x1cb   : > { %v8745_v41 = vpop.f32.mrf.mxu1  ;;  %v8747_v36 = vadd.f32 %v6554_v25, %v1482_v35 }
 0x1cc   : > { %v6444_v3 = vpop.f32.mrf.mxu0 }
 0x1cd   : > { %v6557_v12 = vpop.f32.mrf.mxu1  ;;  %v1484_v45 = vadd.f32 %v6444_v3, %v8512_v55 }
 0x1ce   : > { %v8750_v0 = vpop.f32.mrf.mxu0 }
 0x1cf   : > { %v8752_v48 = vpop.f32.mrf.mxu1  ;;  %v8754_v6 = vadd.f32 %v6557_v12, %v1484_v45 }
 0x1d0   : > { %v6447_v31 = vpop.f32.mrf.mxu0 }
 0x1d1   : > { %10390 = vst [vmem:[#allocation45_spill] sm:$0xff] %v8754_v6  ;;  %v6560_v34 = vpop.f32.mrf.mxu1  ;;  %v1486_v46 = vadd.f32 %v6447_v31, %v8520_v39 }
 0x1d2   : > { %v8757_v52 = vpop.f32.mrf.mxu0 }
 0x1d3   : > { %v8759_v10 = vpop.f32.mrf.mxu1  ;;  %v8761_v25 = vadd.f32 %v6560_v34, %v1486_v46 }
 0x1d4   : > { %v6450_v35 = vpop.f32.mrf.mxu0 }
 0x1d5   : > { %10391 = vst [vmem:[#allocation49_spill] sm:$0xff] %v8761_v25  ;;  %v6563_v44 = vpop.f32.mrf.mxu1  ;;  %v1488_v55 = vadd.f32 %v6450_v35, %v8528_v2 }
 0x1d6   : > { %v8764_v3 = vpop.f32.mrf.mxu0 }
 0x1d7   : > { %10392 = vst [vmem:[#allocation54_spill] sm:$0xff] %v8764_v3  ;;  %v8766_v9 = vpop.f32.mrf.mxu1  ;;  %v8768_v12 = vadd.f32 %v6563_v44, %v1488_v55 }
 0x1d8   : > { %10393 = vst [vmem:[#allocation52_spill] sm:$0xff] %v8766_v9  ;;  %v6453_v45 = vpop.f32.mrf.mxu0 }
 0x1d9   : > { %10394 = vst [vmem:[#allocation17_spill] sm:$0xff] %v8768_v12  ;;  %v6566_v62 = vpop.f32.mrf.mxu1  ;;  %v1490_v39 = vadd.f32 %v6453_v45, %v8536_v57 }
 0x1da   : > { %v8771_v31 = vpop.f32.mrf.mxu0 }
 0x1db   : > { %v8773_v6 = vpop.f32.mrf.mxu1  ;;  %v8775_v34 = vadd.f32 %v6566_v62, %v1490_v39  ;;  %v3523_v62 = vld [vmem:[#allocation7 + $0xf8] sm:$0xff] }
 0x1dc   : > { %v6456_v46 = vpop.f32.mrf.mxu0  ;;  %6838 = vmatprep.subr.mxu0 %v3523_v62 }
 0x1dd   : > { %10395 = vst [vmem:[#allocation57_spill] sm:$0xff] %v8775_v34  ;;  %v6569_v25 = vpop.f32.mrf.mxu1  ;;  %v1492_v2 = vadd.f32 %v6456_v46, %v8544_v32  ;;  %6839 = vmatpush3.msra.mxu0 %v3523_v62  ;;  %v3506_v46 = vld [vmem:[#allocation7 + $0x78] sm:$0xff] }
 0x1de   : > { %v8778_v35 = vpop.f32.mrf.mxu0  ;;  %6918 = vmatprep.subr.mxu1 %v3506_v46 }
 0x1df   : > { %v8780_v3 = vpop.f32.mrf.mxu1  ;;  %v8782_v44 = vadd.f32 %v6569_v25, %v1492_v2  ;;  %6919 = vmatpush3.msra.mxu1 %v3506_v46 }
 0x1e0   : > { %10396 = vst [vmem:[#allocation78_spill] sm:$0xff] %v8780_v3  ;;  %v6459_v55 = vpop.f32.mrf.mxu0 }
 0x1e1   : > { %v6572_v12 = vpop.f32.mrf.mxu1  ;;  %v1494_v57 = vadd.f32 %v6459_v55, %v8552_v59  ;;  %v3522_v55 = vld [vmem:[#allocation7 + $0xf0] sm:$0xff] }
 0x1e2   : > { %v8785_v45 = vpop.f32.mrf.mxu0  ;;  %6840 = vmatprep.subr.mxu0 %v3522_v55 }
 0x1e3   : > { %10397 = vst [vmem:[#allocation79_spill] sm:$0xff] %v8785_v45  ;;  %v8787_v9 = vpop.f32.mrf.mxu1  ;;  %v8789_v39 = vadd.f32 %v6572_v12, %v1494_v57  ;;  %6841 = vmatpush3.msra.mxu0 %v3522_v55  ;;  %v3505_v57 = vld [vmem:[#allocation7 + $0x70] sm:$0xff] }
 0x1e4   : > { %10398 = vst [vmem:[#allocation80_spill] sm:$0xff] %v8787_v9  ;;  %v6462_v34 = vpop.f32.mrf.mxu0  ;;  %6920 = vmatprep.subr.mxu1 %v3505_v57 }
 0x1e5   : > { %10399 = vst [vmem:[#allocation81_spill] sm:$0xff] %v8789_v39  ;;  %v6575_v32 = vpop.f32.mrf.mxu1  ;;  %v1496_v3 = vadd.f32 %v6462_v34, %v8560_v33  ;;  %6921 = vmatpush3.msra.mxu1 %v3505_v57  ;;  %v3504_v57 = vld [vmem:[#allocation7 + $0x68] sm:$0xff] }
 0x1e6   : > { %v8792_v25 = vpop.f32.mrf.mxu0  ;;  %6922 = vmatprep.subr.mxu1 %v3504_v57 }
 0x1e7   : > { %v8794_v2 = vpop.f32.mrf.mxu1  ;;  %v8796_v59 = vadd.f32 %v6575_v32, %v1496_v3  ;;  %6923 = vmatpush3.msra.mxu1 %v3504_v57 }
 0x1e8   : > { %10400 = vst [vmem:[#allocation82_spill] sm:$0xff] %v8794_v2  ;;  %v6465_v9 = vpop.f32.mrf.mxu0 }
 0x1e9   : > { %10401 = vst [vmem:[#allocation83_spill] sm:$0xff] %v8796_v59  ;;  %v6578_v45 = vpop.f32.mrf.mxu1  ;;  %v1498_v12 = vadd.f32 %v6465_v9, %v8568_v63 }
 0x1ea   : > { %v8799_v62 = vpop.f32.mrf.mxu0 }
 0x1eb   : > { %10402 = vst [vmem:[#allocation84_spill] sm:$0xff] %v8799_v62  ;;  %v8801_v39 = vpop.f32.mrf.mxu1  ;;  %v8803_v33 = vadd.f32 %v6578_v45, %v1498_v12  ;;  %v3521_v45 = vld [vmem:[#allocation7 + $0xe8] sm:$0xff] }
 0x1ec   : > { %10403 = vst [vmem:[#allocation85_spill] sm:$0xff] %v8801_v39  ;;  %v6468_v34 = vpop.f32.mrf.mxu0  ;;  %6842 = vmatprep.subr.mxu0 %v3521_v45 }
 0x1ed   : > { %v6581_v46 = vpop.f32.mrf.mxu1  ;;  %v1500_v3 = vadd.f32 %v6468_v34, %v8576_v7  ;;  %6843 = vmatpush3.msra.mxu0 %v3521_v45 }
 0x1ee   : > { %v8806_v32 = vpop.f32.mrf.mxu0 }
 0x1ef   : > { %v8808_v59 = vpop.f32.mrf.mxu1  ;;  %v8810_v2 = vadd.f32 %v6581_v46, %v1500_v3  ;;  %v3520_v3 = vld [vmem:[#allocation7 + $0xe0] sm:$0xff] }
 0x1f0   : > { %v6471_v9 = vpop.f32.mrf.mxu0  ;;  %6844 = vmatprep.subr.mxu0 %v3520_v3 }
 0x1f1   : > { %10404 = vst [vmem:[#allocation86_spill] sm:$0xff] %v8810_v2  ;;  %v6584_v63 = vpop.f32.mrf.mxu1  ;;  %v1502_v55 = vadd.f32 %v6471_v9, %v8584_v50  ;;  %6845 = vmatpush3.msra.mxu0 %v3520_v3  ;;  %v3519_v3 = vld [vmem:[#allocation7 + $0xd8] sm:$0xff] }
 0x1f2   : > { %v8813_v62 = vpop.f32.mrf.mxu0  ;;  %6846 = vmatprep.subr.mxu0 %v3519_v3 }
 0x1f3   : > { %v8815_v39 = vpop.f32.mrf.mxu1  ;;  %v8817_v12 = vadd.f32 %v6584_v63, %v1502_v55  ;;  %v3503_v63 = vld [vmem:[#allocation7 + $0x60] sm:$0xff]  ;;  %6847 = vmatpush3.msra.mxu0 %v3519_v3 }
 0x1f4   : > { %10405 = vst [vmem:[#allocation87_spill] sm:$0xff] %v8815_v39  ;;  %v6474_v7 = vpop.f32.mrf.mxu0  ;;  %6924 = vmatprep.subr.mxu1 %v3503_v63 }
 0x1f5   : > { %10406 = vst [vmem:[#allocation88_spill] sm:$0xff] %v8817_v12  ;;  %v6587_v34 = vpop.f32.mrf.mxu1  ;;  %v1504_v46 = vadd.f32 %v6474_v7, %v8592_v11  ;;  %6925 = vmatpush3.msra.mxu1 %v3503_v63 }
 0x1f6   : > { %v8820_v2 = vpop.f32.mrf.mxu0 }
 0x1f7   : > { %10407 = vst [vmem:[#allocation89_spill] sm:$0xff] %v8820_v2  ;;  %v8822_v50 = vpop.f32.mrf.mxu1  ;;  %v8824_v9 = vadd.f32 %v6587_v34, %v1504_v46 }
 0x1f8   : > { %10408 = vst [vmem:[#allocation90_spill] sm:$0xff] %v8822_v50  ;;  %v6477_v55 = vpop.f32.mrf.mxu0 }
 0x1f9   : > { %10409 = vst [vmem:[#allocation91_spill] sm:$0xff] %v8824_v9  ;;  %v6590_v12 = vpop.f32.mrf.mxu1  ;;  %v1506_v39 = vadd.f32 %v6477_v55, %v8600_v19  ;;  %v3502_v19 = vld [vmem:[#allocation7 + $0x58] sm:$0xff] }
 0x1fa   : > { %v8827_v45 = vpop.f32.mrf.mxu0  ;;  %6926 = vmatprep.subr.mxu1 %v3502_v19 }
 0x1fb   : > { %v8829_v11 = vpop.f32.mrf.mxu1  ;;  %v8831_v57 = vadd.f32 %v6590_v12, %v1506_v39  ;;  %6927 = vmatpush3.msra.mxu1 %v3502_v19 }
 0x1fc   : > { %10410 = vst [vmem:[#allocation92_spill] sm:$0xff] %v8829_v11  ;;  %v6480_v7 = vpop.f32.mrf.mxu0 }
 0x1fd   : > { %10411 = vst [vmem:[#allocation93_spill] sm:$0xff] %v8831_v57  ;;  %v6593_v2 = vpop.f32.mrf.mxu1  ;;  %v1508_v50 = vadd.f32 %v6480_v7, %v8608_v29  ;;  %v3518_v7 = vld [vmem:[#allocation7 + $0xd0] sm:$0xff] }
 0x1fe   : > { %v8834_v34 = vpop.f32.mrf.mxu0  ;;  %6848 = vmatprep.subr.mxu0 %v3518_v7 }
 0x1ff   : > { %v8836_v46 = vpop.f32.mrf.mxu1  ;;  %v8838_v9 = vadd.f32 %v6593_v2, %v1508_v50  ;;  %6849 = vmatpush3.msra.mxu0 %v3518_v7 }
 0x200   : > { %10412 = vst [vmem:[#allocation94_spill] sm:$0xff] %v8836_v46  ;;  %v6483_v63 = vpop.f32.mrf.mxu0 }
 0x201   : > { %10413 = vst [vmem:[#allocation95_spill] sm:$0xff] %v8838_v9  ;;  %v6596_v55 = vpop.f32.mrf.mxu1  ;;  %v1510_v39 = vadd.f32 %v6483_v63, %v8616_v23  ;;  %v3501_v63 = vld [vmem:[#allocation7 + $0x50] sm:$0xff] }
 0x202   : > { %v8841_v12 = vpop.f32.mrf.mxu0  ;;  %6928 = vmatprep.subr.mxu1 %v3501_v63 }
 0x203   : > { %v8843_v57 = vpop.f32.mrf.mxu1  ;;  %v8845_v29 = vadd.f32 %v6596_v55, %v1510_v39  ;;  %6929 = vmatpush3.msra.mxu1 %v3501_v63 }
 0x204   : > { %10414 = vst [vmem:[#allocation96_spill] sm:$0xff] %v8843_v57  ;;  %v6486_v46 = vpop.f32.mrf.mxu0 }
 0x205   : > { %10415 = vst [vmem:[#allocation97_spill] sm:$0xff] %v8845_v29  ;;  %v6599_v11 = vpop.f32.mrf.mxu1  ;;  %v1512_v2 = vadd.f32 %v6486_v46, %v8624_v38 }
 0x206   : > { %v8848_v50 = vpop.f32.mrf.mxu0 }
 0x207   : > { %10416 = vst [vmem:[#allocation98_spill] sm:$0xff] %v8848_v50  ;;  %v8850_v3 = vpop.f32.mrf.mxu1  ;;  %v8852_v9 = vadd.f32 %v6599_v11, %v1512_v2  ;;  %v3500_v11 = vld [vmem:[#allocation7 + $0x48] sm:$0xff]  ;;  %v3516_v2 = vld [vmem:[#allocation7 + $0xc0] sm:$0xff] }
 0x208   : > { %10417 = vst [vmem:[#allocation99_spill] sm:$0xff] %v8850_v3  ;;  %v6489_v23 = vpop.f32.mrf.mxu0  ;;  %v3517_v3 = vld [vmem:[#allocation7 + $0xc8] sm:$0xff]  ;;  %6930 = vmatprep.subr.mxu1 %v3500_v11 }
 0x209   : > { %10418 = vst [vmem:[#allocation100_spill] sm:$0xff] %v8852_v9  ;;  %v6602_v19 = vpop.f32.mrf.mxu1  ;;  %v1514_v57 = vadd.f32 %v6489_v23, %v8632_v49  ;;  %6850 = vmatprep.subr.mxu0 %v3517_v3  ;;  %v3499_v49 = vld [vmem:[#allocation7 + $0x40] sm:$0xff]  ;;  %6931 = vmatpush3.msra.mxu1 %v3500_v11  ;;  %v3496_v11 = vld [vmem:[#allocation7 + $0x28] sm:$0xff] }
 0x20a   : > { %v8855_v55 = vpop.f32.mrf.mxu0  ;;  %6851 = vmatpush3.msra.mxu0 %v3517_v3  ;;  %6932 = vmatprep.subr.mxu1 %v3499_v49 }
 0x20b   : > { %v8857_v39 = vpop.f32.mrf.mxu1  ;;  %v8859_v29 = vadd.f32 %v6602_v19, %v1514_v57  ;;  %v3515_v57 = vld [vmem:[#allocation7 + $0xb8] sm:$0xff]  ;;  %6852 = vmatprep.subr.mxu0 %v3516_v2  ;;  %6933 = vmatpush3.msra.mxu1 %v3499_v49 }
 0x20c   : > { %10419 = vst [vmem:[#allocation101_spill] sm:$0xff] %v8857_v39  ;;  %v3498_v19 = vld [vmem:[#allocation7 + $0x38] sm:$0xff]  ;;  %6853 = vmatpush3.msra.mxu0 %v3516_v2  ;;  %v3513_v39 = vld [vmem:[#allocation7 + $0xa8] sm:$0xff] }
 0x20d   : > { %10420 = vst [vmem:[#allocation102_spill] sm:$0xff] %v8859_v29  ;;  %v6492_v38 = vpop.f32.mrf.mxu0  ;;  %v6605_v46 = vpop.f32.mrf.mxu1  ;;  %6854 = vmatprep.subr.mxu0 %v3515_v57  ;;  %6934 = vmatprep.subr.mxu1 %v3498_v19 }
 0x20e   : > { %v1516_v7 = vadd.f32 %v6492_v38, %v8640_v43  ;;  %6855 = vmatpush3.msra.mxu0 %v3515_v57  ;;  %6935 = vmatpush3.msra.mxu1 %v3498_v19  ;;  %v3494_v57 = vld [vmem:[#allocation7 + $0x18] sm:$0xff] }
 0x20f   : > { %v8862_v9 = vpop.f32.mrf.mxu0  ;;  %v8864_v50 = vpop.f32.mrf.mxu1 }
 0x210   : > { %10421 = vst [vmem:[#allocation103_spill] sm:$0xff] %v8862_v9  ;;  %10422 = vst [vmem:[#allocation104_spill] sm:$0xff] %v8864_v50  ;;  %v8866_v23 = vadd.f32 %v6605_v46, %v1516_v7  ;;  %v3497_v46 = vld [vmem:[#allocation7 + $0x30] sm:$0xff] }
 0x211   : > { %v6495_v63 = vpop.f32.mrf.mxu0  ;;  %v6608_v29 = vpop.f32.mrf.mxu1  ;;  %v3514_v7 = vld [vmem:[#allocation7 + $0xb0] sm:$0xff]  ;;  %6936 = vmatprep.subr.mxu1 %v3497_v46 }
 0x212   : > { %10423 = vst [vmem:[#allocation105_spill] sm:$0xff] %v8866_v23  ;;  %v1518_v43 = vadd.f32 %v6495_v63, %v8648_v47  ;;  %6856 = vmatprep.subr.mxu0 %v3514_v7  ;;  %v10427_v47 = vld [vmem:[#allocation48_spill] sm:$0xff]  ;;  %6937 = vmatpush3.msra.mxu1 %v3497_v46  ;;  %v3495_v63 = vld [vmem:[#allocation7 + $0x20] sm:$0xff] }
 0x213   : > { %v8869_v38 = vpop.f32.mrf.mxu0  ;;  %v8871_v50 = vpop.f32.mrf.mxu1  ;;  %v1467_v2 = vadd.f32 %v8673_v27, %v10427_v47  ;;  %6857 = vmatpush3.msra.mxu0 %v3514_v7  ;;  %6938 = vmatprep.subr.mxu1 %v3496_v11  ;;  %v10431_v27 = vld [vmem:[#allocation51_spill] sm:$0xff]  ;;  %v8891_v46 = vld [vmem:[%s10221_s2] ss:$0 sm:$0xff] }
 0x214   : > { %10424 = vst [vmem:[#allocation106_spill] sm:$0xff] %v8869_v38  ;;  %10425 = vst [vmem:[#allocation107_spill] sm:$0xff] %v8871_v50  ;;  %v8873_v3 = vadd.f32 %v6608_v29, %v1518_v43  ;;  %6939 = vmatpush3.msra.mxu1 %v3496_v11  ;;  %6858 = vmatprep.subr.mxu0 %v3513_v39 }
 0x215   : > { %v6498_v23 = vpop.f32.mrf.mxu0  ;;  %v6611_v9 = vpop.f32.mrf.mxu1  ;;  %6940 = vmatprep.subr.mxu1 %v3495_v63  ;;  %6859 = vmatpush3.msra.mxu0 %v3513_v39  ;;  %v10434_v39 = vld [vmem:[#allocation58_spill] sm:$0xff] }
 0x216   : > { %10426 = vst [vmem:[#allocation108_spill] sm:$0xff] %v8873_v3  ;;  %v1520_v49 = vadd.f32 %v6498_v23, %v8658_v54  ;;  %v2126_v3 = vadd.f32 %v8675_v56, %v1467_v2  ;;  %v1469_v54 = vadd.f32 %v8686_v20, %v10431_v27  ;;  %6941 = vmatpush3.msra.mxu1 %v3495_v63  ;;  %v8895_v2 = vld [vmem:[#allocation8 + $0x8] sm:$0xff] }
 0x217   : > { %v8878_v50 = vpop.f32.mrf.mxu0  ;;  %v8880_v38 = vpop.f32.mrf.mxu1  ;;  %6942 = vmatprep.subr.mxu1 %v3494_v57 }
 0x218   : > { %10428 = vst [vmem:[#allocation48_spill] sm:$0xff] %v8878_v50  ;;  %10429 = vst [vmem:[#allocation109_spill] sm:$0xff] %v8880_v38  ;;  %v8882_v29 = vadd.f32 %v6611_v9, %v1520_v49  ;;  %6943 = vmatpush3.msra.mxu1 %v3494_v57  ;;  %v2128_v56 = vadd.f32 %v8688_v53, %v1469_v54  ;;  %v3492_v54 = vld [vmem:[#allocation7 + $0x8] sm:$0xff] }
 0x219   : > { %v6646_v19 = vpop.f32.mrf.mxu0  ;;  %v6759_v43 = vpop.f32.mrf.mxu1 }
 0x21a   : > { %10430 = vst [vmem:[#allocation110_spill] sm:$0xff] %v8882_v29  ;;  %v2547_v23 = vadd.f32 %v6646_v19, %v8677_v5  ;;  %v10432_v19 = vld [vmem:[#allocation53_spill] sm:$0xff] }
 0x21b   : > { %v2277_v9 = vpop.f32.mrf.mxu0  ;;  %v2697_v7 = vpop.f32.mrf.mxu1  ;;  %v1471_v27 = vadd.f32 %v8701_v61, %v10432_v19 }
 0x21c   : > { %v2967_v11 = vadd.f32 %v6759_v43, %v2547_v23  ;;  %v2546_v47 = vadd.f32 %v2277_v9, %v2126_v3  ;;  %v3493_v43 = vld [vmem:[#allocation7 + $0x10] sm:$0xff]  ;;  %v3512_v3 = vld [vmem:[#allocation7 + $0xa0] sm:$0xff] }
 0x21d   : > { %v6649_v49 = vpop.f32.mrf.mxu0  ;;  %v6762_v29 = vpop.f32.mrf.mxu1  ;;  %6944 = vmatprep.subr.mxu1 %v3493_v43  ;;  %6860 = vmatprep.subr.mxu0 %v3512_v3 }
 0x21e   : > { %v3028_v20 = vadd.f32 %v8891_v46, %v2967_v11  ;;  %v2966_v5 = vadd.f32 %v2697_v7, %v2546_v47  ;;  %v2549_v63 = vadd.f32 %v6649_v49, %v8691_v15  ;;  %v10433_v11 = vld [vmem:[#allocation56_spill] sm:$0xff]  ;;  %v8903_v15 = vld [vmem:[#allocation8] sm:$0xff]  ;;  %6945 = vmatpush3.msra.mxu1 %v3493_v43  ;;  %6861 = vmatpush3.msra.mxu0 %v3512_v3 }
 0x21f   : > { %v2287_v38 = vpop.f32.mrf.mxu0  ;;  %v2707_v50 = vpop.f32.mrf.mxu1  ;;  %v1473_v7 = vadd.f32 %v8713_v1, %v10433_v11  ;;  %6946 = vmatprep.subr.mxu1 %v3492_v54  ;;  %v3491_v11 = vld [vmem:[#allocation7] sm:$0xff]  ;;  %v1475_v43 = vadd.f32 %v8722_v4, %v10434_v39 }
 0x220   : > { %v3082_v57 = vmax.f32 %v3028_v20, 0.0  ;;  %v3027_v23 = vadd.f32 %v8891_v46, %v2966_v5  ;;  %v2969_v9 = vadd.f32 %v6762_v29, %v2549_v63  ;;  %v2548_v53 = vadd.f32 %v2287_v38, %v2128_v56  ;;  %6947 = vmatpush3.msra.mxu1 %v3492_v54  ;;  %v3511_v63 = vld [vmem:[#allocation7 + $0x98] sm:$0xff]  ;;  %v3510_v54 = vld [vmem:[#allocation7 + $0x90] sm:$0xff] }
 0x221   : > { %v6652_v47 = vpop.f32.mrf.mxu0  ;;  %v6765_v61 = vpop.f32.mrf.mxu1  ;;  %v2130_v38 = vadd.f32 %v8703_v37, %v1471_v27  ;;  %6862 = vmatprep.subr.mxu0 %v3511_v63  ;;  %6948 = vmatprep.subr.mxu1 %v3491_v11  ;;  %v8915_v27 = vld [vmem:[#allocation8 + $0x10] sm:$0xff]  ;;  %v2132_v4 = vadd.f32 %v8715_v51, %v1473_v7 }
 0x222   : > { %v3139_v49 = vmul.f32 %v8895_v2, %v3082_v57  ;;  %v3081_v19 = vmax.f32 %v3027_v23, 0.0  ;;  %v3030_v20 = vadd.f32 %v8891_v46, %v2969_v9  ;;  %v2968_v5 = vadd.f32 %v2707_v50, %v2548_v53  ;;  %6863 = vmatpush3.msra.mxu0 %v3511_v63  ;;  %6949 = vmatpush3.msra.mxu1 %v3491_v11 }
 0x223   : > { %v2551_v29 = vadd.f32 %v6652_v47, %v8707_v28  ;;  %v2297_v56 = vpop.f32.mrf.mxu0  ;;  %v2717_v1 = vpop.f32.mrf.mxu1  ;;  %v3509_v47 = vld [vmem:[#allocation7 + $0x88] sm:$0xff]  ;;  %6864 = vmatprep.subr.mxu0 %v3510_v54 }
 0x224   : > { %v3138_v57 = vmul.f32 %v8903_v15, %v3081_v19  ;;  %v3029_v23 = vadd.f32 %v8891_v46, %v2968_v5  ;;  %v8913_v50 = vmul.f32 0.0, %v3139_v49  ;;  %v3084_v37 = vmax.f32 %v3030_v20, 0.0  ;;  %6865 = vmatpush3.msra.mxu0 %v3510_v54 }
 0x225   : > { %v2971_v28 = vadd.f32 %v6765_v61, %v2551_v29  ;;  %v2550_v9 = vadd.f32 %v2297_v56, %v2130_v38  ;;  %v6655_v3 = vpop.f32.mrf.mxu0  ;;  %v6768_v53 = vpop.f32.mrf.mxu1  ;;  %v1477_v49 = vadd.f32 %v8729_v24, %v8492_v13  ;;  %6866 = vmatprep.subr.mxu0 %v3509_v47 }
 0x226   : > { %v8918_v19 = vmul.f32 0.0, %v3138_v57  ;;  %v3083_v5 = vmax.f32 %v3029_v23, 0.0  ;;  %v2553_v39 = vadd.f32 %v6655_v3, %v8718_v18  ;;  %v2134_v18 = vadd.f32 %v8724_v42, %v1475_v43  ;;  %6867 = vmatpush3.msra.mxu0 %v3509_v47  ;;  %v3508_v23 = vld [vmem:[#allocation7 + $0x80] sm:$0xff] }
 0x227   : > { %v3032_v61 = vadd.f32 %v8891_v46, %v2971_v28  ;;  %v2970_v20 = vadd.f32 %v2717_v1, %v2550_v9  ;;  %v2307_v38 = vpop.f32.mrf.mxu0  ;;  %v2727_v29 = vpop.f32.mrf.mxu1  ;;  %v8928_v11 = vmul.f32 %v8903_v15, %v3084_v37  ;;  %v3258_v57 = vrot.slane %v8913_v50, 1  ;;  %6868 = vmatprep.subr.mxu0 %v3508_v23 }
 0x228   : > { %v3140_v56 = vmul.f32 %v8915_v27, %v3083_v5  ;;  %v2973_v63 = vadd.f32 %v6768_v53, %v2553_v39  ;;  %v2552_v51 = vadd.f32 %v2307_v38, %v2132_v4  ;;  %v3257_v7 = vrot.slane %v8918_v19, 1  ;;  %6869 = vmatpush3.msra.mxu0 %v3508_v23 }
 0x229   : > { %v3031_v13 = vadd.f32 %v8891_v46, %v2970_v20  ;;  %v6658_v24 = vpop.f32.mrf.mxu0  ;;  %v6771_v1 = vpop.f32.mrf.mxu1  ;;  %v3086_v9 = vmax.f32 %v3032_v61, 0.0  ;;  %v2136_v42 = vadd.f32 %v8731_v14, %v1477_v49  ;;  %v1479_v47 = vadd.f32 %v8736_v30, %v8500_v17 }
 0x22a   : > { %v8932_v28 = vmul.f32 0.0, %v3140_v56  ;;  %v2972_v3 = vadd.f32 %v2727_v29, %v2552_v51  ;;  %v2555_v53 = vadd.f32 %v6658_v24, %v8726_v60  ;;  %v3034_v37 = vadd.f32 %v8891_v46, %v2973_v63 }
 0x22b   : > { %v3085_v43 = vmax.f32 %v3031_v13, 0.0  ;;  %v2317_v54 = vpop.f32.mrf.mxu0  ;;  %v3259_v4 = vsel %vm3256_vm1, %v3257_v7, %v3258_v57  ;;  %v2737_v5 = vpop.f32.mrf.mxu1  ;;  %v1481_v39 = vadd.f32 %v8743_v22, %v8508_v40  ;;  %v3262_v56 = vrot.slane %v8928_v11, 1 }
 0x22c   : > { %v3033_v61 = vadd.f32 %v8891_v46, %v2972_v3  ;;  %v2975_v60 = vadd.f32 %v6771_v1, %v2555_v53  ;;  %3383 = vrot.lane.b32.xlu1 %v3259_v4, %s7628_s7  ;;  %v2554_v49 = vadd.f32 %v2317_v54, %v2134_v18  ;;  %v3260_v29 = vrot.slane %v8932_v28, 1 }
 0x22d   : > { %v8945_v14 = vmul.f32 %v8895_v2, %v3085_v43  ;;  %v6661_v20 = vpop.f32.mrf.mxu0  ;;  %v6774_v38 = vpop.f32.mrf.mxu1  ;;  %v8950_v17 = vmul.f32 %v8915_v27, %v3086_v9  ;;  %v3088_v63 = vmax.f32 %v3034_v37, 0.0  ;;  %v2138_v1 = vadd.f32 %v8738_v58, %v1479_v47 }
 0x22e   : > { %v3087_v40 = vmax.f32 %v3033_v61, 0.0  ;;  %v3036_v30 = vadd.f32 %v8891_v46, %v2975_v60  ;;  %v2557_v22 = vadd.f32 %v6661_v20, %v8733_v21  ;;  %v2974_v51 = vadd.f32 %v2737_v5, %v2554_v49 }
 0x22f   : > { %10435 = vst [vmem:[#allocation51_spill] sm:$0xff] %v8950_v17  ;;  %v2327_v7 = vpop.f32.mrf.mxu0  ;;  %v3261_v13 = vsel %vm3256_vm1, %v3258_v57, %v3260_v29  ;;  %v2747_v18 = vpop.f32.mrf.mxu1  ;;  %v3263_v24 = vrot.slane %v8945_v14, 1  ;;  %v1483_v9 = vadd.f32 %v8750_v0, %v8516_v26  ;;  %v2140_v5 = vadd.f32 %v8745_v41, %v1481_v39 }
 0x230   : > { %v2977_v23 = vadd.f32 %v6774_v38, %v2557_v22  ;;  %v2556_v3 = vadd.f32 %v2327_v7, %v2136_v42  ;;  %3385 = vrot.lane.b32.xlu1 %v3261_v13, %s7628_s7  ;;  %v8961_v53 = vmul.f32 %v8903_v15, %v3087_v40  ;;  %v3035_v21 = vadd.f32 %v8891_v46, %v2974_v51 }
 0x231   : > { %v6664_v43 = vpop.f32.mrf.mxu0  ;;  %v3264_v57 = vsel %vm3256_vm1, %v3262_v56, %v3263_v24  ;;  %v6777_v37 = vpop.f32.mrf.mxu1  ;;  %v3090_v54 = vmax.f32 %v3036_v30, 0.0  ;;  %v8970_v26 = vmul.f32 %v8895_v2, %v3088_v63  ;;  %v3265_v60 = vrot.slane %v8950_v17, 1  ;;  %v10499_v17 = vld [vmem:[#allocation102_spill] sm:$0xff] }
 0x232   : > { %v3038_v4 = vadd.f32 %v8891_v46, %v2977_v23  ;;  %v2976_v58 = vadd.f32 %v2747_v18, %v2556_v3  ;;  %v2559_v42 = vadd.f32 %v6664_v43, %v8740_v16  ;;  %3387 = vrot.lane.b32.xlu0 %v3264_v57, %s7628_s7  ;;  %v3089_v0 = vmax.f32 %v3035_v21, 0.0 }
 0x233   : > { %v2337_v47 = vpop.f32.mrf.mxu0  ;;  %v2757_v61 = vpop.f32.mrf.mxu1  ;;  %v2142_v56 = vadd.f32 %v8752_v48, %v1483_v9  ;;  %v3266_v41 = vsel %vm3256_vm1, %v3263_v24, %v3265_v60  ;;  %v3267_v30 = vrot.slane %v8961_v53, 1  ;;  %v8981_v22 = vmul.f32 %v8903_v15, %v3090_v54 }
 0x234   : > { %v3092_v49 = vmax.f32 %v3038_v4, 0.0  ;;  %v3037_v20 = vadd.f32 %v8891_v46, %v2976_v58  ;;  %v2979_v38 = vadd.f32 %v6777_v37, %v2559_v42  ;;  %v2558_v29 = vadd.f32 %v2337_v47, %v2138_v1 }
 0x235   : > { %v8976_v16 = vmul.f32 %v8915_v27, %v3089_v0  ;;  %v6667_v40 = vpop.f32.mrf.mxu0  ;;  %v6780_v39 = vpop.f32.mrf.mxu1  ;;  %v3268_v24 = vrot.slane %v8970_v26, 1  ;;  %v1485_v3 = vadd.f32 %v8757_v52, %v8524_v8  ;;  %v10438_v0 = vld [vmem:[#allocation45_spill] sm:$0xff]  ;;  %v3272_v8 = vrot.slane %v8981_v22, 1 }
 0x236   : > { %v3091_v63 = vmax.f32 %v3037_v20, 0.0  ;;  %v3040_v51 = vadd.f32 %v8891_v46, %v2979_v38  ;;  %v2978_v7 = vadd.f32 %v2757_v61, %v2558_v29  ;;  %3389 = vrot.lane.b32.xlu0 %v3266_v41, %s7628_s7  ;;  %v8986_v48 = vmul.f32 %v8915_v27, %v3092_v49 }
 0x237   : > { %10436 = vst [vmem:[#allocation53_spill] sm:$0xff] %v8976_v16  ;;  %v2561_v13 = vadd.f32 %v6667_v40, %v8747_v36  ;;  %v2347_v18 = vpop.f32.mrf.mxu0  ;;  %v2767_v1 = vpop.f32.mrf.mxu1  ;;  %v3270_v23 = vrot.slane %v8976_v16, 1  ;;  %v3269_v36 = vsel %vm3256_vm1, %v3267_v30, %v3268_v24  ;;  %v2144_v30 = vadd.f32 %v8759_v10, %v1485_v3  ;;  %v10441_v10 = vld [vmem:[#allocation54_spill] sm:$0xff] }
 0x238   : > { %10437 = vst [vmem:[#allocation56_spill] sm:$0xff] %v8986_v48  ;;  %v8994_v9 = vmul.f32 %v8895_v2, %v3091_v63  ;;  %v3094_v21 = vmax.f32 %v3040_v51, 0.0  ;;  %v3039_v43 = vadd.f32 %v8891_v46, %v2978_v7  ;;  %v2560_v37 = vadd.f32 %v2347_v18, %v2140_v5 }
 0x239   : > { %v2981_v57 = vadd.f32 %v6780_v39, %v2561_v13  ;;  %v6670_v54 = vpop.f32.mrf.mxu0  ;;  %v3271_v4 = vsel %vm3256_vm1, %v3268_v24, %v3270_v23  ;;  %v6783_v58 = vpop.f32.mrf.mxu1  ;;  %v3275_v38 = vrot.slane %v8986_v48, 1  ;;  %v10439_v23 = vld [vmem:[#allocation49_spill] sm:$0xff] }
 0x23a   : > { %v3093_v42 = vmax.f32 %v3039_v43, 0.0  ;;  %v2563_v47 = vadd.f32 %v6670_v54, %v10438_v0  ;;  %3391 = vrot.lane.b32.xlu0 %v3269_v36, %s7628_s7  ;;  %3393 = vrot.lane.b32.xlu1 %v3271_v4, %s7628_s7  ;;  %v3273_v52 = vrot.slane %v8994_v9, 1  ;;  %v9005_v61 = vmul.f32 %v8895_v2, %v3094_v21  ;;  %v10440_v43 = vld [vmem:[#allocation59_spill] sm:$0xff] }
 0x23b   : > { %v3042_v5 = vadd.f32 %v8891_v46, %v2981_v57  ;;  %v2980_v60 = vadd.f32 %v2767_v1, %v2560_v37  ;;  %v2357_v49 = vpop.f32.mrf.mxu0  ;;  %v2777_v20 = vpop.f32.mrf.mxu1  ;;  %v1487_v3 = vadd.f32 %v10441_v10, %v10440_v43  ;;  %v10442_v57 = vld [vmem:[#allocation60_spill] sm:$0xff] }
 0x23c   : > { %v9010_v29 = vmul.f32 %v8903_v15, %v3093_v42  ;;  %v2983_v40 = vadd.f32 %v6783_v58, %v2563_v47  ;;  %v2562_v41 = vadd.f32 %v2357_v49, %v2142_v56  ;;  %v3274_v39 = vsel %vm3256_vm1, %v3272_v8, %v3273_v52 }
 0x23d   : > { %v3096_v63 = vmax.f32 %v3042_v5, 0.0  ;;  %v3041_v51 = vadd.f32 %v8891_v46, %v2980_v60  ;;  %v6673_v7 = vpop.f32.mrf.mxu0  ;;  %v3276_v13 = vsel %vm3256_vm1, %v3273_v52, %v3275_v38  ;;  %v6786_v18 = vpop.f32.mrf.mxu1  ;;  %v1489_v37 = vadd.f32 %v8771_v31, %v10442_v57 }
 0x23e   : > { %v3044_v1 = vadd.f32 %v8891_v46, %v2983_v40  ;;  %v2982_v24 = vadd.f32 %v2777_v20, %v2562_v41  ;;  %v2565_v21 = vadd.f32 %v6673_v7, %v10439_v23  ;;  %3395 = vrot.lane.b32.xlu0 %v3274_v39, %s7628_s7  ;;  %3397 = vrot.lane.b32.xlu1 %v3276_v13, %s7628_s7  ;;  %v3277_v56 = vrot.slane %v9010_v29, 1  ;;  %v10444_v41 = vld [vmem:[#allocation52_spill] sm:$0xff] }
 0x23f   : > { %v3095_v54 = vmax.f32 %v3041_v51, 0.0  ;;  %v2367_v36 = vpop.f32.mrf.mxu0  ;;  %v2787_v4 = vpop.f32.mrf.mxu1  ;;  %v3278_v58 = vrot.slane %v9005_v61, 1  ;;  %v9032_v20 = vmul.f32 %v8903_v15, %v3096_v63  ;;  %v2146_v39 = vadd.f32 %v10444_v41, %v1487_v3  ;;  %v10446_v51 = vld [vmem:[#allocation17_spill] sm:$0xff] }
 0x240   : > { %v3098_v42 = vmax.f32 %v3044_v1, 0.0  ;;  %v3043_v0 = vadd.f32 %v8891_v46, %v2982_v24  ;;  %v2985_v47 = vadd.f32 %v6786_v18, %v2565_v21  ;;  %v2564_v8 = vadd.f32 %v2367_v36, %v2144_v30 }
 0x241   : > { %v9028_v52 = vmul.f32 %v8915_v27, %v3095_v54  ;;  %v6676_v5 = vpop.f32.mrf.mxu0  ;;  %v3279_v60 = vsel %vm3256_vm1, %v3277_v56, %v3278_v58  ;;  %v6789_v49 = vpop.f32.mrf.mxu1  ;;  %v2148_v63 = vadd.f32 %v8773_v6, %v1489_v37  ;;  %v10447_v56 = vld [vmem:[#allocation61_spill] sm:$0xff]  ;;  %v3282_v6 = vrot.slane %v9032_v20, 1 }
 0x242   : > { %v3097_v31 = vmax.f32 %v3043_v0, 0.0  ;;  %v3046_v38 = vadd.f32 %v8891_v46, %v2985_v47  ;;  %v2984_v40 = vadd.f32 %v2787_v4, %v2564_v8  ;;  %3399 = vrot.lane.b32.xlu0 %v3279_v60, %s7628_s7  ;;  %v9038_v30 = vmul.f32 %v8915_v27, %v3098_v42  ;;  %v10448_v42 = vld [vmem:[#allocation57_spill] sm:$0xff] }
 0x243   : > { %10443 = vst [vmem:[#allocation58_spill] sm:$0xff] %v9028_v52  ;;  %v2567_v7 = vadd.f32 %v6676_v5, %v10446_v51  ;;  %v2377_v13 = vpop.f32.mrf.mxu0  ;;  %v2797_v18 = vpop.f32.mrf.mxu1  ;;  %v3280_v1 = vrot.slane %v9028_v52, 1  ;;  %v1491_v43 = vadd.f32 %v8778_v35, %v10447_v56 }
 0x244   : > { %10445 = vst [vmem:[#allocation45_spill] sm:$0xff] %v9038_v30  ;;  %v9044_v24 = vmul.f32 %v8895_v2, %v3097_v31  ;;  %v3100_v23 = vmax.f32 %v3046_v38, 0.0  ;;  %v3045_v21 = vadd.f32 %v8891_v46, %v2984_v40  ;;  %v2566_v3 = vadd.f32 %v2377_v13, %v2146_v39  ;;  %v10449_v39 = vld [vmem:[#allocation78_spill] sm:$0xff] }
 0x245   : > { %v2987_v10 = vadd.f32 %v6789_v49, %v2567_v7  ;;  %v6679_v57 = vpop.f32.mrf.mxu0  ;;  %v3281_v54 = vsel %vm3256_vm1, %v3278_v58, %v3280_v1  ;;  %v6792_v36 = vpop.f32.mrf.mxu1  ;;  %v3285_v58 = vrot.slane %v9038_v30, 1  ;;  %v9059_v49 = vld [vmem:[#allocation7 + $0x178] sm:$0xff]  ;;  %v2150_v51 = vadd.f32 %v10449_v39, %v1491_v43  ;;  %v10490_v30 = vld [vmem:[#allocation77_spill] sm:$0xff] }
 0x246   : > { %v3099_v4 = vmax.f32 %v3045_v21, 0.0  ;;  %v2569_v0 = vadd.f32 %v6679_v57, %v10448_v42  ;;  %3401 = vrot.lane.b32.xlu1 %v3281_v54, %s7628_s7  ;;  %v3283_v37 = vrot.slane %v9044_v24, 1  ;;  %v9055_v47 = vmul.f32 %v8895_v2, %v3100_v23  ;;  %6998 = vmatprep.subr.mxu0 %v9059_v49  ;;  %v9070_v21 = vld [vmem:[#allocation7 + $0x1f8] sm:$0xff]  ;;  %v10451_v57 = vld [vmem:[#allocation79_spill] sm:$0xff] }
 0x247   : > { %v3048_v35 = vadd.f32 %v8891_v46, %v2987_v10  ;;  %v2986_v8 = vadd.f32 %v2797_v18, %v2566_v3  ;;  %v2387_v5 = vpop.f32.mrf.mxu0  ;;  %v2807_v60 = vpop.f32.mrf.mxu1  ;;  %7078 = vmatprep.subr.mxu1 %v9070_v21  ;;  %v10450_v3 = vld [vmem:[#allocation62_spill] sm:$0xff] }
 0x248   : > { %v9062_v31 = vmul.f32 %v8903_v15, %v3099_v4  ;;  %v2989_v38 = vadd.f32 %v6792_v36, %v2569_v0  ;;  %v2568_v40 = vadd.f32 %v2387_v5, %v2148_v63  ;;  %v3284_v41 = vsel %vm3256_vm1, %v3282_v6, %v3283_v37  ;;  %v10452_v36 = vld [vmem:[#allocation63_spill] sm:$0xff] }
 0x249   : > { %v3102_v7 = vmax.f32 %v3048_v35, 0.0  ;;  %v3047_v13 = vadd.f32 %v8891_v46, %v2986_v8  ;;  %v6682_v18 = vpop.f32.mrf.mxu0  ;;  %3403 = vrot.lane.b32.xlu0 %v3284_v41, %s7628_s7  ;;  %v3286_v1 = vsel %vm3256_vm1, %v3283_v37, %v3285_v58  ;;  %v6795_v23 = vpop.f32.mrf.mxu1  ;;  %v1493_v54 = vadd.f32 %v10451_v57, %v10450_v3  ;;  %v10457_v3 = vld [vmem:[#allocation82_spill] sm:$0xff] }
 0x24a   : > { %v3050_v56 = vadd.f32 %v8891_v46, %v2989_v38  ;;  %v2988_v63 = vadd.f32 %v2807_v60, %v2568_v40  ;;  %v2571_v10 = vadd.f32 %v6682_v18, %v8782_v44  ;;  %3405 = vrot.lane.b32.xlu1 %v3286_v1, %s7628_s7  ;;  %v3287_v43 = vrot.slane %v9062_v31, 1  ;;  %v10454_v18 = vld [vmem:[#allocation80_spill] sm:$0xff] }
 0x24b   : > { %v1495_v4 = vadd.f32 %v8792_v25, %v10452_v36  ;;  %v3101_v42 = vmax.f32 %v3047_v13, 0.0  ;;  %v2397_v0 = vpop.f32.mrf.mxu0  ;;  %v2817_v6 = vpop.f32.mrf.mxu1  ;;  %v3288_v37 = vrot.slane %v9055_v47, 1  ;;  %v9088_v41 = vmul.f32 %v8903_v15, %v3102_v7 }
 0x24c   : > { %v3104_v35 = vmax.f32 %v3050_v56, 0.0  ;;  %v3049_v44 = vadd.f32 %v8891_v46, %v2988_v63  ;;  %v2991_v8 = vadd.f32 %v6795_v23, %v2571_v10  ;;  %v2570_v5 = vadd.f32 %v2397_v0, %v2150_v51  ;;  %v10456_v23 = vld [vmem:[#allocation81_spill] sm:$0xff]  ;;  %v10458_v0 = vld [vmem:[#allocation64_spill] sm:$0xff] }
 0x24d   : > { %v9084_v60 = vmul.f32 %v8915_v27, %v3101_v42  ;;  %v6685_v58 = vpop.f32.mrf.mxu0  ;;  %v3289_v38 = vsel %vm3256_vm1, %v3287_v43, %v3288_v37  ;;  %v6798_v40 = vpop.f32.mrf.mxu1  ;;  %v2152_v1 = vadd.f32 %v10454_v18, %v1493_v54  ;;  %v2154_v7 = vadd.f32 %v10457_v3, %v1495_v4  ;;  %v10460_v18 = vld [vmem:[#allocation83_spill] sm:$0xff] }
 0x24e   : > { %v3103_v25 = vmax.f32 %v3049_v44, 0.0  ;;  %v3052_v39 = vadd.f32 %v8891_v46, %v2991_v8  ;;  %v2990_v13 = vadd.f32 %v2817_v6, %v2570_v5  ;;  %3407 = vrot.lane.b32.xlu0 %v3289_v38, %s7628_s7  ;;  %v9094_v51 = vmul.f32 %v8915_v27, %v3104_v35  ;;  %v10459_v6 = vld [vmem:[#allocation84_spill] sm:$0xff] }
 0x24f   : > { %10453 = vst [vmem:[#allocation49_spill] sm:$0xff] %v9084_v60  ;;  %v2573_v56 = vadd.f32 %v6685_v58, %v10456_v23  ;;  %v2407_v63 = vpop.f32.mrf.mxu0  ;;  %v2827_v10 = vpop.f32.mrf.mxu1  ;;  %v3290_v43 = vrot.slane %v9084_v60, 1  ;;  %v1497_v54 = vadd.f32 %v10459_v6, %v10458_v0  ;;  %v3292_v4 = vrot.slane %v9088_v41, 1  ;;  %v10461_v0 = vld [vmem:[#allocation85_spill] sm:$0xff]  ;;  %v10481_v60 = vld [vmem:[#allocation95_spill] sm:$0xff] }
 0x250   : > { %10455 = vst [vmem:[#allocation59_spill] sm:$0xff] %v9094_v51  ;;  %v9100_v57 = vmul.f32 %v8895_v2, %v3103_v25  ;;  %v3106_v36 = vmax.f32 %v3052_v39, 0.0  ;;  %v3051_v42 = vadd.f32 %v8891_v46, %v2990_v13  ;;  %v2572_v35 = vadd.f32 %v2407_v63, %v2152_v1 }
 0x251   : > { %v2993_v44 = vadd.f32 %v6798_v40, %v2573_v56  ;;  %v6688_v8 = vpop.f32.mrf.mxu0  ;;  %v3291_v5 = vsel %vm3256_vm1, %v3288_v37, %v3290_v43  ;;  %v6801_v58 = vpop.f32.mrf.mxu1  ;;  %v3295_v37 = vrot.slane %v9094_v51, 1  ;;  %v2156_v6 = vadd.f32 %v10461_v0, %v1497_v54  ;;  %v10470_v51 = vld [vmem:[#allocation88_spill] sm:$0xff] }
 0x252   : > { %v3105_v38 = vmax.f32 %v3051_v42, 0.0  ;;  %v2575_v23 = vadd.f32 %v6688_v8, %v10460_v18  ;;  %3409 = vrot.lane.b32.xlu1 %v3291_v5, %s7628_s7  ;;  %v3293_v25 = vrot.slane %v9100_v57, 1  ;;  %v9111_v39 = vmul.f32 %v8895_v2, %v3106_v36 }
 0x253   : > { %v3054_v13 = vadd.f32 %v8891_v46, %v2993_v44  ;;  %v2992_v40 = vadd.f32 %v2827_v10, %v2572_v35  ;;  %v2417_v1 = vpop.f32.mrf.mxu0  ;;  %v2837_v56 = vpop.f32.mrf.mxu1 }
 0x254   : > { %v9116_v63 = vmul.f32 %v8903_v15, %v3105_v38  ;;  %v2995_v43 = vadd.f32 %v6801_v58, %v2575_v23  ;;  %v2574_v3 = vadd.f32 %v2417_v1, %v2154_v7  ;;  %v3294_v42 = vsel %vm3256_vm1, %v3292_v4, %v3293_v25  ;;  %v10462_v58 = vld [vmem:[#allocation65_spill] sm:$0xff]  ;;  %v10463_v23 = vld [vmem:[#allocation66_spill] sm:$0xff] }
 0x255   : > { %v3108_v8 = vmax.f32 %v3054_v13, 0.0  ;;  %v3053_v36 = vadd.f32 %v8891_v46, %v2992_v40  ;;  %v6691_v5 = vpop.f32.mrf.mxu0  ;;  %3411 = vrot.lane.b32.xlu0 %v3294_v42, %s7628_s7  ;;  %v3296_v10 = vsel %vm3256_vm1, %v3293_v25, %v3295_v37  ;;  %v6804_v44 = vpop.f32.mrf.mxu1  ;;  %v1499_v54 = vadd.f32 %v8806_v32, %v10462_v58 }
 0x256   : > { %v3056_v35 = vadd.f32 %v8891_v46, %v2995_v43  ;;  %v2994_v18 = vadd.f32 %v2837_v56, %v2574_v3  ;;  %v2577_v38 = vadd.f32 %v6691_v5, %v8803_v33  ;;  %3413 = vrot.lane.b32.xlu1 %v3296_v10, %s7628_s7  ;;  %v3297_v7 = vrot.slane %v9116_v63, 1 }
 0x257   : > { %v1501_v4 = vadd.f32 %v8813_v62, %v10463_v23  ;;  %v3107_v13 = vmax.f32 %v3053_v36, 0.0  ;;  %v2427_v40 = vpop.f32.mrf.mxu0  ;;  %v2847_v1 = vpop.f32.mrf.mxu1  ;;  %v3298_v25 = vrot.slane %v9111_v39, 1  ;;  %v9138_v5 = vmul.f32 %v8903_v15, %v3108_v8  ;;  %v10467_v23 = vld [vmem:[#allocation87_spill] sm:$0xff] }
 0x258   : > { %v3110_v37 = vmax.f32 %v3056_v35, 0.0  ;;  %v3055_v56 = vadd.f32 %v8891_v46, %v2994_v18  ;;  %v2997_v43 = vadd.f32 %v6804_v44, %v2577_v38  ;;  %v2576_v33 = vadd.f32 %v2427_v40, %v2156_v6  ;;  %v10466_v44 = vld [vmem:[#allocation86_spill] sm:$0xff] }
 0x259   : > { %v9134_v3 = vmul.f32 %v8915_v27, %v3107_v13  ;;  %v6694_v42 = vpop.f32.mrf.mxu0  ;;  %v3299_v0 = vsel %vm3256_vm1, %v3297_v7, %v3298_v25  ;;  %v6807_v32 = vpop.f32.mrf.mxu1  ;;  %v2158_v35 = vadd.f32 %v8808_v59, %v1499_v54  ;;  %v2160_v8 = vadd.f32 %v10467_v23, %v1501_v4 }
 0x25a   : > { %v3109_v62 = vmax.f32 %v3055_v56, 0.0  ;;  %v3058_v36 = vadd.f32 %v8891_v46, %v2997_v43  ;;  %v2996_v10 = vadd.f32 %v2847_v1, %v2576_v33  ;;  %3415 = vrot.lane.b32.xlu0 %v3299_v0, %s7628_s7  ;;  %v9144_v6 = vmul.f32 %v8915_v27, %v3110_v37  ;;  %v10468_v56 = vld [vmem:[#allocation67_spill] sm:$0xff]  ;;  %v10469_v43 = vld [vmem:[#allocation89_spill] sm:$0xff] }
 0x25b   : > { %10464 = vst [vmem:[#allocation54_spill] sm:$0xff] %v9134_v3  ;;  %v2579_v18 = vadd.f32 %v6694_v42, %v10466_v44  ;;  %v2437_v38 = vpop.f32.mrf.mxu0  ;;  %v2857_v58 = vpop.f32.mrf.mxu1  ;;  %v3300_v7 = vrot.slane %v9134_v3, 1  ;;  %v1503_v59 = vadd.f32 %v10469_v43, %v10468_v56  ;;  %v3302_v4 = vrot.slane %v9138_v5, 1 }
 0x25c   : > { %10465 = vst [vmem:[#allocation60_spill] sm:$0xff] %v9144_v6  ;;  %v9150_v13 = vmul.f32 %v8895_v2, %v3109_v62  ;;  %v3112_v40 = vmax.f32 %v3058_v36, 0.0  ;;  %v3057_v1 = vadd.f32 %v8891_v46, %v2996_v10  ;;  %v2578_v37 = vadd.f32 %v2437_v38, %v2158_v35 }
 0x25d   : > { %v2999_v54 = vadd.f32 %v6807_v32, %v2579_v18  ;;  %v6697_v33 = vpop.f32.mrf.mxu0  ;;  %v3301_v42 = vsel %vm3256_vm1, %v3298_v25, %v3300_v7  ;;  %v6810_v0 = vpop.f32.mrf.mxu1  ;;  %v3305_v25 = vrot.slane %v9144_v6, 1 }
 0x25e   : > { %v3111_v44 = vmax.f32 %v3057_v1, 0.0  ;;  %v2581_v3 = vadd.f32 %v6697_v33, %v10470_v51  ;;  %3417 = vrot.lane.b32.xlu1 %v3301_v42, %s7628_s7  ;;  %v3303_v62 = vrot.slane %v9150_v13, 1  ;;  %v9161_v36 = vmul.f32 %v8895_v2, %v3112_v40  ;;  %v10471_v1 = vld [vmem:[#allocation90_spill] sm:$0xff] }
 0x25f   : > { %v3060_v10 = vadd.f32 %v8891_v46, %v2999_v54  ;;  %v2998_v32 = vadd.f32 %v2857_v58, %v2578_v37  ;;  %v2447_v35 = vpop.f32.mrf.mxu0  ;;  %v2867_v18 = vpop.f32.mrf.mxu1  ;;  %v2162_v56 = vadd.f32 %v10471_v1, %v1503_v59 }
 0x260   : > { %v9166_v38 = vmul.f32 %v8903_v15, %v3111_v44  ;;  %v3001_v51 = vadd.f32 %v6810_v0, %v2581_v3  ;;  %v2580_v7 = vadd.f32 %v2447_v35, %v2160_v8  ;;  %v3304_v23 = vsel %vm3256_vm1, %v3302_v4, %v3303_v62  ;;  %v10472_v44 = vld [vmem:[#allocation91_spill] sm:$0xff]  ;;  %v10473_v8 = vld [vmem:[#allocation68_spill] sm:$0xff]  ;;  %v10474_v0 = vld [vmem:[#allocation69_spill] sm:$0xff] }
 0x261   : > { %v3114_v43 = vmax.f32 %v3060_v10, 0.0  ;;  %v3059_v40 = vadd.f32 %v8891_v46, %v2998_v32  ;;  %v6700_v33 = vpop.f32.mrf.mxu0  ;;  %3419 = vrot.lane.b32.xlu0 %v3304_v23, %s7628_s7  ;;  %v3306_v58 = vsel %vm3256_vm1, %v3303_v62, %v3305_v25  ;;  %v6813_v54 = vpop.f32.mrf.mxu1  ;;  %v1505_v59 = vadd.f32 %v8827_v45, %v10473_v8 }
 0x262   : > { %v3062_v37 = vadd.f32 %v8891_v46, %v3001_v51  ;;  %v3000_v42 = vadd.f32 %v2867_v18, %v2580_v7  ;;  %v2583_v6 = vadd.f32 %v6700_v33, %v10472_v44  ;;  %3421 = vrot.lane.b32.xlu1 %v3306_v58, %s7628_s7  ;;  %v3307_v3 = vrot.slane %v9166_v38, 1 }
 0x263   : > { %v1507_v4 = vadd.f32 %v8834_v34, %v10474_v0  ;;  %v3113_v10 = vmax.f32 %v3059_v40, 0.0  ;;  %v2457_v32 = vpop.f32.mrf.mxu0  ;;  %v2877_v35 = vpop.f32.mrf.mxu1  ;;  %v3308_v62 = vrot.slane %v9161_v36, 1  ;;  %v9188_v58 = vmul.f32 %v8903_v15, %v3114_v43 }
 0x264   : > { %v3116_v25 = vmax.f32 %v3062_v37, 0.0  ;;  %v3061_v18 = vadd.f32 %v8891_v46, %v3000_v42  ;;  %v3003_v51 = vadd.f32 %v6813_v54, %v2583_v6  ;;  %v2582_v7 = vadd.f32 %v2457_v32, %v2162_v56  ;;  %v10476_v37 = vld [vmem:[#allocation92_spill] sm:$0xff]  ;;  %v10478_v56 = vld [vmem:[#allocation93_spill] sm:$0xff] }
 0x265   : > { %v9184_v23 = vmul.f32 %v8915_v27, %v3113_v10  ;;  %v6703_v1 = vpop.f32.mrf.mxu0  ;;  %v3309_v33 = vsel %vm3256_vm1, %v3307_v3, %v3308_v62  ;;  %v6816_v45 = vpop.f32.mrf.mxu1  ;;  %v2164_v42 = vadd.f32 %v10476_v37, %v1505_v59  ;;  %v10479_v10 = vld [vmem:[#allocation94_spill] sm:$0xff] }
 0x266   : > { %v3115_v34 = vmax.f32 %v3061_v18, 0.0  ;;  %v3064_v40 = vadd.f32 %v8891_v46, %v3003_v51  ;;  %v3002_v44 = vadd.f32 %v2877_v35, %v2582_v7  ;;  %3423 = vrot.lane.b32.xlu0 %v3309_v33, %s7628_s7  ;;  %v9194_v6 = vmul.f32 %v8915_v27, %v3116_v25  ;;  %v10480_v51 = vld [vmem:[#allocation70_spill] sm:$0xff] }
 0x267   : > { %10475 = vst [vmem:[#allocation52_spill] sm:$0xff] %v9184_v23  ;;  %v2585_v54 = vadd.f32 %v6703_v1, %v10478_v56  ;;  %v2467_v8 = vpop.f32.mrf.mxu0  ;;  %v2887_v0 = vpop.f32.mrf.mxu1  ;;  %v3310_v3 = vrot.slane %v9184_v23, 1  ;;  %v2166_v43 = vadd.f32 %v10479_v10, %v1507_v4  ;;  %v1509_v59 = vadd.f32 %v8841_v12, %v10480_v51  ;;  %v10482_v10 = vld [vmem:[#allocation96_spill] sm:$0xff] }
 0x268   : > { %10477 = vst [vmem:[#allocation17_spill] sm:$0xff] %v9194_v6  ;;  %v9200_v32 = vmul.f32 %v8895_v2, %v3115_v34  ;;  %v3118_v18 = vmax.f32 %v3064_v40, 0.0  ;;  %v3063_v35 = vadd.f32 %v8891_v46, %v3002_v44  ;;  %v2584_v25 = vadd.f32 %v2467_v8, %v2164_v42 }
 0x269   : > { %v3005_v7 = vadd.f32 %v6816_v45, %v2585_v54  ;;  %v6706_v33 = vpop.f32.mrf.mxu0  ;;  %v3311_v1 = vsel %vm3256_vm1, %v3308_v62, %v3310_v3  ;;  %v6819_v37 = vpop.f32.mrf.mxu1  ;;  %v3312_v4 = vrot.slane %v9188_v58, 1  ;;  %v3315_v62 = vrot.slane %v9194_v6, 1 }
 0x26a   : > { %v3117_v56 = vmax.f32 %v3063_v35, 0.0  ;;  %v2587_v23 = vadd.f32 %v6706_v33, %v10481_v60  ;;  %3425 = vrot.lane.b32.xlu1 %v3311_v1, %s7628_s7  ;;  %v3313_v34 = vrot.slane %v9200_v32, 1  ;;  %v9211_v40 = vmul.f32 %v8895_v2, %v3118_v18 }
 0x26b   : > { %v3066_v12 = vadd.f32 %v8891_v46, %v3005_v7  ;;  %v3004_v45 = vadd.f32 %v2887_v0, %v2584_v25  ;;  %v2477_v44 = vpop.f32.mrf.mxu0  ;;  %v2897_v42 = vpop.f32.mrf.mxu1  ;;  %v2168_v35 = vadd.f32 %v10482_v10, %v1509_v59  ;;  %v10485_v59 = vld [vmem:[#allocation98_spill] sm:$0xff] }
 0x26c   : > { %v9216_v54 = vmul.f32 %v8903_v15, %v3117_v56  ;;  %v3007_v60 = vadd.f32 %v6819_v37, %v2587_v23  ;;  %v2586_v8 = vadd.f32 %v2477_v44, %v2166_v43  ;;  %v3314_v3 = vsel %vm3256_vm1, %v3312_v4, %v3313_v34  ;;  %v10483_v56 = vld [vmem:[#allocation97_spill] sm:$0xff]  ;;  %v10484_v43 = vld [vmem:[#allocation71_spill] sm:$0xff]  ;;  %v10486_v4 = vld [vmem:[#allocation72_spill] sm:$0xff] }
 0x26d   : > { %v3120_v51 = vmax.f32 %v3066_v12, 0.0  ;;  %v3065_v18 = vadd.f32 %v8891_v46, %v3004_v45  ;;  %v6709_v33 = vpop.f32.mrf.mxu0  ;;  %3427 = vrot.lane.b32.xlu0 %v3314_v3, %s7628_s7  ;;  %v3316_v0 = vsel %vm3256_vm1, %v3313_v34, %v3315_v62  ;;  %v6822_v7 = vpop.f32.mrf.mxu1  ;;  %v1511_v37 = vadd.f32 %v10485_v59, %v10484_v43  ;;  %v10487_v10 = vld [vmem:[#allocation74_spill] sm:$0xff] }
 0x26e   : > { %v3068_v25 = vadd.f32 %v8891_v46, %v3007_v60  ;;  %v3006_v1 = vadd.f32 %v2897_v42, %v2586_v8  ;;  %v2589_v6 = vadd.f32 %v6709_v33, %v10483_v56  ;;  %3429 = vrot.lane.b32.xlu1 %v3316_v0, %s7628_s7  ;;  %v3317_v23 = vrot.slane %v9216_v54, 1  ;;  %v10488_v33 = vld [vmem:[#allocation75_spill] sm:$0xff]  ;;  %v10489_v56 = vld [vmem:[#allocation76_spill] sm:$0xff] }
 0x26f   : > { %v1513_v12 = vadd.f32 %v8855_v55, %v10486_v4  ;;  %v3119_v45 = vmax.f32 %v3065_v18, 0.0  ;;  %v2487_v44 = vpop.f32.mrf.mxu0  ;;  %v2907_v3 = vpop.f32.mrf.mxu1  ;;  %v3318_v34 = vrot.slane %v9211_v40, 1  ;;  %v1097_v0 = vadd.f32 %v10488_v33, %v10487_v10 }
 0x270   : > { %v3122_v62 = vmax.f32 %v3068_v25, 0.0  ;;  %v3067_v42 = vadd.f32 %v8891_v46, %v3006_v1  ;;  %v3009_v60 = vadd.f32 %v6822_v7, %v2589_v6  ;;  %v2588_v8 = vadd.f32 %v2487_v44, %v2168_v35  ;;  %v10493_v7 = vld [vmem:[#allocation99_spill] sm:$0xff] }
 0x271   : > { %v1107_v52 = vadd.f32 %v10490_v30, %v10489_v56  ;;  %v9238_v43 = vmul.f32 %v8915_v27, %v3119_v45  ;;  %v6712_v55 = vpop.f32.mrf.mxu0  ;;  %v3319_v18 = vsel %vm3256_vm1, %v3317_v23, %v3318_v34  ;;  %v6825_v59 = vpop.f32.mrf.mxu1  ;;  %v9242_v4 = vmul.f32 %v8903_v15, %v3120_v51  ;;  %v10495_v45 = vld [vmem:[#allocation100_spill] sm:$0xff]  ;;  %v10496_v56 = vld [vmem:[#allocation101_spill] sm:$0xff] }
 0x272   : > { %v3121_v25 = vmax.f32 %v3067_v42, 0.0  ;;  %v3070_v6 = vadd.f32 %v8891_v46, %v3009_v60  ;;  %v3008_v35 = vadd.f32 %v2907_v3, %v2588_v8  ;;  %3431 = vrot.lane.b32.xlu0 %v3319_v18, %s7628_s7  ;;  %v2170_v1 = vadd.f32 %v10493_v7, %v1511_v37  ;;  %v10497_v8 = vld [vmem:[#allocation73_spill] sm:$0xff]  ;;  %v10498_v18 = vld [vmem:[#allocation103_spill] sm:$0xff] }
 0x273   : > { %10491 = vst [vmem:[#allocation61_spill] sm:$0xff] %v9238_v43  ;;  %10492 = vst [vmem:[#allocation57_spill] sm:$0xff] %v9242_v4  ;;  %v9248_v30 = vmul.f32 %v8915_v27, %v3122_v62  ;;  %v2591_v44 = vadd.f32 %v6712_v55, %v10495_v45  ;;  %v2497_v10 = vpop.f32.mrf.mxu0  ;;  %v2917_v33 = vpop.f32.mrf.mxu1  ;;  %v3320_v23 = vrot.slane %v9238_v43, 1  ;;  %v2172_v51 = vadd.f32 %v10496_v56, %v1513_v12  ;;  %v10501_v56 = vld [vmem:[#allocation104_spill] sm:$0xff] }
 0x274   : > { %v9254_v42 = vmul.f32 %v8895_v2, %v3121_v25  ;;  %v3124_v60 = vmax.f32 %v3070_v6, 0.0  ;;  %v3069_v3 = vadd.f32 %v8891_v46, %v3008_v35  ;;  %v1515_v37 = vadd.f32 %v10498_v18, %v10497_v8 }
 0x275   : > { %10494 = vst [vmem:[#allocation78_spill] sm:$0xff] %v9248_v30  ;;  %v3011_v7 = vadd.f32 %v6825_v59, %v2591_v44  ;;  %v2590_v62 = vadd.f32 %v2497_v10, %v2170_v1  ;;  %v6715_v48 = vpop.f32.mrf.mxu0  ;;  %v3321_v55 = vsel %vm3256_vm1, %v3318_v34, %v3320_v23  ;;  %v6828_v45 = vpop.f32.mrf.mxu1  ;;  %v3322_v12 = vrot.slane %v9242_v4, 1 }
 0x276   : > { %v3123_v16 = vmax.f32 %v3069_v3, 0.0  ;;  %v2593_v43 = vadd.f32 %v6715_v48, %v10499_v17  ;;  %3433 = vrot.lane.b32.xlu1 %v3321_v55, %s7628_s7  ;;  %v3323_v25 = vrot.slane %v9254_v42, 1  ;;  %v9265_v6 = vmul.f32 %v8895_v2, %v3124_v60 }
 0x277   : > { %v3072_v35 = vadd.f32 %v8891_v46, %v3011_v7  ;;  %v3010_v59 = vadd.f32 %v2917_v33, %v2590_v62  ;;  %v2507_v1 = vpop.f32.mrf.mxu0  ;;  %v2927_v44 = vpop.f32.mrf.mxu1  ;;  %v3325_v34 = vrot.slane %v9248_v30, 1  ;;  %v2174_v3 = vadd.f32 %v10501_v56, %v1515_v37  ;;  %v10502_v7 = vld [vmem:[#allocation105_spill] sm:$0xff]  ;;  %v10503_v37 = vld [vmem:[#allocation106_spill] sm:$0xff] }
 0x278   : > { %v9270_v10 = vmul.f32 %v8903_v15, %v3123_v16  ;;  %v3013_v17 = vadd.f32 %v6828_v45, %v2593_v43  ;;  %v2592_v48 = vadd.f32 %v2507_v1, %v2172_v51  ;;  %v3324_v23 = vsel %vm3256_vm1, %v3322_v12, %v3323_v25  ;;  %v9280_v16 = vld [vmem:[%s10221_s2] ss:$0 sm:$0xff]  ;;  %v10504_v45 = vld [vmem:[#allocation48_spill] sm:$0xff] }
 0x279   : > { %v3126_v8 = vmax.f32 %v3072_v35, 0.0  ;;  %v3071_v2 = vadd.f32 %v8891_v46, %v3010_v59  ;;  %v6718_v60 = vpop.f32.mrf.mxu0  ;;  %3435 = vrot.lane.b32.xlu0 %v3324_v23, %s7628_s7  ;;  %v3326_v33 = vsel %vm3256_vm1, %v3323_v25, %v3325_v34  ;;  %v6831_v18 = vpop.f32.mrf.mxu1  ;;  %v1517_v55 = vadd.f32 %v10503_v37, %v1097_v0 }
 0x27a   : > { %10500 = vst [vmem:[#allocation62_spill] sm:$0xff] %v9270_v10  ;;  %v3074_v43 = vadd.f32 %v9280_v16, %v3013_v17  ;;  %v3012_v51 = vadd.f32 %v2927_v44, %v2592_v48  ;;  %v2595_v62 = vadd.f32 %v6718_v60, %v10502_v7  ;;  %3437 = vrot.lane.b32.xlu1 %v3326_v33, %s7628_s7  ;;  %v3327_v46 = vrot.slane %v9270_v10, 1 }
 0x27b   : > { %v1519_v12 = vadd.f32 %v10504_v45, %v1107_v52  ;;  %v3125_v25 = vmax.f32 %v3071_v2, 0.0  ;;  %v2517_v35 = vpop.f32.mrf.mxu0  ;;  %v2937_v59 = vpop.f32.mrf.mxu1  ;;  %v3328_v1 = vrot.slane %v9265_v6, 1  ;;  %v9291_v48 = vmul.f32 %v8903_v15, %v3126_v8  ;;  %v10509_v15 = vld [vmem:[#allocation108_spill] sm:$0xff]  ;;  %v10510_v45 = vld [vmem:[#allocation109_spill] sm:$0xff] }
 0x27c   : > { %v3128_v34 = vmax.f32 %v3074_v43, 0.0  ;;  %v3073_v23 = vadd.f32 %v9280_v16, %v3012_v51  ;;  %v3015_v17 = vadd.f32 %v6831_v18, %v2595_v62  ;;  %v2594_v44 = vadd.f32 %v2517_v35, %v2174_v3  ;;  %v10507_v43 = vld [vmem:[#allocation107_spill] sm:$0xff] }
 0x27d   : > { %10505 = vst [vmem:[#allocation79_spill] sm:$0xff] %v9291_v48  ;;  %v9294_v56 = vmul.f32 %v8915_v27, %v3125_v25  ;;  %v6721_v60 = vpop.f32.mrf.mxu0  ;;  %v3329_v0 = vsel %vm3256_vm1, %v3327_v46, %v3328_v1  ;;  %v6834_v52 = vpop.f32.mrf.mxu1  ;;  %v2176_v51 = vadd.f32 %v10507_v43, %v1517_v55  ;;  %v2178_v46 = vadd.f32 %v10510_v45, %v1519_v12  ;;  %v7423_v25 = vld [vmem:[#allocation8 + $0x8] sm:$0xff] }
 0x27e   : > { %v3127_v2 = vmax.f32 %v3073_v23, 0.0  ;;  %v3076_v33 = vadd.f32 %v9280_v16, %v3015_v17  ;;  %v3014_v7 = vadd.f32 %v2937_v59, %v2594_v44  ;;  %3439 = vrot.lane.b32.xlu0 %v3329_v0, %s7628_s7  ;;  %v9301_v3 = vmul.f32 %v8915_v27, %v3128_v34 }
 0x27f   : > { %10506 = vst [vmem:[#allocation63_spill] sm:$0xff] %v9294_v56  ;;  %v2597_v8 = vadd.f32 %v6721_v60, %v10509_v15  ;;  %v2527_v18 = vpop.f32.mrf.mxu0  ;;  %v2947_v62 = vpop.f32.mrf.mxu1  ;;  %v3330_v37 = vrot.slane %v9294_v56, 1  ;;  %v3332_v60 = vrot.slane %v9291_v48, 1  ;;  %v10511_v15 = vld [vmem:[#allocation110_spill] sm:$0xff] }
 0x280   : > { %10508 = vst [vmem:[#allocation80_spill] sm:$0xff] %v9301_v3  ;;  %v9306_v35 = vmul.f32 %v7423_v25, %v3127_v2  ;;  %v3130_v23 = vmax.f32 %v3076_v33, 0.0  ;;  %v3075_v59 = vadd.f32 %v9280_v16, %v3014_v7  ;;  %v2596_v44 = vadd.f32 %v2527_v18, %v2176_v51 }
 0x281   : > { %v3017_v17 = vadd.f32 %v6834_v52, %v2597_v8  ;;  %v6724_v55 = vpop.f32.mrf.mxu0  ;;  %v3331_v27 = vsel %vm3256_vm1, %v3328_v1, %v3330_v37  ;;  %v6837_v34 = vpop.f32.mrf.mxu1  ;;  %v3335_v51 = vrot.slane %v9301_v3, 1  ;;  %v7424_v1 = vld [vmem:[#allocation8] sm:$0xff] }
 0x282   : > { %v9311_v0 = vmul.f32 %v7423_v25, %v3130_v23  ;;  %v3129_v43 = vmax.f32 %v3075_v59, 0.0  ;;  %v2599_v56 = vadd.f32 %v6724_v55, %v10511_v15  ;;  %3441 = vrot.lane.b32.xlu1 %v3331_v27, %s7628_s7  ;;  %v3333_v12 = vrot.slane %v9306_v35, 1  ;;  %v7425_v15 = vld [vmem:[#allocation8 + $0x10] sm:$0xff] }
 0x283   : > { %v3078_v2 = vadd.f32 %v9280_v16, %v3017_v17  ;;  %v3016_v33 = vadd.f32 %v2947_v62, %v2596_v44  ;;  %v2537_v52 = vpop.f32.mrf.mxu0  ;;  %v2957_v7 = vpop.f32.mrf.mxu1 }
 0x284   : > { %v9318_v8 = vmul.f32 %v7424_v1, %v3129_v43  ;;  %v2598_v18 = vadd.f32 %v2537_v52, %v2178_v46  ;;  %v3019_v37 = vadd.f32 %v6837_v34, %v2599_v56  ;;  %v3334_v45 = vsel %vm3256_vm1, %v3332_v60, %v3333_v12 }
 0x285   : > { %v3132_v23 = vmax.f32 %v3078_v2, 0.0  ;;  %v3077_v59 = vadd.f32 %v9280_v16, %v3016_v33  ;;  %3443 = vrot.lane.b32.xlu0 %v3334_v45, %s7628_s7  ;;  %v3336_v55 = vsel %vm3256_vm1, %v3333_v12, %v3335_v51  ;;  %v3338_v27 = vrot.slane %v9311_v0, 1 }
 0x286   : > { %v3080_v62 = vadd.f32 %v9280_v16, %v3019_v37  ;;  %v3018_v17 = vadd.f32 %v2957_v7, %v2598_v18  ;;  %3445 = vrot.lane.b32.xlu1 %v3336_v55, %s7628_s7  ;;  %v3337_v44 = vrot.slane %v9318_v8, 1 }
 0x287   : > { %v3131_v46 = vmax.f32 %v3077_v59, 0.0  ;;  %v3189_v56 = vmul.f32 %v7424_v1, %v3132_v23 }
 0x288   : > { %v3134_v34 = vmax.f32 %v3080_v62, 0.0  ;;  %v3079_v60 = vadd.f32 %v9280_v16, %v3018_v17  ;;  %v3339_v43 = vsel %vm3256_vm1, %v3337_v44, %v3338_v27 }
 0x289   : > { %v9330_v2 = vmul.f32 %v7425_v15, %v3131_v46  ;;  %3447 = vrot.lane.b32.xlu0 %v3339_v43, %s7628_s7  ;;  %v9334_v7 = vmul.f32 0.0, %v3189_v56  ;;  %v4375_v56 = vld [vmem:[#allocation7 + $0x1f0] sm:$0xff] }
 0x28a   : > { %v3191_v12 = vmul.f32 %v7425_v15, %v3134_v34  ;;  %v3133_v33 = vmax.f32 %v3079_v60, 0.0  ;;  %v4374_v34 = vld [vmem:[#allocation7 + $0x1e8] sm:$0xff]  ;;  %v3989_v15 = vld [vmem:[#allocation7 + $0x170] sm:$0xff] }
 0x28b   : > { %10512 = vst [vmem:[#allocation81_spill] sm:$0xff] %v9330_v2  ;;  %v3340_v52 = vrot.slane %v9330_v2, 1  ;;  %10513 = vst [vmem:[#allocation82_spill] sm:$0xff] %v9334_v7  ;;  %v3342_v16 = vrot.slane %v9334_v7, 1 }
 0x28c   : > { %v9336_v51 = vmul.f32 0.0, %v3191_v12  ;;  %v3190_v18 = vmul.f32 %v7423_v25, %v3133_v33  ;;  %v4373_v12 = vld [vmem:[#allocation7 + $0x1e0] sm:$0xff] }
 0x28d   : > { %v3341_v1 = vsel %vm3256_vm1, %v3338_v27, %v3340_v52 }
 0x28e   : > { %10514 = vst [vmem:[#allocation64_spill] sm:$0xff] %v9336_v51  ;;  %v9339_v37 = vmul.f32 0.0, %v3190_v18  ;;  %3449 = vrot.lane.b32.xlu1 %v3341_v1, %s7628_s7  ;;  %v3345_v23 = vrot.slane %v9336_v51, 1  ;;  %v3988_v1 = vld [vmem:[#allocation7 + $0x168] sm:$0xff] }
 0x290   : > { %10515 = vst [vmem:[#allocation84_spill] sm:$0xff] %v9339_v37  ;;  %v3343_v45 = vrot.slane %v9339_v37, 1 }
 0x292   : > { %v3344_v59 = vsel %vm3256_vm1, %v3342_v16, %v3343_v45  ;;  %v3346_v55 = vsel %vm3256_vm1, %v3343_v45, %v3345_v23  ;;  %v4372_v16 = vld [vmem:[#allocation7 + $0x1d8] sm:$0xff] }
 0x293   : > { %3451 = vrot.lane.b32.xlu0 %v3344_v59, %s7628_s7  ;;  %3453 = vrot.lane.b32.xlu1 %v3346_v55, %s7628_s7  ;;  %v3987_v55 = vld [vmem:[#allocation7 + $0x160] sm:$0xff] }
 0x29e   : > { %v3384_v25 = vpop.permute.xlu1 %3383 }
 0x29f   : > { %v3455_v62 = vadd.f32 %v3384_v25, %v8918_v19  ;;  %v4371_v25 = vld [vmem:[#allocation7 + $0x1d0] sm:$0xff] }
 0x2a1   : > { %6950 = vmatprep.mubr.f32.mxu1 %v3455_v62 }
 0x2a2   : > { %v3386_v17 = vpop.permute.xlu1 %3385 }
 0x2a3   : > { %v3456_v44 = vadd.f32 %v3386_v17, %v8913_v50 }
 0x2a4   : > { %v3388_v27 = vpop.permute.xlu0 %3387 }
 0x2a5   : > { %v3457_v46 = vadd.f32 %v3388_v27, %v8928_v11  ;;  %6951 = vmatmul.mubr.f32.vlgmr.msra.gmra.mxu1 %v3456_v44  ;;  %v3986_v44 = vld [vmem:[#allocation7 + $0x158] sm:$0xff]  ;;  %v4370_v27 = vld [vmem:[#allocation7 + $0x1c8] sm:$0xff] }
 0x2a6   : > { %7079 = vmatpush3.msra.mxu1 %v9070_v21 }
 0x2a7   : > { %6870 = vmatprep.mubr.f32.mxu0 %v3457_v46  ;;  %6953 = vmatprep.mubr.f32.mxu1 %v3457_v46  ;;  %v3985_v46 = vld [vmem:[#allocation7 + $0x150] sm:$0xff] }
 0x2a8   : > { %v3390_v60 = vpop.permute.xlu0 %3389  ;;  %7080 = vmatprep.subr.mxu1 %v4375_v56 }
 0x2a9   : > { %v3458_v43 = vadd.f32 %v3390_v60, %v8945_v14  ;;  %7081 = vmatpush3.msra.mxu1 %v4375_v56  ;;  %v4369_v56 = vld [vmem:[#allocation7 + $0x1c0] sm:$0xff] }
 0x2aa   : > { %7082 = vmatprep.subr.mxu1 %v4374_v34 }
 0x2ab   : > { %6871 = vmatmul.mubr.f32.vlgmr.msra.gmra.mxu0 %v3458_v43  ;;  %6954 = vmatmul.mubr.f32.gmra.mxu1 %v3458_v43  ;;  %v3984_v43 = vld [vmem:[#allocation7 + $0x148] sm:$0xff] }
 0x2ac   : > { %v3392_v33 = vpop.permute.xlu0 %3391  ;;  %v3394_v52 = vpop.permute.xlu1 %3393  ;;  %6999 = vmatpush3.msra.mxu0 %v9059_v49  ;;  %7083 = vmatpush3.msra.mxu1 %v4374_v34 }
 0x2ad   : > { %v9356_v21 = vadd.f32 %v3392_v33, %v8961_v53  ;;  %v9359_v18 = vadd.f32 %v3394_v52, %v8970_v26  ;;  %7000 = vmatprep.subr.mxu0 %v3989_v15  ;;  %7084 = vmatprep.subr.mxu1 %v4373_v12 }
 0x2ae   : > { %7001 = vmatpush3.msra.mxu0 %v3989_v15  ;;  %7085 = vmatpush3.msra.mxu1 %v4373_v12  ;;  %v4368_v15 = vld [vmem:[#allocation7 + $0x1b8] sm:$0xff] }
 0x2af   : > { %6873 = vmatprep.mubr.f32.mxu0 %v9356_v21  ;;  %6956 = vmatprep.mubr.f32.mxu1 %v9356_v21 }
 0x2b0   : > { %v3396_v45 = vpop.permute.xlu0 %3395  ;;  %6874 = vmatmul.mubr.f32.gmra.mxu0 %v9359_v18  ;;  %6957 = vmatmul.mubr.f32.gmra.mxu1 %v9359_v18  ;;  %v3398_v49 = vpop.permute.xlu1 %3397 }
 0x2b1   : > { %v9366_v23 = vadd.f32 %v3396_v45, %v8981_v22  ;;  %v9369_v59 = vadd.f32 %v3398_v49, %v8994_v9  ;;  %7002 = vmatprep.subr.mxu0 %v3988_v1  ;;  %7086 = vmatprep.subr.mxu1 %v4372_v16  ;;  %v4367_v45 = vld [vmem:[#allocation7 + $0x1b0] sm:$0xff] }
 0x2b2   : > { %7003 = vmatpush3.msra.mxu0 %v3988_v1  ;;  %7087 = vmatpush3.msra.mxu1 %v4372_v16  ;;  %v3983_v16 = vld [vmem:[#allocation7 + $0x140] sm:$0xff] }
 0x2b3   : > { %6876 = vmatprep.mubr.f32.mxu0 %v9366_v23  ;;  %6959 = vmatprep.mubr.f32.mxu1 %v9366_v23 }
 0x2b4   : > { %v3400_v62 = vpop.permute.xlu0 %3399  ;;  %6877 = vmatmul.mubr.f32.gmra.mxu0 %v9369_v59  ;;  %6960 = vmatmul.mubr.f32.gmra.mxu1 %v9369_v59 }
 0x2b5   : > { %v9376_v17 = vadd.f32 %v3400_v62, %v9010_v29  ;;  %7004 = vmatprep.subr.mxu0 %v3987_v55  ;;  %7088 = vmatprep.subr.mxu1 %v4371_v25  ;;  %v4366_v62 = vld [vmem:[#allocation7 + $0x1a8] sm:$0xff] }
 0x2b6   : > { %7005 = vmatpush3.msra.mxu0 %v3987_v55  ;;  %7089 = vmatpush3.msra.mxu1 %v4371_v25  ;;  %v3982_v25 = vld [vmem:[#allocation7 + $0x138] sm:$0xff] }
 0x2b7   : > { %6879 = vmatprep.mubr.f32.mxu0 %v9376_v17  ;;  %6962 = vmatprep.mubr.f32.mxu1 %v9376_v17 }
 0x2b8   : > { %v3402_v34 = vpop.permute.xlu1 %3401  ;;  %7006 = vmatprep.subr.mxu0 %v3986_v44  ;;  %7090 = vmatprep.subr.mxu1 %v4370_v27 }
 0x2b9   : > { %v9381_v60 = vadd.f32 %v3402_v34, %v9005_v61  ;;  %7007 = vmatpush3.msra.mxu0 %v3986_v44  ;;  %7091 = vmatpush3.msra.mxu1 %v4370_v27  ;;  %v3981_v44 = vld [vmem:[#allocation7 + $0x130] sm:$0xff]  ;;  %v4365_v27 = vld [vmem:[#allocation7 + $0x1a0] sm:$0xff]  ;;  %v3980_v34 = vld [vmem:[#allocation7 + $0x128] sm:$0xff] }
 0x2ba   : > { %7008 = vmatprep.subr.mxu0 %v3985_v46  ;;  %7092 = vmatprep.subr.mxu1 %v4369_v56 }
 0x2bb   : > { %6880 = vmatmul.mubr.f32.gmra.mxu0 %v9381_v60  ;;  %6963 = vmatmul.mubr.f32.gmra.mxu1 %v9381_v60  ;;  %v3404_v12 = vpop.permute.xlu0 %3403 }
 0x2bc   : > { %v9386_v33 = vadd.f32 %v3404_v12, %v9032_v20  ;;  %v3406_v52 = vpop.permute.xlu1 %3405  ;;  %7009 = vmatpush3.msra.mxu0 %v3985_v46  ;;  %7093 = vmatpush3.msra.mxu1 %v4369_v56 }
 0x2bd   : > { %v9389_v1 = vadd.f32 %v3406_v52, %v9044_v24  ;;  %7010 = vmatprep.subr.mxu0 %v3984_v43  ;;  %7094 = vmatprep.subr.mxu1 %v4368_v15 }
 0x2be   : > { %6882 = vmatprep.mubr.f32.mxu0 %v9386_v33  ;;  %6965 = vmatprep.mubr.f32.mxu1 %v9386_v33 }
 0x2bf   : > { %6883 = vmatmul.mubr.f32.gmra.mxu0 %v9389_v1  ;;  %6966 = vmatmul.mubr.f32.gmra.mxu1 %v9389_v1 }
 0x2c0   : > { %v3408_v49 = vpop.permute.xlu0 %3407  ;;  %7011 = vmatpush3.msra.mxu0 %v3984_v43  ;;  %7095 = vmatpush3.msra.mxu1 %v4368_v15  ;;  %v4364_v43 = vld [vmem:[#allocation7 + $0x198] sm:$0xff] }
 0x2c1   : > { %v9396_v55 = vadd.f32 %v3408_v49, %v9062_v31  ;;  %7012 = vmatprep.subr.mxu0 %v3983_v16  ;;  %7096 = vmatprep.subr.mxu1 %v4367_v45  ;;  %v4363_v49 = vld [vmem:[#allocation7 + $0x190] sm:$0xff] }
 0x2c2   : > { %7013 = vmatpush3.msra.mxu0 %v3983_v16  ;;  %7097 = vmatpush3.msra.mxu1 %v4367_v45  ;;  %v3979_v45 = vld [vmem:[#allocation7 + $0x120] sm:$0xff] }
 0x2c3   : > { %6885 = vmatprep.mubr.f32.mxu0 %v9396_v55  ;;  %6968 = vmatprep.mubr.f32.mxu1 %v9396_v55 }
 0x2c4   : > { %v3410_v46 = vpop.permute.xlu1 %3409  ;;  %7014 = vmatprep.subr.mxu0 %v3982_v25  ;;  %7098 = vmatprep.subr.mxu1 %v4366_v62 }
 0x2c5   : > { %v9401_v56 = vadd.f32 %v3410_v46, %v9055_v47  ;;  %7015 = vmatpush3.msra.mxu0 %v3982_v25  ;;  %7099 = vmatpush3.msra.mxu1 %v4366_v62  ;;  %v3977_v46 = vld [vmem:[#allocation7 + $0x110] sm:$0xff] }
 0x2c6   : > { %7016 = vmatprep.subr.mxu0 %v3981_v44  ;;  %7100 = vmatprep.subr.mxu1 %v4365_v27 }
 0x2c7   : > { %6886 = vmatmul.mubr.f32.gmra.mxu0 %v9401_v56  ;;  %6969 = vmatmul.mubr.f32.gmra.mxu1 %v9401_v56  ;;  %v3412_v15 = vpop.permute.xlu0 %3411 }
 0x2c8   : > { %v9406_v12 = vadd.f32 %v3412_v15, %v9088_v41  ;;  %v3414_v52 = vpop.permute.xlu1 %3413  ;;  %7017 = vmatpush3.msra.mxu0 %v3981_v44  ;;  %7101 = vmatpush3.msra.mxu1 %v4365_v27  ;;  %v3978_v44 = vld [vmem:[#allocation7 + $0x118] sm:$0xff]  ;;  %v4362_v27 = vld [vmem:[#allocation7 + $0x188] sm:$0xff]  ;;  %v4361_v15 = vld [vmem:[#allocation7 + $0x180] sm:$0xff] }
 0x2c9   : > { %v9409_v16 = vadd.f32 %v3414_v52, %v9100_v57  ;;  %7018 = vmatprep.subr.mxu0 %v3980_v34  ;;  %7102 = vmatprep.subr.mxu1 %v4364_v43 }
 0x2ca   : > { %6888 = vmatprep.mubr.f32.mxu0 %v9406_v12  ;;  %6971 = vmatprep.mubr.f32.mxu1 %v9406_v12 }
 0x2cb   : > { %6889 = vmatmul.mubr.f32.gmra.mxu0 %v9409_v16  ;;  %6972 = vmatmul.mubr.f32.gmra.mxu1 %v9409_v16 }
 0x2cc   : > { %v3416_v25 = vpop.permute.xlu0 %3415  ;;  %7019 = vmatpush3.msra.mxu0 %v3980_v34  ;;  %7103 = vmatpush3.msra.mxu1 %v4364_v43  ;;  %v3976_v43 = vld [vmem:[#allocation7 + $0x108] sm:$0xff] }
 0x2cd   : > { %v9416_v62 = vadd.f32 %v3416_v25, %v9116_v63  ;;  %7020 = vmatprep.subr.mxu0 %v3979_v45  ;;  %7104 = vmatprep.subr.mxu1 %v4363_v49  ;;  %v9423_v25 = vld [vmem:[#allocation7 + $0x2f8] sm:$0xff] }
 0x2ce   : > { %7021 = vmatpush3.msra.mxu0 %v3979_v45  ;;  %7105 = vmatpush3.msra.mxu1 %v4363_v49 }
 0x2cf   : > { %6891 = vmatprep.mubr.f32.mxu0 %v9416_v62  ;;  %6974 = vmatprep.mubr.f32.mxu1 %v9416_v62 }
 0x2d0   : > { %v3418_v52 = vpop.permute.xlu1 %3417  ;;  %7022 = vmatprep.subr.mxu0 %v3978_v44  ;;  %7106 = vmatprep.subr.mxu1 %v4362_v27 }
 0x2d1   : > { %v9421_v34 = vadd.f32 %v3418_v52, %v9111_v39  ;;  %7023 = vmatpush3.msra.mxu0 %v3978_v44  ;;  %7107 = vmatpush3.msra.mxu1 %v4362_v27  ;;  %v3975_v44 = vld [vmem:[#allocation7 + $0x100] sm:$0xff] }
 0x2d2   : > { %7024 = vmatprep.subr.mxu0 %v3977_v46  ;;  %7108 = vmatprep.subr.mxu1 %v4361_v15 }
 0x2d3   : > { %6892 = vmatmul.mubr.f32.gmra.mxu0 %v9421_v34  ;;  %6975 = vmatmul.mubr.f32.gmra.mxu1 %v9421_v34  ;;  %v3420_v45 = vpop.permute.xlu0 %3419 }
 0x2d4   : > { %v9428_v49 = vadd.f32 %v3420_v45, %v9138_v5  ;;  %v3422_v51 = vpop.permute.xlu1 %3421  ;;  %7025 = vmatpush3.msra.mxu0 %v3977_v46  ;;  %7109 = vmatpush3.msra.mxu1 %v4361_v15 }
 0x2d5   : > { %v9431_v52 = vadd.f32 %v3422_v51, %v9150_v13  ;;  %7026 = vmatprep.subr.mxu0 %v3976_v43  ;;  %7238 = vmatprep.subr.mxu1 %v9423_v25  ;;  %v9441_v51 = vld [vmem:[#allocation7 + $0x278] sm:$0xff] }
 0x2d6   : > { %6894 = vmatprep.mubr.f32.mxu0 %v9428_v49  ;;  %6977 = vmatprep.mubr.f32.mxu1 %v9428_v49 }
 0x2d7   : > { %6895 = vmatmul.mubr.f32.gmra.mxu0 %v9431_v52  ;;  %6978 = vmatmul.mubr.f32.gmra.mxu1 %v9431_v52 }
 0x2d8   : > { %v3424_v27 = vpop.permute.xlu0 %3423  ;;  %7027 = vmatpush3.msra.mxu0 %v3976_v43 }
 0x2d9   : > { %v9439_v46 = vadd.f32 %v3424_v27, %v9166_v38  ;;  %7028 = vmatprep.subr.mxu0 %v3975_v44 }
 0x2da   : > { %7029 = vmatpush3.msra.mxu0 %v3975_v44 }
 0x2db   : > { %6897 = vmatprep.mubr.f32.mxu0 %v9439_v46  ;;  %6980 = vmatprep.mubr.f32.mxu1 %v9439_v46 }
 0x2dc   : > { %v3426_v15 = vpop.permute.xlu1 %3425  ;;  %7158 = vmatprep.subr.mxu0 %v9441_v51 }
 0x2dd   : > { %v9447_v45 = vadd.f32 %v3426_v15, %v9161_v36 }
 0x2df   : > { %6898 = vmatmul.mubr.f32.gmra.mxu0 %v9447_v45  ;;  %6981 = vmatmul.mubr.f32.gmra.mxu1 %v9447_v45  ;;  %v3428_v43 = vpop.permute.xlu0 %3427 }
 0x2e0   : > { %v9452_v27 = vadd.f32 %v3428_v43, %v9188_v58  ;;  %v3430_v2 = vpop.permute.xlu1 %3429 }
 0x2e1   : > { %v9455_v44 = vadd.f32 %v3430_v2, %v9200_v32 }
 0x2e2   : > { %6900 = vmatprep.mubr.f32.mxu0 %v9452_v27  ;;  %6983 = vmatprep.mubr.f32.mxu1 %v9452_v27 }
 0x2e3   : > { %6901 = vmatmul.mubr.f32.gmra.mxu0 %v9455_v44  ;;  %6984 = vmatmul.mubr.f32.gmra.mxu1 %v9455_v44 }
 0x2e4   : > { %v3432_v15 = vpop.permute.xlu0 %3431 }
 0x2e5   : > { %v9462_v37 = vadd.f32 %v3432_v15, %v9216_v54 }
 0x2e7   : > { %10516 = vst [vmem:[#allocation83_spill] sm:$0xff] %v9462_v37  ;;  %6903 = vmatprep.mubr.f32.mxu0 %v9462_v37  ;;  %6986 = vmatprep.mubr.f32.mxu1 %v9462_v37 }
 0x2e8   : > { %v3434_v43 = vpop.permute.xlu1 %3433 }
 0x2e9   : > { %v9467_v2 = vadd.f32 %v3434_v43, %v9211_v40 }
 0x2eb   : > { %10517 = vst [vmem:[#allocation85_spill] sm:$0xff] %v9467_v2  ;;  %6904 = vmatmul.mubr.f32.gmra.mxu0 %v9467_v2  ;;  %6987 = vmatmul.mubr.f32.gmra.mxu1 %v9467_v2  ;;  %v3436_v7 = vpop.permute.xlu0 %3435  ;;  %v4248_v2 = vrot.slane %v8918_v19, 2 }
 0x2ec   : > { %v9472_v3 = vadd.f32 %v3436_v7, %v9242_v4  ;;  %v3438_v30 = vpop.permute.xlu1 %3437  ;;  %v4251_v4 = vrot.slane %v8932_v28, 2 }
 0x2ed   : > { %v9475_v15 = vadd.f32 %v3438_v30, %v9254_v42 }
 0x2ee   : > { %10518 = vst [vmem:[#allocation65_spill] sm:$0xff] %v9472_v3  ;;  %6906 = vmatprep.mubr.f32.mxu0 %v9472_v3  ;;  %6989 = vmatprep.mubr.f32.mxu1 %v9472_v3 }
 0x2ef   : > { %10519 = vst [vmem:[#allocation66_spill] sm:$0xff] %v9475_v15  ;;  %6907 = vmatmul.mubr.f32.gmra.mxu0 %v9475_v15  ;;  %6990 = vmatmul.mubr.f32.gmra.mxu1 %v9475_v15 }
 0x2f0   : > { %v3440_v43 = vpop.permute.xlu0 %3439 }
 0x2f1   : > { %v9482_v37 = vadd.f32 %v3440_v43, %v9270_v10 }
 0x2f3   : > { %10520 = vst [vmem:[#allocation86_spill] sm:$0xff] %v9482_v37  ;;  %6909 = vmatprep.mubr.f32.mxu0 %v9482_v37  ;;  %6992 = vmatprep.mubr.f32.mxu1 %v9482_v37  ;;  %v4249_v37 = vrot.slane %v8913_v50, 2  ;;  %v4253_v50 = vrot.slane %v8928_v11, 2 }
 0x2f4   : > { %v3442_v7 = vpop.permute.xlu1 %3441 }
 0x2f5   : > { %v9487_v30 = vadd.f32 %v3442_v7, %v9265_v6  ;;  %v4250_v19 = vsel %vm1593_vm0, %v4248_v2, %v4249_v37  ;;  %v4252_v28 = vsel %vm1593_vm0, %v4249_v37, %v4251_v4  ;;  %v10524_v2 = vld [vmem:[#allocation51_spill] sm:$0xff]  ;;  %v10525_v37 = vld [vmem:[#allocation53_spill] sm:$0xff] }
 0x2f7   : > { %10521 = vst [vmem:[#allocation87_spill] sm:$0xff] %v9487_v30  ;;  %6910 = vmatmul.mubr.f32.gmra.mxu0 %v9487_v30  ;;  %6993 = vmatmul.mubr.f32.gmra.mxu1 %v9487_v30  ;;  %v3444_v3 = vpop.permute.xlu0 %3443 }
 0x2f8   : > { %v9493_v15 = vadd.f32 %v3444_v3, %v9291_v48  ;;  %v3446_v43 = vpop.permute.xlu1 %3445  ;;  %v4254_v3 = vrot.slane %v8945_v14, 2  ;;  %v4256_v48 = vrot.slane %v10524_v2, 2  ;;  %v10527_v2 = vld [vmem:[#allocation58_spill] sm:$0xff] }
 0x2f9   : > { %v9496_v10 = vadd.f32 %v3446_v43, %v9306_v35 }
 0x2fa   : > { %10522 = vst [vmem:[#allocation67_spill] sm:$0xff] %v9493_v15  ;;  %6912 = vmatprep.mubr.f32.mxu0 %v9493_v15  ;;  %6995 = vmatprep.mubr.f32.mxu1 %v9493_v15  ;;  %v4937_v15 = vld [vmem:[#allocation7 + $0x2f0] sm:$0xff]  ;;  %v9513_v30 = vsel %vm1593_vm0, %v4253_v50, %v4254_v3  ;;  %v9524_v4 = vsel %vm1593_vm0, %v4254_v3, %v4256_v48  ;;  %v4935_v3 = vld [vmem:[#allocation7 + $0x2e0] sm:$0xff] }
 0x2fb   : > { %10523 = vst [vmem:[#allocation89_spill] sm:$0xff] %v9496_v10  ;;  %v3448_v7 = vpop.permute.xlu0 %3447  ;;  %6913 = vmatmul.mubr.f32.gmra.mxu0 %v9496_v10  ;;  %6996 = vmatmul.mubr.f32.gmra.mxu1 %v9496_v10  ;;  %v4258_v10 = vrot.slane %v8961_v53, 2  ;;  %v4936_v53 = vld [vmem:[#allocation7 + $0x2e8] sm:$0xff] }
 0x2fc   : > { %v9507_v43 = vadd.f32 %v3448_v7, %v9318_v8  ;;  %7110 = vmatprep.mubr.f32.mxu1 %v4250_v19  ;;  %v4259_v7 = vrot.slane %v8970_v26, 2  ;;  %v4261_v19 = vrot.slane %v10525_v37, 2  ;;  %v4264_v26 = vrot.slane %v8994_v9, 2 }
 0x2fe   : > { %6915 = vmatprep.mubr.f32.mxu0 %v9507_v43  ;;  %v9530_v50 = vsel %vm1593_vm0, %v4258_v10, %v4259_v7  ;;  %v9536_v48 = vsel %vm1593_vm0, %v4259_v7, %v4261_v19  ;;  %v4268_v10 = vrot.slane %v9010_v29, 2  ;;  %v4655_v29 = vld [vmem:[#allocation7 + $0x268] sm:$0xff]  ;;  %v4934_v7 = vld [vmem:[#allocation7 + $0x2d8] sm:$0xff]  ;;  %v4933_v19 = vld [vmem:[#allocation7 + $0x2d0] sm:$0xff] }
 0x2ff   : > { %7111 = vmatmul.mubr.f32.vlgmr.msra.gmra.mxu1 %v4252_v28 }
 0x300   : > { %v3450_v14 = vpop.permute.xlu1 %3449  ;;  %7113 = vmatprep.mubr.f32.mxu1 %v9513_v30  ;;  %7239 = vmatpush3.msra.mxu1 %v9423_v25  ;;  %v4263_v25 = vrot.slane %v8981_v22, 2  ;;  %v4269_v22 = vrot.slane %v9005_v61, 2  ;;  %v4273_v61 = vrot.slane %v9032_v20, 2  ;;  %v4279_v20 = vrot.slane %v9055_v47, 2 }
 0x301   : > { %v9520_v11 = vadd.f32 %v3450_v14, %v9311_v0  ;;  %7240 = vmatprep.subr.mxu1 %v4937_v15  ;;  %v4271_v14 = vrot.slane %v10527_v2, 2  ;;  %v4283_v47 = vrot.slane %v9088_v41, 2  ;;  %v4289_v41 = vrot.slane %v9111_v39, 2  ;;  %v4651_v2 = vld [vmem:[#allocation7 + $0x248] sm:$0xff] }
 0x302   : > { %7241 = vmatpush3.msra.mxu1 %v4937_v15  ;;  %v4656_v15 = vld [vmem:[#allocation7 + $0x270] sm:$0xff]  ;;  %v9546_v9 = vsel %vm1593_vm0, %v4263_v25, %v4264_v26  ;;  %v4653_v25 = vld [vmem:[#allocation7 + $0x258] sm:$0xff]  ;;  %v4293_v39 = vrot.slane %v9138_v5, 2  ;;  %v4299_v5 = vrot.slane %v9161_v36, 2  ;;  %v4303_v36 = vrot.slane %v9188_v58, 2 }
 0x303   : > { %6916 = vmatmul.mubr.f32.gmra.mxu0 %v9520_v11  ;;  %7114 = vmatmul.mubr.f32.gmra.mxu1 %v9524_v4  ;;  %v9564_v37 = vsel %vm1593_vm0, %v4269_v22, %v4271_v14  ;;  %v10531_v14 = vld [vmem:[#allocation54_spill] sm:$0xff]  ;;  %v4309_v58 = vrot.slane %v9211_v40, 2  ;;  %v10536_v40 = vld [vmem:[#allocation83_spill] sm:$0xff] }
 0x304   : > { %7030 = vmatprep.mubr.f32.mxu0 %v9356_v21  ;;  %7116 = vmatprep.mubr.f32.mxu1 %v9530_v50  ;;  %v10526_v21 = vld [vmem:[#allocation56_spill] sm:$0xff] }
 0x305   : > { %7242 = vmatprep.subr.mxu1 %v4936_v53  ;;  %v4266_v28 = vrot.slane %v10526_v21, 2 }
 0x306   : > { %7243 = vmatpush3.msra.mxu1 %v4936_v53  ;;  %v10528_v53 = vld [vmem:[#allocation45_spill] sm:$0xff] }
 0x307   : > { %7031 = vmatmul.mubr.f32.vlgmr.msra.gmra.mxu0 %v9359_v18  ;;  %7117 = vmatmul.mubr.f32.gmra.mxu1 %v9536_v48  ;;  %v9551_v18 = vsel %vm1593_vm0, %v4264_v26, %v4266_v28  ;;  %v4276_v26 = vrot.slane %v10528_v53, 2  ;;  %v4931_v28 = vld [vmem:[#allocation7 + $0x2c0] sm:$0xff]  ;;  %v4649_v53 = vld [vmem:[#allocation7 + $0x238] sm:$0xff] }
 0x308   : > { %7033 = vmatprep.mubr.f32.mxu0 %v9366_v23  ;;  %7159 = vmatpush3.msra.mxu0 %v9441_v51  ;;  %v9557_v23 = vsel %vm1593_vm0, %v4268_v10, %v4269_v22  ;;  %v4274_v51 = vrot.slane %v9044_v24, 2  ;;  %v10530_v22 = vld [vmem:[#allocation59_spill] sm:$0xff] }
 0x309   : > { %7119 = vmatprep.mubr.f32.mxu1 %v9546_v9  ;;  %7160 = vmatprep.subr.mxu0 %v4656_v15 }
 0x30a   : > { %7161 = vmatpush3.msra.mxu0 %v4656_v15  ;;  %7244 = vmatprep.subr.mxu1 %v4935_v3  ;;  %v9569_v24 = vsel %vm1593_vm0, %v4273_v61, %v4274_v51  ;;  %v10529_v15 = vld [vmem:[#allocation49_spill] sm:$0xff] }
 0x30b   : > { %7034 = vmatmul.mubr.f32.gmra.mxu0 %v9369_v59  ;;  %7120 = vmatmul.mubr.f32.gmra.mxu1 %v9551_v18  ;;  %v4654_v59 = vld [vmem:[#allocation7 + $0x260] sm:$0xff]  ;;  %v4281_v10 = vrot.slane %v10529_v15, 2 }
 0x30c   : > { %7036 = vmatprep.mubr.f32.mxu0 %v9376_v17  ;;  %7122 = vmatprep.mubr.f32.mxu1 %v9557_v23  ;;  %v4278_v17 = vrot.slane %v9062_v31, 2 }
 0x30d   : > { %7162 = vmatprep.subr.mxu0 %v4655_v29  ;;  %7245 = vmatpush3.msra.mxu1 %v4935_v3  ;;  %v4932_v3 = vld [vmem:[#allocation7 + $0x2c8] sm:$0xff]  ;;  %v9590_v21 = vsel %vm1593_vm0, %v4279_v20, %v4281_v10  ;;  %v4927_v10 = vld [vmem:[#allocation7 + $0x2a0] sm:$0xff] }
 0x30e   : > { %7163 = vmatpush3.msra.mxu0 %v4655_v29  ;;  %7246 = vmatprep.subr.mxu1 %v4934_v7  ;;  %v9583_v31 = vsel %vm1593_vm0, %v4278_v17, %v4279_v20  ;;  %v4286_v29 = vrot.slane %v10530_v22, 2  ;;  %v10532_v17 = vld [vmem:[#allocation60_spill] sm:$0xff]  ;;  %v10537_v22 = vld [vmem:[#allocation57_spill] sm:$0xff] }
 0x30f   : > { %7037 = vmatmul.mubr.f32.gmra.mxu0 %v9381_v60  ;;  %7123 = vmatmul.mubr.f32.gmra.mxu1 %v9564_v37  ;;  %v9577_v60 = vsel %vm1593_vm0, %v4274_v51, %v4276_v26  ;;  %v4291_v51 = vrot.slane %v10531_v14, 2  ;;  %v10533_v26 = vld [vmem:[#allocation52_spill] sm:$0xff]  ;;  %v10539_v14 = vld [vmem:[#allocation62_spill] sm:$0xff] }
 0x310   : > { %7039 = vmatprep.mubr.f32.mxu0 %v9386_v33  ;;  %7125 = vmatprep.mubr.f32.mxu1 %v9569_v24  ;;  %v4284_v33 = vrot.slane %v9100_v57, 2  ;;  %v4301_v20 = vrot.slane %v10533_v26, 2 }
 0x311   : > { %7164 = vmatprep.subr.mxu0 %v4654_v59  ;;  %7247 = vmatpush3.msra.mxu1 %v4934_v7  ;;  %v4930_v7 = vld [vmem:[#allocation7 + $0x2b8] sm:$0xff]  ;;  %v9616_v61 = vsel %vm1593_vm0, %v4289_v41, %v4291_v51  ;;  %v4318_v51 = vrot.slane %v10539_v14, 2 }
 0x312   : > { %7165 = vmatpush3.msra.mxu0 %v4654_v59  ;;  %7248 = vmatprep.subr.mxu1 %v4933_v19  ;;  %v9595_v57 = vsel %vm1593_vm0, %v4283_v47, %v4284_v33  ;;  %v4929_v59 = vld [vmem:[#allocation7 + $0x2b0] sm:$0xff]  ;;  %v9642_v15 = vsel %vm1593_vm0, %v4299_v5, %v4301_v20  ;;  %v10535_v47 = vld [vmem:[#allocation61_spill] sm:$0xff]  ;;  %v4324_v20 = vrot.slane %v9306_v35, 2 }
 0x313   : > { %7040 = vmatmul.mubr.f32.gmra.mxu0 %v9389_v1  ;;  %7126 = vmatmul.mubr.f32.gmra.mxu1 %v9577_v60  ;;  %v4652_v1 = vld [vmem:[#allocation7 + $0x250] sm:$0xff] }
 0x314   : > { %7042 = vmatprep.mubr.f32.mxu0 %v9396_v55  ;;  %7128 = vmatprep.mubr.f32.mxu1 %v9583_v31  ;;  %v4288_v55 = vrot.slane %v9116_v63, 2 }
 0x315   : > { %7166 = vmatprep.subr.mxu0 %v4653_v25  ;;  %7249 = vmatpush3.msra.mxu1 %v4933_v19  ;;  %v4296_v19 = vrot.slane %v10532_v17, 2 }
 0x316   : > { %7167 = vmatpush3.msra.mxu0 %v4653_v25  ;;  %7250 = vmatprep.subr.mxu1 %v4932_v3  ;;  %v9609_v63 = vsel %vm1593_vm0, %v4288_v55, %v4289_v41  ;;  %v4928_v25 = vld [vmem:[#allocation7 + $0x2a8] sm:$0xff] }
 0x317   : > { %7043 = vmatmul.mubr.f32.gmra.mxu0 %v9401_v56  ;;  %7129 = vmatmul.mubr.f32.gmra.mxu1 %v9590_v21  ;;  %v9603_v56 = vsel %vm1593_vm0, %v4284_v33, %v4286_v29  ;;  %v10534_v33 = vld [vmem:[#allocation17_spill] sm:$0xff]  ;;  %v4647_v55 = vld [vmem:[#allocation7 + $0x228] sm:$0xff]  ;;  %v4313_v29 = vrot.slane %v10537_v22, 2 }
 0x318   : > { %7045 = vmatprep.mubr.f32.mxu0 %v9406_v12  ;;  %7131 = vmatprep.mubr.f32.mxu1 %v9595_v57  ;;  %v4294_v12 = vrot.slane %v9150_v13, 2 }
 0x319   : > { %7168 = vmatprep.subr.mxu0 %v4652_v1  ;;  %7251 = vmatpush3.msra.mxu1 %v4932_v3  ;;  %v4306_v3 = vrot.slane %v10534_v33, 2  ;;  %v4923_v33 = vld [vmem:[#allocation7 + $0x280] sm:$0xff] }
 0x31a   : > { %7169 = vmatpush3.msra.mxu0 %v4652_v1  ;;  %7252 = vmatprep.subr.mxu1 %v4931_v28  ;;  %v9621_v13 = vsel %vm1593_vm0, %v4293_v39, %v4294_v12 }
 0x31b   : > { %7046 = vmatmul.mubr.f32.gmra.mxu0 %v9409_v16  ;;  %7132 = vmatmul.mubr.f32.gmra.mxu1 %v9603_v56  ;;  %v4650_v16 = vld [vmem:[#allocation7 + $0x240] sm:$0xff] }
 0x31c   : > { %7048 = vmatprep.mubr.f32.mxu0 %v9416_v62  ;;  %7134 = vmatprep.mubr.f32.mxu1 %v9609_v63  ;;  %v4298_v62 = vrot.slane %v9166_v38, 2 }
 0x31d   : > { %7170 = vmatprep.subr.mxu0 %v4651_v2  ;;  %7253 = vmatpush3.msra.mxu1 %v4931_v28  ;;  %v4926_v28 = vld [vmem:[#allocation7 + $0x298] sm:$0xff] }
 0x31e   : > { %7171 = vmatpush3.msra.mxu0 %v4651_v2  ;;  %7254 = vmatprep.subr.mxu1 %v4930_v7  ;;  %v9635_v38 = vsel %vm1593_vm0, %v4298_v62, %v4299_v5  ;;  %v10538_v2 = vld [vmem:[#allocation85_spill] sm:$0xff]  ;;  %v4319_v62 = vrot.slane %v9265_v6, 2  ;;  %v4645_v5 = vld [vmem:[#allocation7 + $0x218] sm:$0xff]  ;;  %v10544_v6 = vld [vmem:[#allocation86_spill] sm:$0xff] }
 0x31f   : > { %7049 = vmatmul.mubr.f32.gmra.mxu0 %v9421_v34  ;;  %7135 = vmatmul.mubr.f32.gmra.mxu1 %v9616_v61  ;;  %v9629_v34 = vsel %vm1593_vm0, %v4294_v12, %v4296_v19  ;;  %v4925_v12 = vld [vmem:[#allocation7 + $0x290] sm:$0xff] }
 0x320   : > { %7051 = vmatprep.mubr.f32.mxu0 %v9428_v49  ;;  %7137 = vmatprep.mubr.f32.mxu1 %v9621_v13  ;;  %v4304_v49 = vrot.slane %v9200_v32, 2  ;;  %v9687_v26 = vsel %vm1593_vm0, %v4318_v51, %v4319_v62  ;;  %v10553_v51 = vld [vmem:[#allocation64_spill] sm:$0xff] }
 0x321   : > { %7172 = vmatprep.subr.mxu0 %v4650_v16  ;;  %7255 = vmatpush3.msra.mxu1 %v4930_v7  ;;  %v10540_v7 = vld [vmem:[#allocation78_spill] sm:$0xff] }
 0x322   : > { %7173 = vmatpush3.msra.mxu0 %v4650_v16  ;;  %7256 = vmatprep.subr.mxu1 %v4929_v59  ;;  %v9647_v32 = vsel %vm1593_vm0, %v4303_v36, %v4304_v49  ;;  %v9656_v1 = vsel %vm1593_vm0, %v4304_v49, %v4306_v3  ;;  %v4316_v39 = vrot.slane %v10540_v7, 2  ;;  %v10541_v16 = vld [vmem:[#allocation65_spill] sm:$0xff]  ;;  %v4924_v49 = vld [vmem:[#allocation7 + $0x288] sm:$0xff]  ;;  %v10547_v3 = vld [vmem:[#allocation80_spill] sm:$0xff] }
 0x323   : > { %7052 = vmatmul.mubr.f32.gmra.mxu0 %v9431_v52  ;;  %7138 = vmatmul.mubr.f32.gmra.mxu1 %v9629_v34  ;;  %v4648_v52 = vld [vmem:[#allocation7 + $0x230] sm:$0xff] }
 0x324   : > { %7054 = vmatprep.mubr.f32.mxu0 %v9439_v46  ;;  %7140 = vmatprep.mubr.f32.mxu1 %v9635_v38  ;;  %v4308_v46 = vrot.slane %v9216_v54, 2 }
 0x325   : > { %7174 = vmatprep.subr.mxu0 %v4649_v53  ;;  %7257 = vmatpush3.msra.mxu1 %v4929_v59  ;;  %v10542_v59 = vld [vmem:[#allocation63_spill] sm:$0xff] }
 0x326   : > { %7175 = vmatpush3.msra.mxu0 %v4649_v53  ;;  %7258 = vmatprep.subr.mxu1 %v4928_v25  ;;  %v9661_v54 = vsel %vm1593_vm0, %v4308_v46, %v4309_v58  ;;  %v4321_v17 = vrot.slane %v10542_v59, 2  ;;  %v10543_v53 = vld [vmem:[#allocation66_spill] sm:$0xff]  ;;  %v4644_v46 = vld [vmem:[#allocation7 + $0x210] sm:$0xff] }
 0x327   : > { %7055 = vmatmul.mubr.f32.gmra.mxu0 %v9447_v45  ;;  %7141 = vmatmul.mubr.f32.gmra.mxu1 %v9642_v15  ;;  %v4311_v45 = vrot.slane %v10535_v47, 2  ;;  %v10548_v47 = vld [vmem:[#allocation67_spill] sm:$0xff] }
 0x328   : > { %7057 = vmatprep.mubr.f32.mxu0 %v9452_v27  ;;  %7143 = vmatprep.mubr.f32.mxu1 %v9647_v32  ;;  %v4314_v27 = vrot.slane %v9254_v42, 2 }
 0x329   : > { %7176 = vmatprep.subr.mxu0 %v4648_v52  ;;  %7259 = vmatpush3.msra.mxu1 %v4928_v25  ;;  %v9668_v41 = vsel %vm1593_vm0, %v4309_v58, %v4311_v45  ;;  %v10545_v25 = vld [vmem:[#allocation79_spill] sm:$0xff]  ;;  %v4326_v58 = vrot.slane %v10547_v3, 2 }
 0x32a   : > { %7177 = vmatpush3.msra.mxu0 %v4648_v52  ;;  %7260 = vmatprep.subr.mxu1 %v4927_v10  ;;  %v9673_v42 = vsel %vm1593_vm0, %v4313_v29, %v4314_v27  ;;  %v9682_v19 = vsel %vm1593_vm0, %v4314_v27, %v4316_v39  ;;  %v4323_v36 = vrot.slane %v10545_v25, 2  ;;  %v9694_v52 = vsel %vm1593_vm0, %v4319_v62, %v4321_v17  ;;  %v3452_v27 = vpop.permute.xlu0 %3451  ;;  %v3454_v29 = vpop.permute.xlu1 %3453 }
 0x32b   : > { %7058 = vmatmul.mubr.f32.gmra.mxu0 %v9455_v44  ;;  %7144 = vmatmul.mubr.f32.gmra.mxu1 %v9656_v1  ;;  %v4646_v44 = vld [vmem:[#allocation7 + $0x220] sm:$0xff]  ;;  %v9705_v45 = vsel %vm1593_vm0, %v4324_v20, %v4326_v58 }
 0x32c   : > { %7060 = vmatprep.mubr.f32.mxu0 %v10536_v40  ;;  %7146 = vmatprep.mubr.f32.mxu1 %v9661_v54  ;;  %v9699_v35 = vsel %vm1593_vm0, %v4323_v36, %v4324_v20  ;;  %v10550_v40 = vld [vmem:[#allocation82_spill] sm:$0xff] }
 0x32d   : > { %7178 = vmatprep.subr.mxu0 %v4647_v55  ;;  %7261 = vmatpush3.msra.mxu1 %v4927_v10  ;;  %v10546_v10 = vld [vmem:[#allocation87_spill] sm:$0xff]  ;;  %v3489_v22 = vadd.f32 %v3452_v27, %v10550_v40 }
 0x32e   : > { %7179 = vmatpush3.msra.mxu0 %v4647_v55  ;;  %7262 = vmatprep.subr.mxu1 %v4926_v28  ;;  %v4643_v55 = vld [vmem:[#allocation7 + $0x208] sm:$0xff] }
 0x32f   : > { %7061 = vmatmul.mubr.f32.gmra.mxu0 %v10538_v2  ;;  %7147 = vmatmul.mubr.f32.gmra.mxu1 %v9668_v41  ;;  %v10551_v2 = vld [vmem:[#allocation84_spill] sm:$0xff] }
 0x330   : > { %7063 = vmatprep.mubr.f32.mxu0 %v10541_v16  ;;  %7149 = vmatprep.mubr.f32.mxu1 %v9673_v42  ;;  %v3490_v14 = vadd.f32 %v3454_v29, %v10551_v2 }
 0x331   : > { %7180 = vmatprep.subr.mxu0 %v4646_v44  ;;  %7263 = vmatpush3.msra.mxu1 %v4926_v28  ;;  %v10549_v28 = vld [vmem:[#allocation89_spill] sm:$0xff] }
 0x332   : > { %7181 = vmatpush3.msra.mxu0 %v4646_v44  ;;  %7264 = vmatprep.subr.mxu1 %v4925_v12  ;;  %v4642_v44 = vld [vmem:[#allocation7 + $0x200] sm:$0xff] }
 0x333   : > { %7064 = vmatmul.mubr.f32.gmra.mxu0 %v10543_v53  ;;  %7150 = vmatmul.mubr.f32.gmra.mxu1 %v9682_v19 }
 0x334   : > { %7066 = vmatprep.mubr.f32.mxu0 %v10544_v6  ;;  %7152 = vmatprep.mubr.f32.mxu1 %v9687_v26 }
 0x335   : > { %7182 = vmatprep.subr.mxu0 %v4645_v5  ;;  %7265 = vmatpush3.msra.mxu1 %v4925_v12  ;;  %v4918_v12 = vrot.slane %v10553_v51, 2 }
 0x336   : > { %7183 = vmatpush3.msra.mxu0 %v4645_v5  ;;  %7266 = vmatprep.subr.mxu1 %v4924_v49 }
 0x337   : > { %7067 = vmatmul.mubr.f32.gmra.mxu0 %v10546_v10  ;;  %7153 = vmatmul.mubr.f32.gmra.mxu1 %v9694_v52 }
 0x338   : > { %7069 = vmatprep.mubr.f32.mxu0 %v10548_v47  ;;  %7155 = vmatprep.mubr.f32.mxu1 %v9699_v35 }
 0x339   : > { %7184 = vmatprep.subr.mxu0 %v4644_v46  ;;  %7267 = vmatpush3.msra.mxu1 %v4924_v49 }
 0x33a   : > { %7185 = vmatpush3.msra.mxu0 %v4644_v46  ;;  %7268 = vmatprep.subr.mxu1 %v4923_v33 }
 0x33b   : > { %7070 = vmatmul.mubr.f32.gmra.mxu0 %v10549_v28  ;;  %7156 = vmatmul.mubr.f32.gmra.mxu1 %v9705_v45 }
 0x33c   : > { %7072 = vmatprep.mubr.f32.mxu0 %v9507_v43  ;;  %7270 = vmatprep.mubr.f32.mxu1 %v9530_v50 }
 0x33d   : > { %7186 = vmatprep.subr.mxu0 %v4643_v55  ;;  %7269 = vmatpush3.msra.mxu1 %v4923_v33 }
 0x33e   : > { %7187 = vmatpush3.msra.mxu0 %v4643_v55 }
 0x33f   : > { %7073 = vmatmul.mubr.f32.gmra.mxu0 %v9520_v11  ;;  %7271 = vmatmul.mubr.f32.vlgmr.msra.gmra.mxu1 %v9536_v48 }
 0x340   : > { %7075 = vmatprep.mubr.f32.mxu0 %v3489_v22  ;;  %7273 = vmatprep.mubr.f32.mxu1 %v9546_v9 }
 0x341   : > { %7188 = vmatprep.subr.mxu0 %v4642_v44 }
 0x342   : > { %7189 = vmatpush3.msra.mxu0 %v4642_v44 }
 0x343   : > { %7076 = vmatmul.mubr.f32.gmra.mxu0 %v3490_v14  ;;  %7274 = vmatmul.mubr.f32.gmra.mxu1 %v9551_v18 }
 0x344   : > { %7190 = vmatprep.mubr.f32.mxu0 %v9513_v30  ;;  %7276 = vmatprep.mubr.f32.mxu1 %v9557_v23 }
 0x347   : > { %7191 = vmatmul.mubr.f32.vlgmr.msra.gmra.mxu0 %v9524_v4  ;;  %7277 = vmatmul.mubr.f32.gmra.mxu1 %v9564_v37 }
 0x348   : > { %7193 = vmatprep.mubr.f32.mxu0 %v9530_v50  ;;  %7279 = vmatprep.mubr.f32.mxu1 %v9569_v24 }
 0x34b   : > { %7194 = vmatmul.mubr.f32.gmra.mxu0 %v9536_v48  ;;  %7280 = vmatmul.mubr.f32.gmra.mxu1 %v9577_v60 }
 0x34c   : > { %7196 = vmatprep.mubr.f32.mxu0 %v9546_v9  ;;  %7282 = vmatprep.mubr.f32.mxu1 %v9583_v31 }
 0x34f   : > { %7197 = vmatmul.mubr.f32.gmra.mxu0 %v9551_v18  ;;  %7283 = vmatmul.mubr.f32.gmra.mxu1 %v9590_v21 }
 0x350   : > { %7199 = vmatprep.mubr.f32.mxu0 %v9557_v23  ;;  %7285 = vmatprep.mubr.f32.mxu1 %v9595_v57  ;;  %v4634_v23 = vrot.slane %v9318_v8, 2 }
 0x353   : > { %7200 = vmatmul.mubr.f32.gmra.mxu0 %v9564_v37  ;;  %7286 = vmatmul.mubr.f32.gmra.mxu1 %v9603_v56 }
 0x354   : > { %7202 = vmatprep.mubr.f32.mxu0 %v9569_v24  ;;  %7288 = vmatprep.mubr.f32.mxu1 %v9609_v63 }
 0x357   : > { %7203 = vmatmul.mubr.f32.gmra.mxu0 %v9577_v60  ;;  %7289 = vmatmul.mubr.f32.gmra.mxu1 %v9616_v61 }
 0x358   : > { %7205 = vmatprep.mubr.f32.mxu0 %v9583_v31  ;;  %7291 = vmatprep.mubr.f32.mxu1 %v9621_v13  ;;  %v4635_v31 = vrot.slane %v9311_v0, 2 }
 0x35a   : > { %v4636_v8 = vsel %vm1593_vm0, %v4634_v23, %v4635_v31 }
 0x35b   : > { %7206 = vmatmul.mubr.f32.gmra.mxu0 %v9590_v21  ;;  %7292 = vmatmul.mubr.f32.gmra.mxu1 %v9629_v34  ;;  %v10552_v21 = vld [vmem:[#allocation81_spill] sm:$0xff] }
 0x35c   : > { %7208 = vmatprep.mubr.f32.mxu0 %v9595_v57  ;;  %7294 = vmatprep.mubr.f32.mxu1 %v9635_v38  ;;  %v4637_v57 = vrot.slane %v10552_v21, 2 }
 0x35f   : > { %7209 = vmatmul.mubr.f32.gmra.mxu0 %v9603_v56  ;;  %7295 = vmatmul.mubr.f32.gmra.mxu1 %v9642_v15 }
 0x360   : > { %7211 = vmatprep.mubr.f32.mxu0 %v9609_v63  ;;  %7297 = vmatprep.mubr.f32.mxu1 %v9647_v32 }
 0x363   : > { %7212 = vmatmul.mubr.f32.gmra.mxu0 %v9616_v61  ;;  %7298 = vmatmul.mubr.f32.gmra.mxu1 %v9656_v1 }
 0x364   : > { %7214 = vmatprep.mubr.f32.mxu0 %v9621_v13  ;;  %7300 = vmatprep.mubr.f32.mxu1 %v9661_v54  ;;  %v4916_v13 = vrot.slane %v10551_v2, 2 }
 0x365   : > { %v6952_v30 = vpop.f32.mrf.mxu1 }
 0x366   : > { %v4919_v7 = vsel %vm1593_vm0, %v4916_v13, %v4918_v12 }
 0x367   : > { %7215 = vmatmul.mubr.f32.gmra.mxu0 %v9629_v34  ;;  %7301 = vmatmul.mubr.f32.gmra.mxu1 %v9668_v41  ;;  %v3815_v43 = vpop.f32.mrf.mxu1 }
 0x368   : > { %7217 = vmatprep.mubr.f32.mxu0 %v9635_v38  ;;  %7303 = vmatprep.mubr.f32.mxu1 %v9673_v42 }
 0x36b   : > { %v6872_v11 = vpop.f32.mrf.mxu0  ;;  %v6955_v4 = vpop.f32.mrf.mxu1  ;;  %7218 = vmatmul.mubr.f32.gmra.mxu0 %v9642_v15  ;;  %7304 = vmatmul.mubr.f32.gmra.mxu1 %v9682_v19  ;;  %v4915_v15 = vrot.slane %v10550_v40, 2 }
 0x36c   : > { %v9757_v50 = vadd.f32 %v6952_v30, %v6872_v11  ;;  %7220 = vmatprep.mubr.f32.mxu0 %v9647_v32  ;;  %7306 = vmatprep.mubr.f32.mxu1 %v9687_v26 }
 0x36d   : > { %v3590_v48 = vpop.f32.mrf.mxu0  ;;  %v3825_v9 = vpop.f32.mrf.mxu1 }
 0x36e   : > { %v9761_v18 = vadd.f32 %v3815_v43, %v3590_v48 }
 0x36f   : > { %7221 = vmatmul.mubr.f32.gmra.mxu0 %v9656_v1  ;;  %7307 = vmatmul.mubr.f32.gmra.mxu1 %v9694_v52  ;;  %v4638_v1 = vsel %vm1593_vm0, %v4635_v31, %v4637_v57 }
 0x370   : > { %v6875_v37 = vpop.f32.mrf.mxu0  ;;  %v6958_v24 = vpop.f32.mrf.mxu1  ;;  %7223 = vmatprep.mubr.f32.mxu0 %v9661_v54  ;;  %7309 = vmatprep.mubr.f32.mxu1 %v9699_v35 }
 0x371   : > { %v9768_v60 = vadd.f32 %v6955_v4, %v6875_v37 }
 0x372   : > { %v3600_v56 = vpop.f32.mrf.mxu0  ;;  %v3835_v63 = vpop.f32.mrf.mxu1 }
 0x373   : > { %v9772_v61 = vadd.f32 %v3825_v9, %v3600_v56  ;;  %7224 = vmatmul.mubr.f32.gmra.mxu0 %v9668_v41  ;;  %7310 = vmatmul.mubr.f32.gmra.mxu1 %v9705_v45  ;;  %v4917_v41 = vsel %vm1593_vm0, %v4915_v15, %v4916_v13 }
 0x374   : > { %v6878_v34 = vpop.f32.mrf.mxu0  ;;  %7226 = vmatprep.mubr.f32.mxu0 %v9673_v42  ;;  %7312 = vmatprep.mubr.f32.mxu1 %v4636_v8  ;;  %v6961_v0 = vpop.f32.mrf.mxu1 }
 0x375   : > { %v9779_v38 = vadd.f32 %v6958_v24, %v6878_v34 }
 0x376   : > { %v3610_v32 = vpop.f32.mrf.mxu0  ;;  %v3845_v42 = vpop.f32.mrf.mxu1 }
 0x377   : > { %v9783_v54 = vadd.f32 %v3835_v63, %v3610_v32  ;;  %7227 = vmatmul.mubr.f32.gmra.mxu0 %v9682_v19  ;;  %7313 = vmatmul.mubr.f32.gmra.mxu1 %v4638_v1 }
 0x378   : > { %7229 = vmatprep.mubr.f32.mxu0 %v9687_v26  ;;  %7315 = vmatprep.mubr.f32.mxu1 %v4917_v41 }
 0x37b   : > { %v6881_v39 = vpop.f32.mrf.mxu0  ;;  %v6964_v16 = vpop.f32.mrf.mxu1  ;;  %7230 = vmatmul.mubr.f32.gmra.mxu0 %v9694_v52  ;;  %7316 = vmatmul.mubr.f32.gmra.mxu1 %v4919_v7 }
 0x37c   : > { %v9791_v62 = vadd.f32 %v6961_v0, %v6881_v39  ;;  %7232 = vmatprep.mubr.f32.mxu0 %v9699_v35 }
 0x37d   : > { %v3620_v59 = vpop.f32.mrf.mxu0  ;;  %v3855_v17 = vpop.f32.mrf.mxu1 }
 0x37e   : > { %v9794_v19 = vadd.f32 %v3845_v42, %v3620_v59 }
 0x37f   : > { %7233 = vmatmul.mubr.f32.gmra.mxu0 %v9705_v45  ;;  %v6884_v5 = vpop.f32.mrf.mxu0  ;;  %v6967_v26 = vpop.f32.mrf.mxu1 }
 0x380   : > { %v9797_v53 = vadd.f32 %v6964_v16, %v6884_v5  ;;  %7235 = vmatprep.mubr.f32.mxu0 %v4636_v8 }
 0x381   : > { %v3630_v20 = vpop.f32.mrf.mxu0  ;;  %v3865_v6 = vpop.f32.mrf.mxu1 }
 0x382   : > { %v9799_v49 = vadd.f32 %v3855_v17, %v3630_v20 }
 0x383   : > { %7236 = vmatmul.mubr.f32.gmra.mxu0 %v4638_v1 }
 0x387   : > { %v6887_v25 = vpop.f32.mrf.mxu0  ;;  %v6970_v36 = vpop.f32.mrf.mxu1 }
 0x388   : > { %v9801_v52 = vadd.f32 %v6967_v26, %v6887_v25 }
 0x389   : > { %v3640_v46 = vpop.f32.mrf.mxu0  ;;  %v3875_v10 = vpop.f32.mrf.mxu1 }
 0x38a   : > { %v9803_v35 = vadd.f32 %v3865_v6, %v3640_v46 }
 0x38b   : > { %v6890_v33 = vpop.f32.mrf.mxu0  ;;  %v6973_v58 = vpop.f32.mrf.mxu1 }
 0x38c   : > { %v9805_v3 = vadd.f32 %v6970_v36, %v6890_v33 }
 0x38d   : > { %v3650_v47 = vpop.f32.mrf.mxu0  ;;  %v3885_v55 = vpop.f32.mrf.mxu1 }
 0x38e   : > { %v9807_v45 = vadd.f32 %v3875_v10, %v3650_v47 }
 0x393   : > { %v6893_v27 = vpop.f32.mrf.mxu0  ;;  %v6976_v28 = vpop.f32.mrf.mxu1 }
 0x394   : > { %v9809_v40 = vadd.f32 %v6973_v58, %v6893_v27 }
 0x395   : > { %v3660_v22 = vpop.f32.mrf.mxu0  ;;  %v3895_v29 = vpop.f32.mrf.mxu1 }
 0x396   : > { %v9811_v44 = vadd.f32 %v3885_v55, %v3660_v22 }
 0x397   : > { %v6896_v2 = vpop.f32.mrf.mxu0  ;;  %v6979_v30 = vpop.f32.mrf.mxu1 }
 0x398   : > { %v9813_v14 = vadd.f32 %v6976_v28, %v6896_v2 }
 0x399   : > { %v3670_v43 = vpop.f32.mrf.mxu0  ;;  %v3905_v4 = vpop.f32.mrf.mxu1 }
 0x39a   : > { %v9815_v11 = vadd.f32 %v3895_v29, %v3670_v43 }
 0x39f   : > { %v6899_v48 = vpop.f32.mrf.mxu0  ;;  %v6982_v9 = vpop.f32.mrf.mxu1 }
 0x3a0   : > { %v9817_v23 = vadd.f32 %v6979_v30, %v6899_v48 }
 0x3a1   : > { %v3680_v37 = vpop.f32.mrf.mxu0  ;;  %v3915_v24 = vpop.f32.mrf.mxu1 }
 0x3a2   : > { %10554 = vst [vmem:[#allocation88_spill] sm:$0xff] %v9817_v23  ;;  %v9819_v31 = vadd.f32 %v3905_v4, %v3680_v37 }
 0x3a3   : > { %v6902_v21 = vpop.f32.mrf.mxu0  ;;  %v6985_v56 = vpop.f32.mrf.mxu1 }
 0x3a4   : > { %10555 = vst [vmem:[#allocation90_spill] sm:$0xff] %v9819_v31  ;;  %v9821_v57 = vadd.f32 %v6982_v9, %v6902_v21 }
 0x3a5   : > { %v3690_v63 = vpop.f32.mrf.mxu0  ;;  %v3925_v13 = vpop.f32.mrf.mxu1 }
 0x3a6   : > { %10556 = vst [vmem:[#allocation91_spill] sm:$0xff] %v9821_v57  ;;  %v9823_v8 = vadd.f32 %v3915_v24, %v3690_v63 }
 0x3a8   : > { %10557 = vst [vmem:[#allocation68_spill] sm:$0xff] %v9823_v8 }
 0x3ab   : > { %v6905_v34 = vpop.f32.mrf.mxu0  ;;  %v6988_v0 = vpop.f32.mrf.mxu1 }
 0x3ac   : > { %v9825_v15 = vadd.f32 %v6985_v56, %v6905_v34 }
 0x3ad   : > { %v3700_v32 = vpop.f32.mrf.mxu0  ;;  %v3935_v1 = vpop.f32.mrf.mxu1 }
 0x3ae   : > { %10558 = vst [vmem:[#allocation69_spill] sm:$0xff] %v9825_v15  ;;  %v9827_v41 = vadd.f32 %v3925_v13, %v3700_v32 }
 0x3af   : > { %v6908_v51 = vpop.f32.mrf.mxu0  ;;  %v6991_v42 = vpop.f32.mrf.mxu1 }
 0x3b0   : > { %10559 = vst [vmem:[#allocation92_spill] sm:$0xff] %v9827_v41  ;;  %v9829_v12 = vadd.f32 %v6988_v0, %v6908_v51 }
 0x3b1   : > { %v3710_v7 = vpop.f32.mrf.mxu0  ;;  %v3945_v16 = vpop.f32.mrf.mxu1 }
 0x3b2   : > { %10560 = vst [vmem:[#allocation93_spill] sm:$0xff] %v9829_v12  ;;  %v9831_v39 = vadd.f32 %v3935_v1, %v3710_v7 }
 0x3b4   : > { %10561 = vst [vmem:[#allocation94_spill] sm:$0xff] %v9831_v39 }
 0x3b7   : > { %v6911_v59 = vpop.f32.mrf.mxu0  ;;  %v6994_v17 = vpop.f32.mrf.mxu1 }
 0x3b8   : > { %v9833_v5 = vadd.f32 %v6991_v42, %v6911_v59 }
 0x3b9   : > { %v3720_v26 = vpop.f32.mrf.mxu0  ;;  %v3955_v20 = vpop.f32.mrf.mxu1 }
 0x3ba   : > { %10562 = vst [vmem:[#allocation70_spill] sm:$0xff] %v9833_v5  ;;  %v9835_v6 = vadd.f32 %v3945_v16, %v3720_v26 }
 0x3bb   : > { %v6914_v25 = vpop.f32.mrf.mxu0  ;;  %v6997_v36 = vpop.f32.mrf.mxu1 }
 0x3bc   : > { %10563 = vst [vmem:[#allocation95_spill] sm:$0xff] %v9835_v6  ;;  %v9837_v46 = vadd.f32 %v6994_v17, %v6914_v25 }
 0x3bd   : > { %v3730_v10 = vpop.f32.mrf.mxu0  ;;  %v3965_v33 = vpop.f32.mrf.mxu1 }
 0x3be   : > { %10564 = vst [vmem:[#allocation96_spill] sm:$0xff] %v9837_v46  ;;  %v9839_v58 = vadd.f32 %v3955_v20, %v3730_v10 }
 0x3bf   : > { %v9841_v47 = vpop.f32.mrf.mxu1 }
 0x3c0   : > { %10565 = vst [vmem:[#allocation97_spill] sm:$0xff] %v9839_v58 }
 0x3c1   : > { %v9843_v55 = vpop.f32.mrf.mxu1 }
 0x3c3   : > { %v6917_v27 = vpop.f32.mrf.mxu0  ;;  %v9845_v28 = vpop.f32.mrf.mxu1 }
 0x3c4   : > { %v9847_v22 = vadd.f32 %v6997_v36, %v6917_v27 }
 0x3c5   : > { %v3740_v29 = vpop.f32.mrf.mxu0  ;;  %v9849_v2 = vpop.f32.mrf.mxu1 }
 0x3c6   : > { %10566 = vst [vmem:[#allocation71_spill] sm:$0xff] %v9847_v22  ;;  %v9851_v30 = vadd.f32 %v3965_v33, %v3740_v29 }
 0x3c7   : > { %v7032_v43 = vpop.f32.mrf.mxu0  ;;  %v9853_v4 = vpop.f32.mrf.mxu1 }
 0x3c8   : > { %10567 = vst [vmem:[#allocation98_spill] sm:$0xff] %v9851_v30 }
 0x3c9   : > { %v4057_v48 = vpop.f32.mrf.mxu0  ;;  %v9855_v9 = vpop.f32.mrf.mxu1 }
 0x3cb   : > { %v7035_v37 = vpop.f32.mrf.mxu0  ;;  %v9857_v24 = vpop.f32.mrf.mxu1 }
 0x3cd   : > { %v9859_v21 = vpop.f32.mrf.mxu0  ;;  %v9861_v56 = vpop.f32.mrf.mxu1 }
 0x3cf   : > { %v9863_v63 = vpop.f32.mrf.mxu0  ;;  %v9865_v13 = vpop.f32.mrf.mxu1 }
 0x3d1   : > { %v9867_v34 = vpop.f32.mrf.mxu0  ;;  %v9869_v0 = vpop.f32.mrf.mxu1 }
 0x3d3   : > { %v9871_v32 = vpop.f32.mrf.mxu0  ;;  %v9873_v1 = vpop.f32.mrf.mxu1 }
 0x3d5   : > { %v9875_v51 = vpop.f32.mrf.mxu0  ;;  %v9877_v42 = vpop.f32.mrf.mxu1 }
 0x3d7   : > { %v9879_v7 = vpop.f32.mrf.mxu0  ;;  %v9881_v16 = vpop.f32.mrf.mxu1 }
 0x3d9   : > { %v9883_v59 = vpop.f32.mrf.mxu0  ;;  %v9885_v17 = vpop.f32.mrf.mxu1 }
 0x3db   : > { %v9887_v26 = vpop.f32.mrf.mxu0  ;;  %v9889_v20 = vpop.f32.mrf.mxu1 }
 0x3dd   : > { %v9891_v25 = vpop.f32.mrf.mxu0  ;;  %v9893_v36 = vpop.f32.mrf.mxu1 }
 0x3de   : > { %10568 = vst [vmem:[#allocation72_spill] sm:$0xff] %v9893_v36 }
 0x3df   : > { %v9895_v10 = vpop.f32.mrf.mxu0  ;;  %v9897_v33 = vpop.f32.mrf.mxu1 }
 0x3e0   : > { %10569 = vst [vmem:[#allocation74_spill] sm:$0xff] %v9897_v33 }
 0x3e1   : > { %v9899_v27 = vpop.f32.mrf.mxu0  ;;  %v9901_v29 = vpop.f32.mrf.mxu1 }
 0x3e2   : > { %10570 = vst [vmem:[#allocation75_spill] sm:$0xff] %v9901_v29 }
 0x3e3   : > { %v9903_v30 = vpop.f32.mrf.mxu0  ;;  %v9905_v22 = vpop.f32.mrf.mxu1 }
 0x3e4   : > { %10571 = vst [vmem:[#allocation76_spill] sm:$0xff] %v9905_v22 }
 0x3e5   : > { %v9907_v58 = vpop.f32.mrf.mxu0  ;;  %v9909_v46 = vpop.f32.mrf.mxu1 }
 0x3e6   : > { %10572 = vst [vmem:[#allocation77_spill] sm:$0xff] %v9909_v46 }
 0x3e7   : > { %v9911_v6 = vpop.f32.mrf.mxu0  ;;  %v9913_v5 = vpop.f32.mrf.mxu1 }
 0x3e8   : > { %10573 = vst [vmem:[#allocation99_spill] sm:$0xff] %v9913_v5 }
 0x3e9   : > { %v9915_v39 = vpop.f32.mrf.mxu0  ;;  %v9917_v12 = vpop.f32.mrf.mxu1 }
 0x3ea   : > { %10574 = vst [vmem:[#allocation100_spill] sm:$0xff] %v9915_v39  ;;  %10575 = vst [vmem:[#allocation101_spill] sm:$0xff] %v9917_v12 }
 0x3eb   : > { %v9919_v41 = vpop.f32.mrf.mxu0  ;;  %v9921_v15 = vpop.f32.mrf.mxu1 }
 0x3ec   : > { %10576 = vst [vmem:[#allocation73_spill] sm:$0xff] %v9919_v41  ;;  %10577 = vst [vmem:[#allocation103_spill] sm:$0xff] %v9921_v15 }
 0x3ed   : > { %v9923_v8 = vpop.f32.mrf.mxu0  ;;  %v9925_v57 = vpop.f32.mrf.mxu1 }
 0x3ee   : > { %10578 = vst [vmem:[#allocation102_spill] sm:$0xff] %v9923_v8  ;;  %10579 = vst [vmem:[#allocation104_spill] sm:$0xff] %v9925_v57 }
 0x3ef   : > { %v9927_v22 = vpop.f32.mrf.mxu0  ;;  %v9929_v29 = vpop.f32.mrf.mxu1 }
 0x3f0   : > { %10580 = vst [vmem:[#allocation105_spill] sm:$0xff] %v9927_v22  ;;  %10581 = vst [vmem:[#allocation106_spill] sm:$0xff] %v9929_v29 }
 0x3f1   : > { %v9931_v46 = vpop.f32.mrf.mxu0  ;;  %v9933_v31 = vpop.f32.mrf.mxu1 }
 0x3f2   : > { %10582 = vst [vmem:[#allocation48_spill] sm:$0xff] %v9931_v46  ;;  %10583 = vst [vmem:[#allocation107_spill] sm:$0xff] %v9933_v31 }
 0x3f3   : > { %v9935_v5 = vpop.f32.mrf.mxu0  ;;  %v9937_v33 = vpop.f32.mrf.mxu1 }
 0x3f4   : > { %10584 = vst [vmem:[#allocation108_spill] sm:$0xff] %v9935_v5  ;;  %10585 = vst [vmem:[#allocation109_spill] sm:$0xff] %v9937_v33 }
 0x3f5   : > { %v9939_v12 = vpop.f32.mrf.mxu0  ;;  %v9941_v41 = vpop.f32.mrf.mxu1 }
 0x3f6   : > { %10586 = vst [vmem:[#allocation110_spill] sm:$0xff] %v9939_v12  ;;  %10587 = vst [vmem:[#allocation51_spill] sm:$0xff] %v9941_v41 }
 0x3f7   : > { %v9943_v15 = vpop.f32.mrf.mxu0  ;;  %v9945_v8 = vpop.f32.mrf.mxu1 }
 0x3f8   : > { %10588 = vst [vmem:[#allocation53_spill] sm:$0xff] %v9943_v15  ;;  %10589 = vst [vmem:[#allocation56_spill] sm:$0xff] %v9945_v8  ;;  %v4217_v8 = vadd.f32 %v7032_v43, %v9757_v50  ;;  %v4221_v43 = vadd.f32 %v9863_v63, %v9779_v38 }
 0x3f9   : > { %v9947_v57 = vpop.f32.mrf.mxu0  ;;  %v9949_v22 = vpop.f32.mrf.mxu1 }
 0x3fa   : > { %10590 = vst [vmem:[#allocation58_spill] sm:$0xff] %v9947_v57  ;;  %10591 = vst [vmem:[#allocation45_spill] sm:$0xff] %v9949_v22 }
 0x3fb   : > { %v9951_v29 = vpop.f32.mrf.mxu0  ;;  %v9953_v46 = vpop.f32.mrf.mxu1 }
 0x3fc   : > { %10592 = vst [vmem:[#allocation49_spill] sm:$0xff] %v9951_v29  ;;  %10593 = vst [vmem:[#allocation59_spill] sm:$0xff] %v9953_v46  ;;  %v4216_v29 = vadd.f32 %v4057_v48, %v9761_v18  ;;  %v9979_v18 = vld [vmem:[%s10223_s4] ss:$0 sm:$0xff] }
 0x3fd   : > { %v9955_v31 = vpop.f32.mrf.mxu0  ;;  %v9957_v5 = vpop.f32.mrf.mxu1 }
 0x3fe   : > { %10594 = vst [vmem:[#allocation54_spill] sm:$0xff] %v9955_v31  ;;  %10595 = vst [vmem:[#allocation60_spill] sm:$0xff] %v9957_v5  ;;  %v4219_v31 = vadd.f32 %v7035_v37, %v9768_v60  ;;  %v4603_v5 = vadd.f32 %v9841_v47, %v4217_v8  ;;  %v4602_v50 = vadd.f32 %v9843_v55, %v4216_v29 }
 0x3ff   : > { %v9959_v33 = vpop.f32.mrf.mxu0  ;;  %v7272_v12 = vpop.f32.mrf.mxu1  ;;  %v4223_v29 = vadd.f32 %v9871_v32, %v9791_v62  ;;  %v10601_v62 = vld [vmem:[#allocation19_spill] sm:$0xff] }
 0x400   : > { %10596 = vst [vmem:[#allocation52_spill] sm:$0xff] %v9959_v33  ;;  %v4605_v37 = vadd.f32 %v9845_v28, %v4219_v31 }
 0x401   : > { %v9961_v41 = vpop.f32.mrf.mxu0  ;;  %v5005_v15 = vpop.f32.mrf.mxu1 }
 0x402   : > { %10597 = vst [vmem:[#allocation17_spill] sm:$0xff] %v9961_v41  ;;  %v4218_v41 = vadd.f32 %v9859_v21, %v9772_v61  ;;  %v4220_v61 = vadd.f32 %v9867_v34, %v9783_v54 }
 0x403   : > { %v9964_v23 = vpop.f32.mrf.mxu0  ;;  %v7275_v22 = vpop.f32.mrf.mxu1 }
 0x404   : > { %10598 = vst [vmem:[#allocation61_spill] sm:$0xff] %v9964_v23 }
 0x405   : > { %v9967_v57 = vpop.f32.mrf.mxu0  ;;  %v5015_v46 = vpop.f32.mrf.mxu1 }
 0x406   : > { %10599 = vst [vmem:[#allocation83_spill] sm:$0xff] %v9967_v57 }
 0x407   : > { %v7192_v33 = vpop.f32.mrf.mxu0  ;;  %v7278_v36 = vpop.f32.mrf.mxu1 }
 0x408   : > { %v4884_v39 = vadd.f32 %v7192_v33, %v4603_v5  ;;  %v4604_v33 = vadd.f32 %v9849_v2, %v4218_v41  ;;  %v4606_v41 = vadd.f32 %v9855_v9, %v4220_v61  ;;  %v10602_v9 = vld [vmem:[#allocation22_spill] sm:$0xff] }
 0x409   : > { %v4724_v48 = vpop.f32.mrf.mxu0  ;;  %v5025_v60 = vpop.f32.mrf.mxu1 }
 0x40a   : > { %v5165_v8 = vadd.f32 %v7272_v12, %v4884_v39  ;;  %v4883_v47 = vadd.f32 %v4724_v48, %v4602_v50  ;;  %v4607_v12 = vadd.f32 %v9853_v4, %v4221_v43  ;;  %v10600_v39 = vld [vmem:[#allocation20_spill] sm:$0xff]  ;;  %v4222_v50 = vadd.f32 %v9875_v51, %v9794_v19 }
 0x40b   : > { %v7195_v5 = vpop.f32.mrf.mxu0  ;;  %v7281_v55 = vpop.f32.mrf.mxu1  ;;  %v4609_v43 = vadd.f32 %v9857_v24, %v4223_v29  ;;  %v4227_v29 = vadd.f32 %v9887_v26, %v9801_v52  ;;  %v10605_v52 = vld [vmem:[#allocation23_spill] sm:$0xff] }
 0x40c   : > { %v5204_v21 = vadd.f32 %v9979_v18, %v5165_v8  ;;  %v5164_v38 = vadd.f32 %v5005_v15, %v4883_v47  ;;  %v4886_v63 = vadd.f32 %v7195_v5, %v4605_v37  ;;  %v4224_v5 = vadd.f32 %v9883_v59, %v9799_v49  ;;  %v10604_v49 = vld [vmem:[#allocation24_spill] sm:$0xff] }
 0x40d   : > { %v4734_v57 = vpop.f32.mrf.mxu0  ;;  %v5035_v23 = vpop.f32.mrf.mxu1 }
 0x40e   : > { %v5236_v31 = vadd.f32 %v5204_v21, %v10600_v39  ;;  %v5203_v28 = vadd.f32 %v9979_v18, %v5164_v38  ;;  %v5167_v54 = vadd.f32 %v7275_v22, %v4886_v63  ;;  %v4885_v34 = vadd.f32 %v4734_v57, %v4604_v33 }
 0x40f   : > { %v7198_v15 = vpop.f32.mrf.mxu0  ;;  %v7284_v48 = vpop.f32.mrf.mxu1  ;;  %v4225_v57 = vadd.f32 %v9879_v7, %v9797_v53  ;;  %v4608_v38 = vadd.f32 %v9861_v56, %v4222_v50  ;;  %v10603_v53 = vld [vmem:[#allocation21_spill] sm:$0xff]  ;;  %v4610_v50 = vadd.f32 %v9869_v0, %v4224_v5 }
 0x410   : > { %5268 = vst [vmem:[%s9995_s11 + $0x8] sm:$0xff] %v5236_v31  ;;  %v5235_v2 = vadd.f32 %v5203_v28, %v10601_v62  ;;  %v5206_v4 = vadd.f32 %v9979_v18, %v5167_v54  ;;  %v5166_v32 = vadd.f32 %v5015_v46, %v4885_v34  ;;  %v4888_v22 = vadd.f32 %v7198_v15, %v4607_v12 }
 0x411   : > { %v4744_v19 = vpop.f32.mrf.mxu0  ;;  %v5045_v51 = vpop.f32.mrf.mxu1  ;;  %v4611_v39 = vadd.f32 %v9865_v13, %v4225_v57  ;;  %v4226_v54 = vadd.f32 %v9891_v25, %v9803_v35  ;;  %v4229_v62 = vadd.f32 %v9895_v10, %v9805_v3  ;;  %v10606_v35 = vld [vmem:[#allocation26_spill] sm:$0xff]  ;;  %v4228_v57 = vadd.f32 %v9899_v27, %v9807_v45  ;;  %v10607_v3 = vld [vmem:[#allocation25_spill] sm:$0xff]  ;;  %v10608_v45 = vld [vmem:[#allocation28_spill] sm:$0xff] }
 0x412   : > { %5267 = vst [vmem:[%s9995_s11] sm:$0xff] %v5235_v2  ;;  %v5238_v8 = vadd.f32 %v5206_v4, %v10602_v9  ;;  %v5205_v47 = vadd.f32 %v9979_v18, %v5166_v32  ;;  %v5169_v37 = vadd.f32 %v7278_v36, %v4888_v22  ;;  %v4887_v61 = vadd.f32 %v4744_v19, %v4606_v41 }
 0x413   : > { %v7201_v46 = vpop.f32.mrf.mxu0  ;;  %v7287_v21 = vpop.f32.mrf.mxu1  ;;  %v4613_v4 = vadd.f32 %v9873_v1, %v4227_v29 }
 0x414   : > { %5270 = vst [vmem:[%s9995_s11 + $0x18] sm:$0xff] %v5238_v8  ;;  %v5237_v7 = vadd.f32 %v5205_v47, %v10603_v53  ;;  %v5208_v24 = vadd.f32 %v9979_v18, %v5169_v37  ;;  %v5168_v63 = vadd.f32 %v5025_v60, %v4887_v61  ;;  %v4890_v33 = vadd.f32 %v7201_v46, %v4609_v43 }
 0x415   : > { %v4754_v36 = vpop.f32.mrf.mxu0  ;;  %v5055_v12 = vpop.f32.mrf.mxu1  ;;  %v4612_v43 = vadd.f32 %v9877_v42, %v4226_v54  ;;  %v4231_v47 = vadd.f32 %v9903_v30, %v9809_v40  ;;  %v4615_v61 = vadd.f32 %v9881_v16, %v4229_v62  ;;  %v10609_v40 = vld [vmem:[#allocation27_spill] sm:$0xff] }
 0x416   : > { %5269 = vst [vmem:[%s9995_s11 + $0x10] sm:$0xff] %v5237_v7  ;;  %v5240_v59 = vadd.f32 %v5208_v24, %v10604_v49  ;;  %v5207_v56 = vadd.f32 %v9979_v18, %v5168_v63  ;;  %v5171_v31 = vadd.f32 %v7281_v55, %v4890_v33  ;;  %v4889_v28 = vadd.f32 %v4754_v36, %v4608_v38 }
 0x417   : > { %v7204_v60 = vpop.f32.mrf.mxu0  ;;  %v7290_v34 = vpop.f32.mrf.mxu1  ;;  %v4230_v38 = vadd.f32 %v9907_v58, %v9811_v44  ;;  %v4614_v7 = vadd.f32 %v9885_v17, %v4228_v57  ;;  %v4233_v33 = vadd.f32 %v9911_v6, %v9813_v14  ;;  %v4617_v36 = vadd.f32 %v9889_v20, %v4231_v47  ;;  %v10610_v44 = vld [vmem:[#allocation30_spill] sm:$0xff]  ;;  %v10613_v14 = vld [vmem:[#allocation29_spill] sm:$0xff]  ;;  %v10622_v47 = vld [vmem:[#allocation91_spill] sm:$0xff] }
 0x418   : > { %5272 = vst [vmem:[%s9995_s11 + $0x28] sm:$0xff] %v5240_v59  ;;  %v5239_v26 = vadd.f32 %v5207_v56, %v10605_v52  ;;  %v5210_v13 = vadd.f32 %v9979_v18, %v5171_v31  ;;  %v5170_v15 = vadd.f32 %v5035_v23, %v4889_v28  ;;  %v4892_v41 = vadd.f32 %v7204_v60, %v4611_v39  ;;  %v10611_v59 = vld [vmem:[#allocation100_spill] sm:$0xff] }
 0x419   : > { %v4764_v55 = vpop.f32.mrf.mxu0  ;;  %v5065_v2 = vpop.f32.mrf.mxu1  ;;  %v4232_v56 = vadd.f32 %v10611_v59, %v9815_v11  ;;  %v10612_v28 = vld [vmem:[#allocation72_spill] sm:$0xff] }
 0x41a   : > { %5271 = vst [vmem:[%s9995_s11 + $0x20] sm:$0xff] %v5239_v26  ;;  %v5242_v25 = vadd.f32 %v5210_v13, %v10606_v35  ;;  %v5209_v0 = vadd.f32 %v9979_v18, %v5170_v15  ;;  %v5173_v32 = vadd.f32 %v7284_v48, %v4892_v41  ;;  %v4891_v22 = vadd.f32 %v4764_v55, %v4610_v50  ;;  %v10614_v52 = vld [vmem:[#allocation88_spill] sm:$0xff]  ;;  %v10615_v26 = vld [vmem:[#allocation73_spill] sm:$0xff]  ;;  %v10616_v41 = vld [vmem:[#allocation74_spill] sm:$0xff] }
 0x41b   : > { %v7207_v23 = vpop.f32.mrf.mxu0  ;;  %v7293_v19 = vpop.f32.mrf.mxu1  ;;  %v4616_v54 = vadd.f32 %v10612_v28, %v4230_v38  ;;  %v4235_v13 = vadd.f32 %v10615_v26, %v10614_v52  ;;  %v4619_v62 = vadd.f32 %v10616_v41, %v4233_v33  ;;  %v10617_v11 = vld [vmem:[#allocation32_spill] sm:$0xff]  ;;  %v10635_v52 = vld [vmem:[#allocation110_spill] sm:$0xff] }
 0x41c   : > { %5274 = vst [vmem:[%s9995_s11 + $0x38] sm:$0xff] %v5242_v25  ;;  %v5241_v10 = vadd.f32 %v5209_v0, %v10607_v3  ;;  %v5212_v1 = vadd.f32 %v9979_v18, %v5173_v32  ;;  %v5172_v9 = vadd.f32 %v5045_v51, %v4891_v22  ;;  %v4894_v8 = vadd.f32 %v7207_v23, %v4613_v4  ;;  %v10618_v0 = vld [vmem:[#allocation90_spill] sm:$0xff]  ;;  %v10620_v23 = vld [vmem:[#allocation75_spill] sm:$0xff] }
 0x41d   : > { %v4774_v48 = vpop.f32.mrf.mxu0  ;;  %v5075_v37 = vpop.f32.mrf.mxu1  ;;  %v10619_v32 = vld [vmem:[#allocation102_spill] sm:$0xff]  ;;  %v10621_v3 = vld [vmem:[#allocation31_spill] sm:$0xff] }
 0x41e   : > { %5273 = vst [vmem:[%s9995_s11 + $0x30] sm:$0xff] %v5241_v10  ;;  %v5244_v27 = vadd.f32 %v5212_v1, %v10608_v45  ;;  %v5211_v42 = vadd.f32 %v9979_v18, %v5172_v9  ;;  %v5175_v5 = vadd.f32 %v7287_v21, %v4894_v8  ;;  %v4893_v46 = vadd.f32 %v4774_v48, %v4612_v43  ;;  %v10623_v48 = vld [vmem:[#allocation105_spill] sm:$0xff] }
 0x41f   : > { %v7210_v51 = vpop.f32.mrf.mxu0  ;;  %v7296_v53 = vpop.f32.mrf.mxu1  ;;  %v4234_v22 = vadd.f32 %v10619_v32, %v10618_v0  ;;  %v4618_v43 = vadd.f32 %v10620_v23, %v4232_v56  ;;  %v10639_v0 = vld [vmem:[#allocation53_spill] sm:$0xff] }
 0x420   : > { %5276 = vst [vmem:[%s9995_s11 + $0x48] sm:$0xff] %v5244_v27  ;;  %v5243_v30 = vadd.f32 %v5211_v42, %v10609_v40  ;;  %v5214_v16 = vadd.f32 %v9979_v18, %v5175_v5  ;;  %v5174_v24 = vadd.f32 %v5055_v12, %v4893_v46  ;;  %v4896_v63 = vadd.f32 %v7210_v51, %v4615_v61  ;;  %v10624_v27 = vld [vmem:[#allocation76_spill] sm:$0xff]  ;;  %v10625_v5 = vld [vmem:[#allocation34_spill] sm:$0xff] }
 0x421   : > { %v4784_v21 = vpop.f32.mrf.mxu0  ;;  %v5085_v29 = vpop.f32.mrf.mxu1  ;;  %v4237_v61 = vadd.f32 %v10623_v48, %v10622_v47  ;;  %v4621_v42 = vadd.f32 %v10624_v27, %v4235_v13  ;;  %v10626_v40 = vld [vmem:[#allocation68_spill] sm:$0xff]  ;;  %v10643_v47 = vld [vmem:[#allocation58_spill] sm:$0xff] }
 0x422   : > { %5275 = vst [vmem:[%s9995_s11 + $0x40] sm:$0xff] %v5243_v30  ;;  %v5246_v58 = vadd.f32 %v5214_v16, %v10610_v44  ;;  %v5213_v17 = vadd.f32 %v9979_v18, %v5174_v24  ;;  %v5177_v39 = vadd.f32 %v7290_v34, %v4896_v63  ;;  %v4895_v49 = vadd.f32 %v4784_v21, %v4614_v7  ;;  %v10627_v30 = vld [vmem:[#allocation48_spill] sm:$0xff]  ;;  %v10628_v63 = vld [vmem:[#allocation77_spill] sm:$0xff] }
 0x423   : > { %v7213_v12 = vpop.f32.mrf.mxu0  ;;  %v7299_v31 = vpop.f32.mrf.mxu1  ;;  %v4236_v16 = vadd.f32 %v10627_v30, %v10626_v40  ;;  %v4620_v33 = vadd.f32 %v10628_v63, %v4234_v22  ;;  %v10629_v21 = vld [vmem:[#allocation33_spill] sm:$0xff]  ;;  %v10649_v63 = vld [vmem:[#allocation40_spill] sm:$0xff] }
 0x424   : > { %5278 = vst [vmem:[%s9995_s11 + $0x58] sm:$0xff] %v5246_v58  ;;  %v5245_v6 = vadd.f32 %v5213_v17, %v10613_v14  ;;  %v5216_v20 = vadd.f32 %v9979_v18, %v5177_v39  ;;  %v5176_v60 = vadd.f32 %v5065_v2, %v4895_v49  ;;  %v4898_v50 = vadd.f32 %v7213_v12, %v4617_v36  ;;  %v10630_v39 = vld [vmem:[#allocation69_spill] sm:$0xff]  ;;  %v10631_v49 = vld [vmem:[#allocation108_spill] sm:$0xff]  ;;  %v10632_v12 = vld [vmem:[#allocation99_spill] sm:$0xff] }
 0x425   : > { %v4794_v34 = vpop.f32.mrf.mxu0  ;;  %v5095_v15 = vpop.f32.mrf.mxu1  ;;  %v4239_v59 = vadd.f32 %v10631_v49, %v10630_v39  ;;  %v4623_v28 = vadd.f32 %v10632_v12, %v4237_v61  ;;  %v10647_v40 = vld [vmem:[#allocation49_spill] sm:$0xff]  ;;  %v10653_v12 = vld [vmem:[#allocation39_spill] sm:$0xff] }
 0x426   : > { %5277 = vst [vmem:[%s9995_s11 + $0x50] sm:$0xff] %v5245_v6  ;;  %v5248_v55 = vadd.f32 %v5216_v20, %v10617_v11  ;;  %v5215_v4 = vadd.f32 %v9979_v18, %v5176_v60  ;;  %v5179_v35 = vadd.f32 %v7293_v19, %v4898_v50  ;;  %v4897_v25 = vadd.f32 %v4794_v34, %v4616_v54  ;;  %v10633_v54 = vld [vmem:[#allocation36_spill] sm:$0xff]  ;;  %v10636_v34 = vld [vmem:[#allocation101_spill] sm:$0xff] }
 0x427   : > { %v7216_v2 = vpop.f32.mrf.mxu0  ;;  %v7302_v57 = vpop.f32.mrf.mxu1  ;;  %v10634_v50 = vld [vmem:[#allocation92_spill] sm:$0xff]  ;;  %v4622_v41 = vadd.f32 %v10636_v34, %v4236_v16  ;;  %v10648_v16 = vld [vmem:[#allocation106_spill] sm:$0xff] }
 0x428   : > { %5280 = vst [vmem:[%s9995_s11 + $0x68] sm:$0xff] %v5248_v55  ;;  %v5247_v10 = vadd.f32 %v5215_v4, %v10621_v3  ;;  %v5218_v1 = vadd.f32 %v9979_v18, %v5179_v35  ;;  %v5178_v9 = vadd.f32 %v5075_v37, %v4897_v25  ;;  %v4900_v8 = vadd.f32 %v7216_v2, %v4619_v62  ;;  %v10637_v62 = vld [vmem:[#allocation35_spill] sm:$0xff]  ;;  %v10638_v25 = vld [vmem:[#allocation93_spill] sm:$0xff] }
 0x429   : > { %v4804_v19 = vpop.f32.mrf.mxu0  ;;  %v5105_v45 = vpop.f32.mrf.mxu1  ;;  %v4238_v26 = vadd.f32 %v10635_v52, %v10634_v50  ;;  %v4241_v32 = vadd.f32 %v10639_v0, %v10638_v25  ;;  %v10640_v2 = vld [vmem:[#allocation103_spill] sm:$0xff]  ;;  %v10656_v52 = vld [vmem:[#allocation109_spill] sm:$0xff] }
 0x42a   : > { %5279 = vst [vmem:[%s9995_s11 + $0x60] sm:$0xff] %v5247_v10  ;;  %v5250_v46 = vadd.f32 %v5218_v1, %v10625_v5  ;;  %v5217_v38 = vadd.f32 %v9979_v18, %v5178_v9  ;;  %v5181_v51 = vadd.f32 %v7296_v53, %v4900_v8  ;;  %v4899_v7 = vadd.f32 %v4804_v19, %v4618_v43  ;;  %v10641_v43 = vld [vmem:[#allocation38_spill] sm:$0xff]  ;;  %v10644_v19 = vld [vmem:[#allocation104_spill] sm:$0xff]  ;;  %v10660_v0 = vld [vmem:[#allocation51_spill] sm:$0xff] }
 0x42b   : > { %v7219_v37 = vpop.f32.mrf.mxu0  ;;  %v7305_v24 = vpop.f32.mrf.mxu1  ;;  %v4625_v23 = vadd.f32 %v10640_v2, %v4239_v59  ;;  %v10642_v8 = vld [vmem:[#allocation94_spill] sm:$0xff]  ;;  %v4624_v27 = vadd.f32 %v10644_v19, %v4238_v26  ;;  %v10652_v59 = vld [vmem:[#allocation107_spill] sm:$0xff] }
 0x42c   : > { %5282 = vst [vmem:[%s9995_s11 + $0x78] sm:$0xff] %v5250_v46  ;;  %v5249_v36 = vadd.f32 %v5217_v38, %v10629_v21  ;;  %v5220_v44 = vadd.f32 %v9979_v18, %v5181_v51  ;;  %v5180_v58 = vadd.f32 %v5085_v29, %v4899_v7  ;;  %v4902_v17 = vadd.f32 %v7219_v37, %v4621_v42  ;;  %v10645_v42 = vld [vmem:[#allocation37_spill] sm:$0xff]  ;;  %v10646_v7 = vld [vmem:[#allocation70_spill] sm:$0xff] }
 0x42d   : > { %v4814_v53 = vpop.f32.mrf.mxu0  ;;  %v5115_v56 = vpop.f32.mrf.mxu1  ;;  %v4240_v48 = vadd.f32 %v10643_v47, %v10642_v8  ;;  %v4243_v30 = vadd.f32 %v10647_v40, %v10646_v7  ;;  %v4627_v37 = vadd.f32 %v10648_v16, %v4241_v32  ;;  %v10664_v8 = vld [vmem:[#allocation56_spill] sm:$0xff]  ;;  %v10668_v7 = vld [vmem:[#allocation45_spill] sm:$0xff] }
 0x42e   : > { %5281 = vst [vmem:[%s9995_s11 + $0x70] sm:$0xff] %v5249_v36  ;;  %v5252_v14 = vadd.f32 %v5220_v44, %v10633_v54  ;;  %v5219_v6 = vadd.f32 %v9979_v18, %v5180_v58  ;;  %v5183_v20 = vadd.f32 %v7299_v31, %v4902_v17  ;;  %v4901_v60 = vadd.f32 %v4814_v53, %v4620_v33  ;;  %v10650_v58 = vld [vmem:[#allocation95_spill] sm:$0xff]  ;;  %v10651_v17 = vld [vmem:[#allocation54_spill] sm:$0xff] }
 0x42f   : > { %v7222_v29 = vpop.f32.mrf.mxu0  ;;  %v7308_v13 = vpop.f32.mrf.mxu1  ;;  %v4242_v39 = vadd.f32 %v10651_v17, %v10650_v58  ;;  %v4626_v53 = vadd.f32 %v10652_v59, %v4240_v48  ;;  %v4629_v26 = vadd.f32 %v10656_v52, %v4243_v30  ;;  %v10665_v48 = vld [vmem:[#allocation44_spill] sm:$0xff]  ;;  %v10669_v30 = vld [vmem:[#allocation43_spill] sm:$0xff] }
 0x430   : > { %5284 = vst [vmem:[%s9995_s11 + $0x88] sm:$0xff] %v5252_v14  ;;  %v5251_v11 = vadd.f32 %v5219_v6, %v10637_v62  ;;  %v5222_v55 = vadd.f32 %v9979_v18, %v5183_v20  ;;  %v5182_v4 = vadd.f32 %v5095_v15, %v4901_v60  ;;  %v4904_v35 = vadd.f32 %v7222_v29, %v4623_v28  ;;  %v10654_v20 = vld [vmem:[#allocation96_spill] sm:$0xff]  ;;  %v10657_v29 = vld [vmem:[#allocation42_spill] sm:$0xff] }
 0x431   : > { %v4824_v31 = vpop.f32.mrf.mxu0  ;;  %v5125_v22 = vpop.f32.mrf.mxu1  ;;  %v10655_v60 = vld [vmem:[#allocation52_spill] sm:$0xff]  ;;  %v4628_v32 = vadd.f32 %v10660_v0, %v4242_v39 }
 0x432   : > { %5283 = vst [vmem:[%s9995_s11 + $0x80] sm:$0xff] %v5251_v11  ;;  %v5254_v3 = vadd.f32 %v5222_v55, %v10641_v43  ;;  %v5221_v10 = vadd.f32 %v9979_v18, %v5182_v4  ;;  %v5185_v1 = vadd.f32 %v7302_v57, %v4904_v35  ;;  %v4903_v9 = vadd.f32 %v4824_v31, %v4622_v41  ;;  %v10658_v55 = vld [vmem:[#allocation97_spill] sm:$0xff] }
 0x433   : > { %v7225_v15 = vpop.f32.mrf.mxu0  ;;  %v7311_v61 = vpop.f32.mrf.mxu1  ;;  %v4245_v50 = vadd.f32 %v10655_v60, %v10654_v20  ;;  %v10659_v4 = vld [vmem:[#allocation17_spill] sm:$0xff]  ;;  %v10674_v60 = vld [vmem:[#allocation16_spill] sm:$0xff] }
 0x434   : > { %5286 = vst [vmem:[%s9995_s11 + $0x98] sm:$0xff] %v5254_v3  ;;  %v5253_v5 = vadd.f32 %v5221_v10, %v10645_v42  ;;  %v5224_v46 = vadd.f32 %v9979_v18, %v5185_v1  ;;  %v5184_v38 = vadd.f32 %v5105_v45, %v4903_v9  ;;  %v4906_v51 = vadd.f32 %v7225_v15, %v4625_v23  ;;  %v10661_v31 = vld [vmem:[#allocation41_spill] sm:$0xff]  ;;  %v10662_v10 = vld [vmem:[#allocation71_spill] sm:$0xff] }
 0x435   : > { %v4834_v57 = vpop.f32.mrf.mxu0  ;;  %v5135_v49 = vpop.f32.mrf.mxu1  ;;  %v4244_v35 = vadd.f32 %v10659_v4, %v10658_v55  ;;  %v10663_v1 = vld [vmem:[#allocation61_spill] sm:$0xff]  ;;  %v4631_v47 = vadd.f32 %v10664_v8, %v4245_v50  ;;  %v10676_v55 = vld [vmem:[#allocation55_spill] sm:$0xff] }
 0x436   : > { %5285 = vst [vmem:[%s9995_s11 + $0x90] sm:$0xff] %v5253_v5  ;;  %v5256_v33 = vadd.f32 %v5224_v46, %v10649_v63  ;;  %v5223_v21 = vadd.f32 %v9979_v18, %v5184_v38  ;;  %v5187_v36 = vadd.f32 %v7305_v24, %v4906_v51  ;;  %v4905_v44 = vadd.f32 %v4834_v57, %v4624_v27  ;;  %v10666_v5 = vld [vmem:[#allocation98_spill] sm:$0xff]  ;;  %v10667_v46 = vld [vmem:[#allocation83_spill] sm:$0xff] }
 0x437   : > { %v7228_v45 = vpop.f32.mrf.mxu0  ;;  %v7314_v25 = vpop.f32.mrf.mxu1  ;;  %v4247_v9 = vadd.f32 %v10663_v1, %v10662_v10  ;;  %v4246_v38 = vadd.f32 %v10667_v46, %v10666_v5  ;;  %v4630_v40 = vadd.f32 %v10668_v7, %v4244_v35 }
 0x438   : > { %5288 = vst [vmem:[%s9995_s11 + $0xa8] sm:$0xff] %v5256_v33  ;;  %v5255_v28 = vadd.f32 %v5223_v21, %v10653_v12  ;;  %v5226_v54 = vadd.f32 %v9979_v18, %v5187_v36  ;;  %v5186_v14 = vadd.f32 %v5115_v56, %v4905_v44  ;;  %v4908_v6 = vadd.f32 %v7228_v45, %v4627_v37  ;;  %v10670_v21 = vld [vmem:[#allocation59_spill] sm:$0xff] }
 0x439   : > { %v4844_v24 = vpop.f32.mrf.mxu0  ;;  %v5145_v51 = vpop.f32.mrf.mxu1  ;;  %v10671_v36 = vld [vmem:[#allocation47_spill] sm:$0xff] }
 0x43a   : > { %5287 = vst [vmem:[%s9995_s11 + $0xa0] sm:$0xff] %v5255_v28  ;;  %v5258_v34 = vadd.f32 %v5226_v54, %v10657_v29  ;;  %v5225_v41 = vadd.f32 %v9979_v18, %v5186_v14  ;;  %v5189_v62 = vadd.f32 %v7308_v13, %v4908_v6  ;;  %v4907_v11 = vadd.f32 %v4844_v24, %v4626_v53  ;;  %v10672_v53 = vld [vmem:[#allocation60_spill] sm:$0xff]  ;;  %v10673_v28 = vld [vmem:[#allocation46_spill] sm:$0xff] }
 0x43b   : > { %v7231_v56 = vpop.f32.mrf.mxu0  ;;  %v7317_v45 = vpop.f32.mrf.mxu1  ;;  %v4632_v12 = vadd.f32 %v10672_v53, %v4246_v38 }
 0x43c   : > { %5290 = vst [vmem:[%s9995_s11 + $0xb8] sm:$0xff] %v5258_v34  ;;  %v5257_v2 = vadd.f32 %v5225_v41, %v10661_v31  ;;  %v5228_v23 = vadd.f32 %v9979_v18, %v5189_v62  ;;  %v5188_v43 = vadd.f32 %v5125_v22, %v4907_v11  ;;  %v4910_v3 = vadd.f32 %v7231_v56, %v4629_v26  ;;  %v10675_v34 = vld [vmem:[#allocation50_spill] sm:$0xff] }
 0x43d   : > { %v4854_v13 = vpop.f32.mrf.mxu0  ;;  %v5155_v29 = vpop.f32.mrf.mxu1 }
 0x43e   : > { %5289 = vst [vmem:[%s9995_s11 + $0xb0] sm:$0xff] %v5257_v2  ;;  %v5260_v15 = vadd.f32 %v5228_v23, %v10665_v48  ;;  %v5227_v19 = vadd.f32 %v9979_v18, %v5188_v43  ;;  %v5191_v27 = vadd.f32 %v7311_v61, %v4910_v3  ;;  %v4909_v42 = vadd.f32 %v4854_v13, %v4628_v32 }
 0x43f   : > { %v7234_v22 = vpop.f32.mrf.mxu0  ;;  %v4633_v61 = vadd.f32 %v10670_v21, %v4247_v9 }
 0x440   : > { %5292 = vst [vmem:[%s9995_s11 + $0xc8] sm:$0xff] %v5260_v15  ;;  %v5259_v57 = vadd.f32 %v5227_v19, %v10669_v30  ;;  %v5230_v16 = vadd.f32 %v9979_v18, %v5191_v27  ;;  %v5190_v37 = vadd.f32 %v5135_v49, %v4909_v42  ;;  %v4912_v63 = vadd.f32 %v7234_v22, %v4631_v47 }
 0x441   : > { %v4864_v33 = vpop.f32.mrf.mxu0 }
 0x442   : > { %5291 = vst [vmem:[%s9995_s11 + $0xc0] sm:$0xff] %v5259_v57  ;;  %v5262_v44 = vadd.f32 %v5230_v16, %v10671_v36  ;;  %v5229_v58 = vadd.f32 %v9979_v18, %v5190_v37  ;;  %v5193_v17 = vadd.f32 %v7314_v25, %v4912_v63  ;;  %v4911_v39 = vadd.f32 %v4864_v33, %v4630_v40  ;;  %v10677_v25 = vld [vmem:[#allocation18_spill] sm:$0xff] }
 0x443   : > { %v7237_v59 = vpop.f32.mrf.mxu0 }
 0x444   : > { %5294 = vst [vmem:[%s9995_s11 + $0xd8] sm:$0xff] %v5262_v44  ;;  %v5261_v49 = vadd.f32 %v5229_v58, %v10673_v28  ;;  %v5232_v54 = vadd.f32 %v9979_v18, %v5193_v17  ;;  %v5192_v14 = vadd.f32 %v5145_v51, %v4911_v39  ;;  %v4914_v6 = vadd.f32 %v7237_v59, %v4633_v61 }
 0x445   : > { %v4874_v20 = vpop.f32.mrf.mxu0 }
 0x446   : > { %5293 = vst [vmem:[%s9995_s11 + $0xd0] sm:$0xff] %v5261_v49  ;;  %v5264_v50 = vadd.f32 %v5232_v54, %v10674_v60  ;;  %v5231_v24 = vadd.f32 %v9979_v18, %v5192_v14  ;;  %v5195_v52 = vadd.f32 %v7317_v45, %v4914_v6  ;;  %v4913_v26 = vadd.f32 %v4874_v20, %v4632_v12 }
 0x448   : > { %5296 = vst [vmem:[%s9995_s11 + $0xe8] sm:$0xff] %v5264_v50  ;;  %v5263_v41 = vadd.f32 %v5231_v24, %v10675_v34  ;;  %v5234_v62 = vadd.f32 %v9979_v18, %v5195_v52  ;;  %v5194_v11 = vadd.f32 %v5155_v29, %v4913_v26 }
 0x44a   : > { %5295 = vst [vmem:[%s9995_s11 + $0xe0] sm:$0xff] %v5263_v41  ;;  %v5266_v4 = vadd.f32 %v5234_v62, %v10676_v55  ;;  %v5233_v35 = vadd.f32 %v9979_v18, %v5194_v11 }
 0x44c   : > { %5298 = vst [vmem:[%s9995_s11 + $0xf8] sm:$0xff] %v5266_v4  ;;  %v5265_v56 = vadd.f32 %v5233_v35, %v10677_v25 }
 0x44e   : > { %5297 = vst [vmem:[%s9995_s11 + $0xf0] sm:$0xff] %v5265_v56 }
 0x44f   : > { %7545 = shalt.err (!%p7542_p10)
}
 0x450   : > { %s7546_s29 = scalar_lea.hbm %s10166_s14, 4096  ;;  %s7550_s19 = scalar_lea.hbm %s10225_s6, 8192 }
 0x451   : > { %p7547_p7 = scmp.ne.s32.totalorder %s10166_s14, %s7546_s29  ;;  %p7551_p9 = scmp.lt.s32.totalorder %s10166_s14, %s10225_s6 }
 0x452   : > { %p7552_p0 = scmp.lt.s32.totalorder %s7550_s19, %s7546_s29 }
 0x453   : > { %p7548_p6 = pnand %p7547_p7, %p7776_p13 }
 0x454   : > { %p7553_p3 = por %p7552_p0, %p7551_p9 }
 0x455   : > { %p7549_p12 = pneg %p7548_p6 }
 0x457   : > { %p7554_p1 = pnand %p7553_p3, %p7549_p12 }
 0x459   : > { %7557 = shalt.err (!%p7554_p1)
}
 0x45a   : > { %s7630_s13 = smov 128   ;;  %s7631_s11 = smov 8  }
 0x45b   : > { %7335 = dma.vmem_to_hbm [thread:$0]  (%p7776_p13), %s10168_s17, 4096, %s10166_s14, %s5300_s24, %s7630_s13, %s7630_s13, %s7631_s11  }
 0x45c PF: > { %s5331_s15 = sand.u32 1, %s7600_s21   ;;  %p10678_p4 = scmp.ne.s32.totalorder %s10304_s8, 0 }
 0x45d   : > { %p10679_p8 = scmp.ge.s32.totalorder %s7620_s26, 2  ;;  %s5332_s28 = scalar_lea.sflag [#allocation4], %s5331_s15 }
 0x45f   : > { %p7352_p5 = pnand %p10679_p8, %p10678_p4 }
 0x461   : > { %p7353_p11 = pneg %p7352_p5 }
 0x463   : > { %7595 = dma.done.wait (%p7353_p11), %s5332_s28, 4096  }
 0x464   : > { %7597 = vsyncadd (%p7353_p11), %s5332_s28, 4294963200  ;;  %s24_s26 = sadd.s32 1, %s7620_s26   ;;  %s10680_s20 = sld [smem:[#allocation15_spill]] }
 0x465   : > { %p21_p2 = scmp.ge.s32.totalorder %s24_s26, 4   ;;  %s10681_s21 = smov %s7604_s22 }
 0x466   : > { %s10682_s22 = smov %s7608_s23  ;;  %s10683_s23 = smov %s7792_s30 }
 0x467   : > { %s10684_s24 = smov %s7616_s25  ;;  %23 = sbr.rel (!%p21_p2) target bundleno = 12 (0xc), region = 112 }
 0x46a   : > { %s10685_s25 = smov %s10680_s20 }
 0x46c   :  { %5337 = vsyncpa [#allocation3], 1 }
 0x46d   :  { %5339 = vsyncpa [#allocation3 + $0x1], 1 }
 0x46e   :  { %5340 = vsyncpa [#allocation6], 1 }
 0x46f   :  { %5341 = vsyncpa [#allocation9], 1 }
 0x470   :  { %5342 = vsyncpa [#allocation4], 1 }
 0x471   :  { %5344 = vsyncpa [#allocation4 + $0x1], 1 }

</bundles_post_ra>
